<compile_context>
chip_gen: v5e
topology: v5e:2x2
jax: 0.10.0
libtpu: 0.0.40
codegen_flags: <defaults>
</compile_context>

<pallas_src>
import math

import numpy as np
import jax
import jax.numpy as jnp
from jax.experimental import pallas as pl
from jax.experimental.pallas import tpu as pltpu

# ----------------------------- model hyper-parameters -----------------------------
B = 2            # batch
S = 8            # max_seq_len (== seq length here)
D = 32           # hita_input_size (model dim)
H = 4            # hita_encoder_head_num
DPH = D // H     # dim per head
NCHUNK = D // DPH  # feature chunks per row in the quirky head view (== H)
FFN = 64         # hita_encoder_ffn_size
Q = 8            # global_query_size (== hita_time_selection_layer_global[1])
L0_ENC = 16      # hita_time_selection_layer_encoder[0]
L0_GLOB = 16     # hita_time_selection_layer_global[0]
N_LAYERS = 2     # hita_encoder_layer
MOVE_NUM = 10
POOL_OUT = 1 + Q + 2

LN_EPS = 1e-5
NEG_INF = -1e30
# HiTANet quirk (faithful to the PyTorch reference):
#   scale = (key.size(-1) // num_heads) ** -0.5 = (dph // H) ** -0.5, NOT 1/sqrt(dph).
ATTN_SCALE = float((DPH // H) ** (-0.5))


# ----------------------------------- fused kernel ----------------------------------
def _fused_kernel(
    lengths_ref,                       # SMEM [B] int32 (scalar prefetch)
    # --- inputs (VMEM) ---
    emb_ref,                           # (1, S, D)
    time_ref,                          # (1, S, 1)
    maskm_ref,                         # (1, S, 1) 1.0 where padded
    maskf_ref,                         # (1, S, 1) 1.0 at the last valid step
    pe_ref,                            # (S, D)
    asplit_ref,                        # (NCHUNK, H*S, S) 0/1 head-split selectors
    amerge_ref,                        # (NCHUNK, S, H*S) transposed selectors
    esel_w_ref, esel_b_ref,            # (1, L0_ENC)
    etime_w_ref, etime_b_ref,          # (L0_ENC, D), (1, D)
    bias_emb_ref,                      # (1, D)
    wqkv_ref, bqkv_ref,                # (L, D, 3D), (L, 1, 3D)
    wo_ref, bo_ref,                    # (L, D, D), (L, 1, D)
    ln1g_ref, ln1b_ref,                # (L, 1, D)
    w1_ref, b1_ref,                    # (L, D, FFN), (L, 1, FFN)
    w2_ref, b2_ref,                    # (L, FFN, D), (L, 1, D)
    ln2g_ref, ln2b_ref,                # (L, 1, D)
    gsel_w_ref, gsel_b_ref,            # (1, L0_GLOB)
    gw_w_ref, gw_b_ref,                # (L0_GLOB, Q), (1, Q)
    pool_w_ref, pool_b_ref,            # (D, 1+Q+2), (1, 1+Q+2)
    # --- outputs ---
    avg_ref,                           # (1, 1, D)
    selfw_ref,                         # (1, S, 1)
):
    bi = pl.program_id(0)
    length_b = lengths_ref[bi]

    row_idx = jax.lax.broadcasted_iota(jnp.int32, (S, 1), 0)          # [S,1]
    valid = (row_idx < length_b).astype(jnp.float32)                  # [S,1]
    col_key = jax.lax.broadcasted_iota(jnp.int32, (S, S), 1)          # key index per column

    t = time_ref[0]                                                   # [S,1]
    emb = emb_ref[0]                                                  # [S,D]

    # --- encoder time feature: time_layer(1 - tanh(selection_layer(t)^2))
    sel = t * esel_w_ref[...] + esel_b_ref[...]                       # [S, L0_ENC]
    sel = 1.0 - jnp.tanh(sel * sel)
    tfeat = jnp.dot(sel, etime_w_ref[...],
                    preferred_element_type=jnp.float32) + etime_b_ref[...]     # [S, D]

    # --- positional encoding (PE row s for valid positions, zero row for padding)
    pos = pe_ref[...] * valid                                         # [S, D]

    x = emb + bias_emb_ref[...] + tfeat + pos                         # [S, D]

    def layer_norm(h, g, beta):
        mu = jnp.mean(h, axis=-1, keepdims=True)
        var = jnp.mean((h - mu) * (h - mu), axis=-1, keepdims=True)
        return (h - mu) * jax.lax.rsqrt(var + LN_EPS) * g + beta

    # Faithful torch .view(B*H, -1, dph) head split, expressed as selection matmuls
    # (avoids lane-changing reshapes): heads_flat[R,k] = y[R//H, (R%H)*dph + k].
    def head_split(y):                                                # [S,D] -> [H*S,DPH]
        acc = jnp.dot(asplit_ref[0], y[:, 0:DPH],
                      preferred_element_type=jnp.float32)
        for c in range(1, NCHUNK):
            acc = acc + jnp.dot(asplit_ref[c], y[:, c * DPH:(c + 1) * DPH],
                                preferred_element_type=jnp.float32)
        return acc

    def head_merge(y):                                                # [H*S,DPH] -> [S,D]
        cols = [jnp.dot(amerge_ref[c], y, preferred_element_type=jnp.float32)
                for c in range(NCHUNK)]
        return jnp.concatenate(cols, axis=1)

    for l in range(N_LAYERS):
        residual = x
        qkv = jnp.dot(x, wqkv_ref[l],
                      preferred_element_type=jnp.float32) + bqkv_ref[l]        # [S, 3D]
        qf = head_split(qkv[:, 0:D] * ATTN_SCALE)                              # [H*S, DPH]
        kf = head_split(qkv[:, D:2 * D])
        vf = head_split(qkv[:, 2 * D:3 * D])

        ctx_blocks = []
        for h in range(H):
            qh = qf[h * S:(h + 1) * S, :]                                      # [S, DPH]
            kh = kf[h * S:(h + 1) * S, :]
            vh = vf[h * S:(h + 1) * S, :]
            scores = jax.lax.dot_general(qh, kh, (((1,), (1,)), ((), ())),
                                         preferred_element_type=jnp.float32)  # [S, S]
            # torch quirk: data chunk (b, h) is masked with mask[(b*H + h) % B]
            mlen = lengths_ref[(bi * H + h) % B]
            scores = jnp.where(col_key >= mlen, NEG_INF, scores)
            smax = jnp.max(scores, axis=-1, keepdims=True)
            p = jnp.exp(scores - smax)
            p = p * pl.reciprocal(jnp.sum(p, axis=-1, keepdims=True), approx=True)
            ctx_blocks.append(jnp.dot(p, vh, preferred_element_type=jnp.float32))
        ctx = head_merge(jnp.concatenate(ctx_blocks, axis=0))                  # [S, D]

        attn_out = jnp.dot(ctx, wo_ref[l],
                           preferred_element_type=jnp.float32) + bo_ref[l]
        x = layer_norm(residual + attn_out, ln1g_ref[l], ln1b_ref[l])

        # position-wise FFN (Conv1d kernel_size=1 == feature-dim matmul)
        hmid = jnp.maximum(jnp.dot(x, w1_ref[l],
                                   preferred_element_type=jnp.float32) + b1_ref[l], 0.0)
        ffn = jnp.dot(hmid, w2_ref[l],
                      preferred_element_type=jnp.float32) + b2_ref[l]
        x = layer_norm(x + ffn, ln2g_ref[l], ln2b_ref[l])

    features = x                                                               # [S, D]

    # --- global TimeEncoder features: relu(weight_layer(1 - tanh(selection_layer(t)^2)))
    gsel = t * gsel_w_ref[...] + gsel_b_ref[...]
    gsel = 1.0 - jnp.tanh(gsel * gsel)
    tsel = jnp.maximum(jnp.dot(gsel, gw_w_ref[...],
                               preferred_element_type=jnp.float32) + gw_b_ref[...], 0.0)  # [S,Q]

    mm = maskm_ref[0]                                                          # [S,1]
    mf = maskf_ref[0]                                                          # [S,1]
    masked = mm > 0.5

    # --- concatenated pooling head: columns = [self(1) | quiry(Q) | quiry_weight(2)]
    pb = pool_b_ref[...]                                                       # [1, 11]
    feat_logits = jnp.dot(features, pool_w_ref[...],
                          preferred_element_type=jnp.float32)                  # [S, 11] (no bias)
    fs_logits = jnp.sum(feat_logits * mf, axis=0, keepdims=True) + pb          # [1, 11]

    self_logit = feat_logits[:, 0:1] + pb[:, 0:1]                              # [S,1]
    quiry = jnp.maximum(fs_logits[:, 1:1 + Q], 0.0)                            # [1,Q]
    aw_logit = fs_logits[:, 1 + Q:1 + Q + 2]                                   # [1,2]

    # self-attention weight: softmax over sequence
    self_logit = jnp.where(masked, NEG_INF, self_logit)
    sw = jnp.exp(self_logit - jnp.max(self_logit, axis=0, keepdims=True))
    sw = sw * pl.reciprocal(jnp.sum(sw, axis=0, keepdims=True), approx=True)   # [S,1]

    # time weight: softmax over sequence of <time_feature, query>/sqrt(Q)
    t_logit = jnp.sum(tsel * quiry, axis=-1, keepdims=True) * (1.0 / math.sqrt(Q))
    t_logit = jnp.where(masked, NEG_INF, t_logit)
    tw = jnp.exp(t_logit - jnp.max(t_logit, axis=0, keepdims=True))
    tw = tw * pl.reciprocal(jnp.sum(tw, axis=0, keepdims=True), approx=True)   # [S,1]

    # attention over (time_weight, self_weight)
    aw = jnp.exp(aw_logit - jnp.max(aw_logit, axis=-1, keepdims=True))
    aw = aw * pl.reciprocal(jnp.sum(aw, axis=-1, keepdims=True), approx=True)  # [1,2]

    total = tw * aw[:, 0:1] + sw * aw[:, 1:2]                                  # [S,1]
    total = total * pl.reciprocal(jnp.sum(total, axis=0, keepdims=True) + 1e-5,
                                  approx=True)

    avg_ref[...] = jnp.sum(features * total, axis=0, keepdims=True)[None]      # (1,1,D)
    selfw_ref[...] = sw[None]                                                  # (1,S,1)


# ------------------------------- wrapper (one launch) -------------------------------
def transformer_time_forward(params, seq_emb, seq_time, mask_mult, mask_final, lengths):
    b, s, d = seq_emb.shape
    mask_mult_f = mask_mult.astype(jnp.float32)
    mask_final_f = mask_final.astype(jnp.float32)

    def fixed(ndim):
        return lambda i, L: (0,) * ndim

    def per_batch(ndim):
        return lambda i, L: (i,) + (0,) * (ndim - 1)

    grid_spec = pltpu.PrefetchScalarGridSpec(
        num_scalar_prefetch=1,
        grid=(b,),
        in_specs=[
            pl.BlockSpec((1, s, d), per_batch(3)),                      # seq_emb
            pl.BlockSpec((1, s, 1), per_batch(3)),                      # seq_time
            pl.BlockSpec((1, s, 1), per_batch(3)),                      # mask_mult
            pl.BlockSpec((1, s, 1), per_batch(3)),                      # mask_final
            pl.BlockSpec((s, d), fixed(2)),                             # pe_rows
            pl.BlockSpec((NCHUNK, H * s, s), fixed(3)),                 # a_split
            pl.BlockSpec((NCHUNK, s, H * s), fixed(3)),                 # a_merge
            pl.BlockSpec((1, L0_ENC), fixed(2)),                        # enc_sel_w
            pl.BlockSpec((1, L0_ENC), fixed(2)),                        # enc_sel_b
            pl.BlockSpec((L0_ENC, d), fixed(2)),                        # enc_time_w
            pl.BlockSpec((1, d), fixed(2)),                             # enc_time_b
            pl.BlockSpec((1, d), fixed(2)),                             # bias_embedding
            pl.BlockSpec((N_LAYERS, d, 3 * d), fixed(3)),               # wqkv
            pl.BlockSpec((N_LAYERS, 1, 3 * d), fixed(3)),               # bqkv
            pl.BlockSpec((N_LAYERS, d, d), fixed(3)),                   # wo
            pl.BlockSpec((N_LAYERS, 1, d), fixed(3)),                   # bo
            pl.BlockSpec((N_LAYERS, 1, d), fixed(3)),                   # ln1_g
            pl.BlockSpec((N_LAYERS, 1, d), fixed(3)),                   # ln1_b
            pl.BlockSpec((N_LAYERS, d, FFN), fixed(3)),                 # w1
            pl.BlockSpec((N_LAYERS, 1, FFN), fixed(3)),                 # b1
            pl.BlockSpec((N_LAYERS, FFN, d), fixed(3)),                 # w2
            pl.BlockSpec((N_LAYERS, 1, d), fixed(3)),                   # b2
            pl.BlockSpec((N_LAYERS, 1, d), fixed(3)),                   # ln2_g
            pl.BlockSpec((N_LAYERS, 1, d), fixed(3)),                   # ln2_b
            pl.BlockSpec((1, L0_GLOB), fixed(2)),                       # glob_sel_w
            pl.BlockSpec((1, L0_GLOB), fixed(2)),                       # glob_sel_b
            pl.BlockSpec((L0_GLOB, Q), fixed(2)),                       # glob_weight_w
            pl.BlockSpec((1, Q), fixed(2)),                             # glob_weight_b
            pl.BlockSpec((d, POOL_OUT), fixed(2)),                      # pool_w
            pl.BlockSpec((1, POOL_OUT), fixed(2)),                      # pool_b
        ],
        out_specs=(
            pl.BlockSpec((1, 1, d), per_batch(3)),                      # averaged features
            pl.BlockSpec((1, s, 1), per_batch(3)),                      # self weight
        ),
    )

    avg, selfw = pl.pallas_call(
        _fused_kernel,
        out_shape=(jax.ShapeDtypeStruct((b, 1, d), jnp.float32),
                   jax.ShapeDtypeStruct((b, s, 1), jnp.float32)),
        grid_spec=grid_spec,
        compiler_params=pltpu.CompilerParams(
            dimension_semantics=("parallel",)),     # shard batch across TCs on v7x
    )(
        lengths.astype(jnp.int32),
        seq_emb, seq_time, mask_mult_f, mask_final_f,
        params["pe_rows"], params["a_split"], params["a_merge"],
        params["enc_sel_w"], params["enc_sel_b"],
        params["enc_time_w"], params["enc_time_b"],
        params["bias_embedding"],
        params["wqkv"], params["bqkv"], params["wo"], params["bo"],
        params["ln1_g"], params["ln1_b"],
        params["w1"], params["b1"], params["w2"], params["b2"],
        params["ln2_g"], params["ln2_b"],
        params["glob_sel_w"], params["glob_sel_b"],
        params["glob_weight_w"], params["glob_weight_b"],
        params["pool_w"], params["pool_b"],
    )
    return avg[:, 0, :], selfw


# --------------------------------- parameter init ----------------------------------
def init_params(key):
    keys = iter(jax.random.split(key, 64))

    def lin(fan_in, fan_out):
        k1, k2 = jax.random.split(next(keys))
        bound = 1.0 / math.sqrt(fan_in)
        w = jax.random.uniform(k1, (fan_in, fan_out), jnp.float32, -bound, bound)
        b = jax.random.uniform(k2, (1, fan_out), jnp.float32, -bound, bound)
        return w, b

    p = {}
    # EncoderNew: selection / time layers, bias embedding
    p["enc_sel_w"], p["enc_sel_b"] = lin(1, L0_ENC)
    p["enc_time_w"], p["enc_time_b"] = lin(L0_ENC, D)
    bound = 1.0 / math.sqrt(MOVE_NUM)
    p["bias_embedding"] = jax.random.uniform(next(keys), (1, D), jnp.float32, -bound, bound)

    # positional encoding rows for positions 1..S (embedding index 0 is the zero pad row,
    # handled in-kernel by masking invalid positions)
    pe = np.array([[pos / np.power(10000, 2.0 * (j // 2) / D) for j in range(D)]
                   for pos in range(S)])
    pe[:, 0::2] = np.sin(pe[:, 0::2])
    pe[:, 1::2] = np.cos(pe[:, 1::2])
    p["pe_rows"] = jnp.asarray(pe.astype(np.float32))

    # 0/1 selection matrices that reproduce torch .view(B*H, -1, dph) row-major head split
    a_split = np.zeros((NCHUNK, H * S, S), np.float32)
    for r in range(H * S):
        a_split[r % NCHUNK, r, r // H] = 1.0          # heads_flat[r,:] = x[r//H, (r%H)*dph : ...]
    p["a_split"] = jnp.asarray(a_split)
    p["a_merge"] = jnp.asarray(np.transpose(a_split, (0, 2, 1)))

    # transformer layers, weights stacked along a leading layer axis
    wqkv, bqkv, wo, bo = [], [], [], []
    ln1_g, ln1_b, w1, b1, w2, b2, ln2_g, ln2_b = [], [], [], [], [], [], [], []
    for _ in range(N_LAYERS):
        wq, bq = lin(D, D)
        wk, bk = lin(D, D)
        wv, bv = lin(D, D)
        wqkv.append(jnp.concatenate([wq, wk, wv], axis=1))   # [D, 3D]
        bqkv.append(jnp.concatenate([bq, bk, bv], axis=1))   # [1, 3D]
        w, bb = lin(D, D);   wo.append(w);  bo.append(bb)
        ln1_g.append(jnp.ones((1, D), jnp.float32)); ln1_b.append(jnp.zeros((1, D), jnp.float32))
        w, bb = lin(D, FFN); w1.append(w);  b1.append(bb)    # Conv1d(D, FFN, 1)
        w, bb = lin(FFN, D); w2.append(w);  b2.append(bb)    # Conv1d(FFN, D, 1)
        ln2_g.append(jnp.ones((1, D), jnp.float32)); ln2_b.append(jnp.zeros((1, D), jnp.float32))
    p["wqkv"], p["bqkv"] = jnp.stack(wqkv), jnp.stack(bqkv)
    p["wo"], p["bo"] = jnp.stack(wo), jnp.stack(bo)
    p["ln1_g"], p["ln1_b"] = jnp.stack(ln1_g), jnp.stack(ln1_b)
    p["w1"], p["b1"] = jnp.stack(w1), jnp.stack(b1)
    p["w2"], p["b2"] = jnp.stack(w2), jnp.stack(b2)
    p["ln2_g"], p["ln2_b"] = jnp.stack(ln2_g), jnp.stack(ln2_b)

    # TimeEncoder (global)
    p["glob_sel_w"], p["glob_sel_b"] = lin(1, L0_GLOB)
    p["glob_weight_w"], p["glob_weight_b"] = lin(L0_GLOB, Q)

    # TransformerTime pooling heads, concatenated: [self(1) | quiry(Q) | quiry_weight(2)]
    self_w, self_b = lin(D, 1)
    quiry_w, quiry_b = lin(D, Q)
    qw_w, qw_b = lin(D, 2)
    p["pool_w"] = jnp.concatenate([self_w, quiry_w, qw_w], axis=1)   # [D, 1+Q+2]
    p["pool_b"] = jnp.concatenate([self_b, quiry_b, qw_b], axis=1)   # [1, 1+Q+2]
    return p


# -------------------------------------- main ---------------------------------------
if __name__ == "__main__":
    root = jax.random.PRNGKey(0)
    k_param, k_emb, k_time = jax.random.split(root, 3)
    params = init_params(k_param)

    sequence_embedding = jax.random.normal(k_emb, (B, S, D), jnp.float32)
    seq_time_step = jax.random.uniform(k_time, (B, S, 1), jnp.float32, 0.0, 10.0)
    lengths = jnp.array([8, 5], dtype=jnp.int32)

    t = jnp.arange(S)
    mask_mult = (t[None, :, None] >= lengths[:, None, None])                             # [B,S,1] True = padded
    mask_final = (t[None, :, None] == (lengths[:, None, None] - 1)).astype(jnp.float32)  # [B,S,1]

    fwd = jax.jit(transformer_time_forward)
    averaged_features, self_weight = fwd(params, sequence_embedding, seq_time_step,
                                         mask_mult, mask_final, lengths)
    jax.block_until_ready((averaged_features, self_weight))

    assert averaged_features.shape == (B, D)
    assert self_weight.shape == (B, S, 1)
    assert bool(np.all(np.isfinite(np.asarray(averaged_features))))
    assert bool(np.all(np.isfinite(np.asarray(self_weight))))
    # TODO(synk): dropout layers are treated as identity (eval mode / p=0), matching inference semantics.
    print("KERNEL_OK")
</pallas_src>

<mosaic_0001>
module attributes {stable_mosaic.version = 11 : i64} {
  func.func @_fused_kernel(%arg0: i32, %arg1: memref<2xi32, #tpu.memory_space<smem>>, %arg2: memref<1x8x32xf32, #tpu.memory_space<vmem>>, %arg3: memref<1x8x1xf32, #tpu.memory_space<vmem>>, %arg4: memref<1x8x1xf32, #tpu.memory_space<vmem>>, %arg5: memref<1x8x1xf32, #tpu.memory_space<vmem>>, %arg6: memref<8x32xf32, #tpu.memory_space<vmem>>, %arg7: memref<4x32x8xf32, #tpu.memory_space<vmem>>, %arg8: memref<4x8x32xf32, #tpu.memory_space<vmem>>, %arg9: memref<1x16xf32, #tpu.memory_space<vmem>>, %arg10: memref<1x16xf32, #tpu.memory_space<vmem>>, %arg11: memref<16x32xf32, #tpu.memory_space<vmem>>, %arg12: memref<1x32xf32, #tpu.memory_space<vmem>>, %arg13: memref<1x32xf32, #tpu.memory_space<vmem>>, %arg14: memref<2x32x96xf32, #tpu.memory_space<vmem>>, %arg15: memref<2x1x96xf32, #tpu.memory_space<vmem>>, %arg16: memref<2x32x32xf32, #tpu.memory_space<vmem>>, %arg17: memref<2x1x32xf32, #tpu.memory_space<vmem>>, %arg18: memref<2x1x32xf32, #tpu.memory_space<vmem>>, %arg19: memref<2x1x32xf32, #tpu.memory_space<vmem>>, %arg20: memref<2x32x64xf32, #tpu.memory_space<vmem>>, %arg21: memref<2x1x64xf32, #tpu.memory_space<vmem>>, %arg22: memref<2x64x32xf32, #tpu.memory_space<vmem>>, %arg23: memref<2x1x32xf32, #tpu.memory_space<vmem>>, %arg24: memref<2x1x32xf32, #tpu.memory_space<vmem>>, %arg25: memref<2x1x32xf32, #tpu.memory_space<vmem>>, %arg26: memref<1x16xf32, #tpu.memory_space<vmem>>, %arg27: memref<1x16xf32, #tpu.memory_space<vmem>>, %arg28: memref<16x8xf32, #tpu.memory_space<vmem>>, %arg29: memref<1x8xf32, #tpu.memory_space<vmem>>, %arg30: memref<32x11xf32, #tpu.memory_space<vmem>>, %arg31: memref<1x11xf32, #tpu.memory_space<vmem>>, %arg32: memref<1x1x32xf32, #tpu.memory_space<vmem>>, %arg33: memref<1x8x1xf32, #tpu.memory_space<vmem>>) attributes {dimension_semantics = [#tpu.dimension_semantics<parallel>], iteration_bounds = array<i64: 2>, scalar_prefetch = 1 : i64, scratch_operands = 0 : i64, tpu.core_type = #tpu.core_type<tc>, window_params = [{transform_indices = @transform_0, window_bounds = array<i64: 1, 8, 32>}, {transform_indices = @transform_1, window_bounds = array<i64: 1, 8, 1>}, {transform_indices = @transform_2, window_bounds = array<i64: 1, 8, 1>}, {transform_indices = @transform_3, window_bounds = array<i64: 1, 8, 1>}, {pipeline_mode = #tpu.pipeline_mode<synchronous>, transform_indices = @transform_4, window_bounds = array<i64: 8, 32>}, {pipeline_mode = #tpu.pipeline_mode<synchronous>, transform_indices = @transform_5, window_bounds = array<i64: 4, 32, 8>}, {pipeline_mode = #tpu.pipeline_mode<synchronous>, transform_indices = @transform_6, window_bounds = array<i64: 4, 8, 32>}, {pipeline_mode = #tpu.pipeline_mode<synchronous>, transform_indices = @transform_7, window_bounds = array<i64: 1, 16>}, {pipeline_mode = #tpu.pipeline_mode<synchronous>, transform_indices = @transform_8, window_bounds = array<i64: 1, 16>}, {pipeline_mode = #tpu.pipeline_mode<synchronous>, transform_indices = @transform_9, window_bounds = array<i64: 16, 32>}, {pipeline_mode = #tpu.pipeline_mode<synchronous>, transform_indices = @transform_10, window_bounds = array<i64: 1, 32>}, {pipeline_mode = #tpu.pipeline_mode<synchronous>, transform_indices = @transform_11, window_bounds = array<i64: 1, 32>}, {pipeline_mode = #tpu.pipeline_mode<synchronous>, transform_indices = @transform_12, window_bounds = array<i64: 2, 32, 96>}, {pipeline_mode = #tpu.pipeline_mode<synchronous>, transform_indices = @transform_13, window_bounds = array<i64: 2, 1, 96>}, {pipeline_mode = #tpu.pipeline_mode<synchronous>, transform_indices = @transform_14, window_bounds = array<i64: 2, 32, 32>}, {pipeline_mode = #tpu.pipeline_mode<synchronous>, transform_indices = @transform_15, window_bounds = array<i64: 2, 1, 32>}, {pipeline_mode = #tpu.pipeline_mode<synchronous>, transform_indices = @transform_16, window_bounds = array<i64: 2, 1, 32>}, {pipeline_mode = #tpu.pipeline_mode<synchronous>, transform_indices = @transform_17, window_bounds = array<i64: 2, 1, 32>}, {pipeline_mode = #tpu.pipeline_mode<synchronous>, transform_indices = @transform_18, window_bounds = array<i64: 2, 32, 64>}, {pipeline_mode = #tpu.pipeline_mode<synchronous>, transform_indices = @transform_19, window_bounds = array<i64: 2, 1, 64>}, {pipeline_mode = #tpu.pipeline_mode<synchronous>, transform_indices = @transform_20, window_bounds = array<i64: 2, 64, 32>}, {pipeline_mode = #tpu.pipeline_mode<synchronous>, transform_indices = @transform_21, window_bounds = array<i64: 2, 1, 32>}, {pipeline_mode = #tpu.pipeline_mode<synchronous>, transform_indices = @transform_22, window_bounds = array<i64: 2, 1, 32>}, {pipeline_mode = #tpu.pipeline_mode<synchronous>, transform_indices = @transform_23, window_bounds = array<i64: 2, 1, 32>}, {pipeline_mode = #tpu.pipeline_mode<synchronous>, transform_indices = @transform_24, window_bounds = array<i64: 1, 16>}, {pipeline_mode = #tpu.pipeline_mode<synchronous>, transform_indices = @transform_25, window_bounds = array<i64: 1, 16>}, {pipeline_mode = #tpu.pipeline_mode<synchronous>, transform_indices = @transform_26, window_bounds = array<i64: 16, 8>}, {pipeline_mode = #tpu.pipeline_mode<synchronous>, transform_indices = @transform_27, window_bounds = array<i64: 1, 8>}, {pipeline_mode = #tpu.pipeline_mode<synchronous>, transform_indices = @transform_28, window_bounds = array<i64: 32, 11>}, {pipeline_mode = #tpu.pipeline_mode<synchronous>, transform_indices = @transform_29, window_bounds = array<i64: 1, 11>}, {transform_indices = @transform_30, window_bounds = array<i64: 1, 1, 32>}, {transform_indices = @transform_31, window_bounds = array<i64: 1, 8, 1>}]} {
    %0 = arith.index_cast %arg0 : i32 to index
    %1 = memref.load %arg1[%0] : memref<2xi32, #tpu.memory_space<smem>>
    %2 = tpu.iota {dimensions = array<i32: 0>} : vector<8x1xi32>
    %3 = vector.broadcast %1 : i32 to vector<8x1xi32>
    %4 = arith.cmpi slt, %2, %3 : vector<8x1xi32>
    %5 = arith.extui %4 : vector<8x1xi1> to vector<8x1xi32>
    %6 = arith.sitofp %5 : vector<8x1xi32> to vector<8x1xf32>
    %7 = tpu.iota {dimensions = array<i32: 1>} : vector<8x8xi32>
    %c0 = arith.constant 0 : index
    %c0_0 = arith.constant 0 : index
    %c0_1 = arith.constant 0 : index
    %8 = vector.load %arg3[%c0, %c0_0, %c0_1] : memref<1x8x1xf32, #tpu.memory_space<vmem>>, vector<1x8x1xf32>
    %9 = vector.shape_cast %8 : vector<1x8x1xf32> to vector<8x1xf32>
    %c0_2 = arith.constant 0 : index
    %c0_3 = arith.constant 0 : index
    %c0_4 = arith.constant 0 : index
    %10 = vector.load %arg2[%c0_2, %c0_3, %c0_4] : memref<1x8x32xf32, #tpu.memory_space<vmem>>, vector<1x8x32xf32>
    %11 = vector.shape_cast %10 : vector<1x8x32xf32> to vector<8x32xf32>
    %c0_5 = arith.constant 0 : index
    %c0_6 = arith.constant 0 : index
    %12 = vector.load %arg9[%c0_5, %c0_6] : memref<1x16xf32, #tpu.memory_space<vmem>>, vector<1x16xf32>
    %13 = vector.broadcast %9 : vector<8x1xf32> to vector<8x16xf32>
    %14 = vector.broadcast %12 : vector<1x16xf32> to vector<8x16xf32>
    %15 = arith.mulf %13, %14 : vector<8x16xf32>
    %c0_7 = arith.constant 0 : index
    %c0_8 = arith.constant 0 : index
    %16 = vector.load %arg10[%c0_7, %c0_8] : memref<1x16xf32, #tpu.memory_space<vmem>>, vector<1x16xf32>
    %17 = vector.broadcast %16 : vector<1x16xf32> to vector<8x16xf32>
    %18 = arith.addf %15, %17 : vector<8x16xf32>
    %19 = arith.mulf %18, %18 : vector<8x16xf32>
    %20 = math.tanh %19 : vector<8x16xf32>
    %cst = arith.constant 1.000000e+00 : f32
    %21 = vector.broadcast %cst : f32 to vector<8x16xf32>
    %22 = arith.subf %21, %20 : vector<8x16xf32>
    %c0_9 = arith.constant 0 : index
    %c0_10 = arith.constant 0 : index
    %23 = vector.load %arg11[%c0_9, %c0_10] : memref<16x32xf32, #tpu.memory_space<vmem>>, vector<16x32xf32>
    %cst_11 = arith.constant dense<0.000000e+00> : vector<8x32xf32>
    %24 = tpu.matmul %22, %23, %cst_11 {dimension_numbers = #tpu.dot_dimension_numbers<[1], [0], [0], [1], [0, 0, 1, 1], [], []>} : vector<8x16xf32>, vector<16x32xf32>, vector<8x32xf32> -> vector<8x32xf32>
    %c0_12 = arith.constant 0 : index
    %c0_13 = arith.constant 0 : index
    %25 = vector.load %arg12[%c0_12, %c0_13] : memref<1x32xf32, #tpu.memory_space<vmem>>, vector<1x32xf32>
    %26 = vector.broadcast %25 : vector<1x32xf32> to vector<8x32xf32>
    %27 = arith.addf %24, %26 : vector<8x32xf32>
    %c0_14 = arith.constant 0 : index
    %c0_15 = arith.constant 0 : index
    %28 = vector.load %arg6[%c0_14, %c0_15] : memref<8x32xf32, #tpu.memory_space<vmem>>, vector<8x32xf32>
    %29 = vector.broadcast %6 : vector<8x1xf32> to vector<8x32xf32>
    %30 = arith.mulf %28, %29 : vector<8x32xf32>
    %c0_16 = arith.constant 0 : index
    %c0_17 = arith.constant 0 : index
    %31 = vector.load %arg13[%c0_16, %c0_17] : memref<1x32xf32, #tpu.memory_space<vmem>>, vector<1x32xf32>
    %32 = vector.broadcast %31 : vector<1x32xf32> to vector<8x32xf32>
    %33 = arith.addf %11, %32 : vector<8x32xf32>
    %34 = arith.addf %33, %27 : vector<8x32xf32>
    %35 = arith.addf %34, %30 : vector<8x32xf32>
    %c0_18 = arith.constant 0 : index
    %c0_19 = arith.constant 0 : index
    %c0_20 = arith.constant 0 : index
    %36 = vector.load %arg14[%c0_18, %c0_19, %c0_20] : memref<2x32x96xf32, #tpu.memory_space<vmem>>, vector<1x32x96xf32>
    %37 = vector.shape_cast %36 : vector<1x32x96xf32> to vector<32x96xf32>
    %cst_21 = arith.constant dense<0.000000e+00> : vector<8x96xf32>
    %38 = tpu.matmul %35, %37, %cst_21 {dimension_numbers = #tpu.dot_dimension_numbers<[1], [0], [0], [1], [0, 0, 1, 1], [], []>} : vector<8x32xf32>, vector<32x96xf32>, vector<8x96xf32> -> vector<8x96xf32>
    %c0_22 = arith.constant 0 : index
    %c0_23 = arith.constant 0 : index
    %c0_24 = arith.constant 0 : index
    %39 = vector.load %arg15[%c0_22, %c0_23, %c0_24] : memref<2x1x96xf32, #tpu.memory_space<vmem>>, vector<1x1x96xf32>
    %40 = vector.shape_cast %39 : vector<1x1x96xf32> to vector<1x96xf32>
    %41 = vector.broadcast %40 : vector<1x96xf32> to vector<8x96xf32>
    %42 = arith.addf %38, %41 : vector<8x96xf32>
    %43 = vector.extract_strided_slice %42 {offsets = [0, 0], sizes = [8, 32], strides = [1, 1]} : vector<8x96xf32> to vector<8x32xf32>
    %cst_25 = arith.constant 0.707106769 : f32
    %44 = vector.broadcast %cst_25 : f32 to vector<8x32xf32>
    %45 = arith.mulf %43, %44 : vector<8x32xf32>
    %c0_26 = arith.constant 0 : index
    %c0_27 = arith.constant 0 : index
    %c0_28 = arith.constant 0 : index
    %46 = vector.load %arg7[%c0_26, %c0_27, %c0_28] : memref<4x32x8xf32, #tpu.memory_space<vmem>>, vector<1x32x8xf32>
    %47 = vector.shape_cast %46 : vector<1x32x8xf32> to vector<32x8xf32>
    %48 = vector.extract_strided_slice %45 {offsets = [0, 0], sizes = [8, 8], strides = [1, 1]} : vector<8x32xf32> to vector<8x8xf32>
    %cst_29 = arith.constant dense<0.000000e+00> : vector<32x8xf32>
    %49 = tpu.matmul %47, %48, %cst_29 {dimension_numbers = #tpu.dot_dimension_numbers<[1], [0], [0], [1], [0, 0, 1, 1], [], []>} : vector<32x8xf32>, vector<8x8xf32>, vector<32x8xf32> -> vector<32x8xf32>
    %c1 = arith.constant 1 : index
    %c0_30 = arith.constant 0 : index
    %c0_31 = arith.constant 0 : index
    %50 = vector.load %arg7[%c1, %c0_30, %c0_31] : memref<4x32x8xf32, #tpu.memory_space<vmem>>, vector<1x32x8xf32>
    %51 = vector.shape_cast %50 : vector<1x32x8xf32> to vector<32x8xf32>
    %52 = vector.extract_strided_slice %45 {offsets = [0, 8], sizes = [8, 8], strides = [1, 1]} : vector<8x32xf32> to vector<8x8xf32>
    %cst_32 = arith.constant dense<0.000000e+00> : vector<32x8xf32>
    %53 = tpu.matmul %51, %52, %cst_32 {dimension_numbers = #tpu.dot_dimension_numbers<[1], [0], [0], [1], [0, 0, 1, 1], [], []>} : vector<32x8xf32>, vector<8x8xf32>, vector<32x8xf32> -> vector<32x8xf32>
    %54 = arith.addf %49, %53 : vector<32x8xf32>
    %c2 = arith.constant 2 : index
    %c0_33 = arith.constant 0 : index
    %c0_34 = arith.constant 0 : index
    %55 = vector.load %arg7[%c2, %c0_33, %c0_34] : memref<4x32x8xf32, #tpu.memory_space<vmem>>, vector<1x32x8xf32>
    %56 = vector.shape_cast %55 : vector<1x32x8xf32> to vector<32x8xf32>
    %57 = vector.extract_strided_slice %45 {offsets = [0, 16], sizes = [8, 8], strides = [1, 1]} : vector<8x32xf32> to vector<8x8xf32>
    %cst_35 = arith.constant dense<0.000000e+00> : vector<32x8xf32>
    %58 = tpu.matmul %56, %57, %cst_35 {dimension_numbers = #tpu.dot_dimension_numbers<[1], [0], [0], [1], [0, 0, 1, 1], [], []>} : vector<32x8xf32>, vector<8x8xf32>, vector<32x8xf32> -> vector<32x8xf32>
    %59 = arith.addf %54, %58 : vector<32x8xf32>
    %c3 = arith.constant 3 : index
    %c0_36 = arith.constant 0 : index
    %c0_37 = arith.constant 0 : index
    %60 = vector.load %arg7[%c3, %c0_36, %c0_37] : memref<4x32x8xf32, #tpu.memory_space<vmem>>, vector<1x32x8xf32>
    %61 = vector.shape_cast %60 : vector<1x32x8xf32> to vector<32x8xf32>
    %62 = vector.extract_strided_slice %45 {offsets = [0, 24], sizes = [8, 8], strides = [1, 1]} : vector<8x32xf32> to vector<8x8xf32>
    %cst_38 = arith.constant dense<0.000000e+00> : vector<32x8xf32>
    %63 = tpu.matmul %61, %62, %cst_38 {dimension_numbers = #tpu.dot_dimension_numbers<[1], [0], [0], [1], [0, 0, 1, 1], [], []>} : vector<32x8xf32>, vector<8x8xf32>, vector<32x8xf32> -> vector<32x8xf32>
    %64 = arith.addf %59, %63 : vector<32x8xf32>
    %65 = vector.extract_strided_slice %42 {offsets = [0, 32], sizes = [8, 32], strides = [1, 1]} : vector<8x96xf32> to vector<8x32xf32>
    %c0_39 = arith.constant 0 : index
    %c0_40 = arith.constant 0 : index
    %c0_41 = arith.constant 0 : index
    %66 = vector.load %arg7[%c0_39, %c0_40, %c0_41] : memref<4x32x8xf32, #tpu.memory_space<vmem>>, vector<1x32x8xf32>
    %67 = vector.shape_cast %66 : vector<1x32x8xf32> to vector<32x8xf32>
    %68 = vector.extract_strided_slice %65 {offsets = [0, 0], sizes = [8, 8], strides = [1, 1]} : vector<8x32xf32> to vector<8x8xf32>
    %cst_42 = arith.constant dense<0.000000e+00> : vector<32x8xf32>
    %69 = tpu.matmul %67, %68, %cst_42 {dimension_numbers = #tpu.dot_dimension_numbers<[1], [0], [0], [1], [0, 0, 1, 1], [], []>} : vector<32x8xf32>, vector<8x8xf32>, vector<32x8xf32> -> vector<32x8xf32>
    %c1_43 = arith.constant 1 : index
    %c0_44 = arith.constant 0 : index
    %c0_45 = arith.constant 0 : index
    %70 = vector.load %arg7[%c1_43, %c0_44, %c0_45] : memref<4x32x8xf32, #tpu.memory_space<vmem>>, vector<1x32x8xf32>
    %71 = vector.shape_cast %70 : vector<1x32x8xf32> to vector<32x8xf32>
    %72 = vector.extract_strided_slice %65 {offsets = [0, 8], sizes = [8, 8], strides = [1, 1]} : vector<8x32xf32> to vector<8x8xf32>
    %cst_46 = arith.constant dense<0.000000e+00> : vector<32x8xf32>
    %73 = tpu.matmul %71, %72, %cst_46 {dimension_numbers = #tpu.dot_dimension_numbers<[1], [0], [0], [1], [0, 0, 1, 1], [], []>} : vector<32x8xf32>, vector<8x8xf32>, vector<32x8xf32> -> vector<32x8xf32>
    %74 = arith.addf %69, %73 : vector<32x8xf32>
    %c2_47 = arith.constant 2 : index
    %c0_48 = arith.constant 0 : index
    %c0_49 = arith.constant 0 : index
    %75 = vector.load %arg7[%c2_47, %c0_48, %c0_49] : memref<4x32x8xf32, #tpu.memory_space<vmem>>, vector<1x32x8xf32>
    %76 = vector.shape_cast %75 : vector<1x32x8xf32> to vector<32x8xf32>
    %77 = vector.extract_strided_slice %65 {offsets = [0, 16], sizes = [8, 8], strides = [1, 1]} : vector<8x32xf32> to vector<8x8xf32>
    %cst_50 = arith.constant dense<0.000000e+00> : vector<32x8xf32>
    %78 = tpu.matmul %76, %77, %cst_50 {dimension_numbers = #tpu.dot_dimension_numbers<[1], [0], [0], [1], [0, 0, 1, 1], [], []>} : vector<32x8xf32>, vector<8x8xf32>, vector<32x8xf32> -> vector<32x8xf32>
    %79 = arith.addf %74, %78 : vector<32x8xf32>
    %c3_51 = arith.constant 3 : index
    %c0_52 = arith.constant 0 : index
    %c0_53 = arith.constant 0 : index
    %80 = vector.load %arg7[%c3_51, %c0_52, %c0_53] : memref<4x32x8xf32, #tpu.memory_space<vmem>>, vector<1x32x8xf32>
    %81 = vector.shape_cast %80 : vector<1x32x8xf32> to vector<32x8xf32>
    %82 = vector.extract_strided_slice %65 {offsets = [0, 24], sizes = [8, 8], strides = [1, 1]} : vector<8x32xf32> to vector<8x8xf32>
    %cst_54 = arith.constant dense<0.000000e+00> : vector<32x8xf32>
    %83 = tpu.matmul %81, %82, %cst_54 {dimension_numbers = #tpu.dot_dimension_numbers<[1], [0], [0], [1], [0, 0, 1, 1], [], []>} : vector<32x8xf32>, vector<8x8xf32>, vector<32x8xf32> -> vector<32x8xf32>
    %84 = arith.addf %79, %83 : vector<32x8xf32>
    %85 = vector.extract_strided_slice %42 {offsets = [0, 64], sizes = [8, 32], strides = [1, 1]} : vector<8x96xf32> to vector<8x32xf32>
    %c0_55 = arith.constant 0 : index
    %c0_56 = arith.constant 0 : index
    %c0_57 = arith.constant 0 : index
    %86 = vector.load %arg7[%c0_55, %c0_56, %c0_57] : memref<4x32x8xf32, #tpu.memory_space<vmem>>, vector<1x32x8xf32>
    %87 = vector.shape_cast %86 : vector<1x32x8xf32> to vector<32x8xf32>
    %88 = vector.extract_strided_slice %85 {offsets = [0, 0], sizes = [8, 8], strides = [1, 1]} : vector<8x32xf32> to vector<8x8xf32>
    %cst_58 = arith.constant dense<0.000000e+00> : vector<32x8xf32>
    %89 = tpu.matmul %87, %88, %cst_58 {dimension_numbers = #tpu.dot_dimension_numbers<[1], [0], [0], [1], [0, 0, 1, 1], [], []>} : vector<32x8xf32>, vector<8x8xf32>, vector<32x8xf32> -> vector<32x8xf32>
    %c1_59 = arith.constant 1 : index
    %c0_60 = arith.constant 0 : index
    %c0_61 = arith.constant 0 : index
    %90 = vector.load %arg7[%c1_59, %c0_60, %c0_61] : memref<4x32x8xf32, #tpu.memory_space<vmem>>, vector<1x32x8xf32>
    %91 = vector.shape_cast %90 : vector<1x32x8xf32> to vector<32x8xf32>
    %92 = vector.extract_strided_slice %85 {offsets = [0, 8], sizes = [8, 8], strides = [1, 1]} : vector<8x32xf32> to vector<8x8xf32>
    %cst_62 = arith.constant dense<0.000000e+00> : vector<32x8xf32>
    %93 = tpu.matmul %91, %92, %cst_62 {dimension_numbers = #tpu.dot_dimension_numbers<[1], [0], [0], [1], [0, 0, 1, 1], [], []>} : vector<32x8xf32>, vector<8x8xf32>, vector<32x8xf32> -> vector<32x8xf32>
    %94 = arith.addf %89, %93 : vector<32x8xf32>
    %c2_63 = arith.constant 2 : index
    %c0_64 = arith.constant 0 : index
    %c0_65 = arith.constant 0 : index
    %95 = vector.load %arg7[%c2_63, %c0_64, %c0_65] : memref<4x32x8xf32, #tpu.memory_space<vmem>>, vector<1x32x8xf32>
    %96 = vector.shape_cast %95 : vector<1x32x8xf32> to vector<32x8xf32>
    %97 = vector.extract_strided_slice %85 {offsets = [0, 16], sizes = [8, 8], strides = [1, 1]} : vector<8x32xf32> to vector<8x8xf32>
    %cst_66 = arith.constant dense<0.000000e+00> : vector<32x8xf32>
    %98 = tpu.matmul %96, %97, %cst_66 {dimension_numbers = #tpu.dot_dimension_numbers<[1], [0], [0], [1], [0, 0, 1, 1], [], []>} : vector<32x8xf32>, vector<8x8xf32>, vector<32x8xf32> -> vector<32x8xf32>
    %99 = arith.addf %94, %98 : vector<32x8xf32>
    %c3_67 = arith.constant 3 : index
    %c0_68 = arith.constant 0 : index
    %c0_69 = arith.constant 0 : index
    %100 = vector.load %arg7[%c3_67, %c0_68, %c0_69] : memref<4x32x8xf32, #tpu.memory_space<vmem>>, vector<1x32x8xf32>
    %101 = vector.shape_cast %100 : vector<1x32x8xf32> to vector<32x8xf32>
    %102 = vector.extract_strided_slice %85 {offsets = [0, 24], sizes = [8, 8], strides = [1, 1]} : vector<8x32xf32> to vector<8x8xf32>
    %cst_70 = arith.constant dense<0.000000e+00> : vector<32x8xf32>
    %103 = tpu.matmul %101, %102, %cst_70 {dimension_numbers = #tpu.dot_dimension_numbers<[1], [0], [0], [1], [0, 0, 1, 1], [], []>} : vector<32x8xf32>, vector<8x8xf32>, vector<32x8xf32> -> vector<32x8xf32>
    %104 = arith.addf %99, %103 : vector<32x8xf32>
    %105 = vector.extract_strided_slice %64 {offsets = [0, 0], sizes = [8, 8], strides = [1, 1]} : vector<32x8xf32> to vector<8x8xf32>
    %106 = vector.extract_strided_slice %84 {offsets = [0, 0], sizes = [8, 8], strides = [1, 1]} : vector<32x8xf32> to vector<8x8xf32>
    %107 = vector.extract_strided_slice %104 {offsets = [0, 0], sizes = [8, 8], strides = [1, 1]} : vector<32x8xf32> to vector<8x8xf32>
    %cst_71 = arith.constant dense<0.000000e+00> : vector<8x8xf32>
    %108 = tpu.matmul %105, %106, %cst_71 {dimension_numbers = #tpu.dot_dimension_numbers<[1], [1], [0], [0], [0, 0, 1, 0], [], []>} : vector<8x8xf32>, vector<8x8xf32>, vector<8x8xf32> -> vector<8x8xf32>
    %c4_i32 = arith.constant 4 : i32
    %109 = arith.muli %arg0, %c4_i32 : i32
    %c0_i32 = arith.constant 0 : i32
    %110 = arith.addi %109, %c0_i32 : i32
    %c2_i32 = arith.constant 2 : i32
    %c0_i32_72 = arith.constant 0 : i32
    %111 = arith.cmpi eq, %c2_i32, %c0_i32_72 : i32
    %c1_i32 = arith.constant 1 : i32
    %112 = arith.select %111, %c1_i32, %c2_i32 : i32
    %113 = arith.remsi %110, %112 : i32
    %c0_i32_73 = arith.constant 0 : i32
    %114 = arith.cmpi ne, %113, %c0_i32_73 : i32
    %c0_i32_74 = arith.constant 0 : i32
    %115 = arith.cmpi slt, %113, %c0_i32_74 : i32
    %c0_i32_75 = arith.constant 0 : i32
    %116 = arith.cmpi slt, %112, %c0_i32_75 : i32
    %117 = arith.xori %115, %116 : i1
    %118 = arith.andi %117, %114 : i1
    %119 = arith.addi %113, %112 : i32
    %120 = arith.select %118, %119, %113 : i32
    %121 = arith.index_cast %120 : i32 to index
    %122 = memref.load %arg1[%121] : memref<2xi32, #tpu.memory_space<smem>>
    %123 = vector.broadcast %122 : i32 to vector<8x8xi32>
    %124 = arith.cmpi sge, %7, %123 : vector<8x8xi32>
    %cst_76 = arith.constant -1.000000e+30 : f32
    %125 = vector.broadcast %cst_76 : f32 to vector<8x8xf32>
    %126 = arith.select %124, %125, %108 : vector<8x8xi1>, vector<8x8xf32>
    %cst_77 = arith.constant dense<0xFF800000> : vector<8xf32>
    %127 = vector.multi_reduction <maximumf>, %126, %cst_77 [1] : vector<8x8xf32> to vector<8xf32>
    %128 = vector.shape_cast %127 : vector<8xf32> to vector<8x1xf32>
    %129 = vector.broadcast %128 : vector<8x1xf32> to vector<8x8xf32>
    %130 = arith.subf %126, %129 : vector<8x8xf32>
    %131 = math.exp %130 : vector<8x8xf32>
    %cst_78 = arith.constant dense<0.000000e+00> : vector<8xf32>
    %132 = vector.multi_reduction <add>, %131, %cst_78 [1] : vector<8x8xf32> to vector<8xf32>
    %133 = vector.shape_cast %132 : vector<8xf32> to vector<8x1xf32>
    %134 = tpu.reciprocal %133 {approx = true} : vector<8x1xf32> -> vector<8x1xf32>
    %135 = vector.broadcast %134 : vector<8x1xf32> to vector<8x8xf32>
    %136 = arith.mulf %131, %135 : vector<8x8xf32>
    %cst_79 = arith.constant dense<0.000000e+00> : vector<8x8xf32>
    %137 = tpu.matmul %136, %107, %cst_79 {dimension_numbers = #tpu.dot_dimension_numbers<[1], [0], [0], [1], [0, 0, 1, 1], [], []>} : vector<8x8xf32>, vector<8x8xf32>, vector<8x8xf32> -> vector<8x8xf32>
    %138 = vector.extract_strided_slice %64 {offsets = [8, 0], sizes = [8, 8], strides = [1, 1]} : vector<32x8xf32> to vector<8x8xf32>
    %139 = vector.extract_strided_slice %84 {offsets = [8, 0], sizes = [8, 8], strides = [1, 1]} : vector<32x8xf32> to vector<8x8xf32>
    %140 = vector.extract_strided_slice %104 {offsets = [8, 0], sizes = [8, 8], strides = [1, 1]} : vector<32x8xf32> to vector<8x8xf32>
    %cst_80 = arith.constant dense<0.000000e+00> : vector<8x8xf32>
    %141 = tpu.matmul %138, %139, %cst_80 {dimension_numbers = #tpu.dot_dimension_numbers<[1], [1], [0], [0], [0, 0, 1, 0], [], []>} : vector<8x8xf32>, vector<8x8xf32>, vector<8x8xf32> -> vector<8x8xf32>
    %c4_i32_81 = arith.constant 4 : i32
    %142 = arith.muli %arg0, %c4_i32_81 : i32
    %c1_i32_82 = arith.constant 1 : i32
    %143 = arith.addi %142, %c1_i32_82 : i32
    %c2_i32_83 = arith.constant 2 : i32
    %c0_i32_84 = arith.constant 0 : i32
    %144 = arith.cmpi eq, %c2_i32_83, %c0_i32_84 : i32
    %c1_i32_85 = arith.constant 1 : i32
    %145 = arith.select %144, %c1_i32_85, %c2_i32_83 : i32
    %146 = arith.remsi %143, %145 : i32
    %c0_i32_86 = arith.constant 0 : i32
    %147 = arith.cmpi ne, %146, %c0_i32_86 : i32
    %c0_i32_87 = arith.constant 0 : i32
    %148 = arith.cmpi slt, %146, %c0_i32_87 : i32
    %c0_i32_88 = arith.constant 0 : i32
    %149 = arith.cmpi slt, %145, %c0_i32_88 : i32
    %150 = arith.xori %148, %149 : i1
    %151 = arith.andi %150, %147 : i1
    %152 = arith.addi %146, %145 : i32
    %153 = arith.select %151, %152, %146 : i32
    %154 = arith.index_cast %153 : i32 to index
    %155 = memref.load %arg1[%154] : memref<2xi32, #tpu.memory_space<smem>>
    %156 = vector.broadcast %155 : i32 to vector<8x8xi32>
    %157 = arith.cmpi sge, %7, %156 : vector<8x8xi32>
    %cst_89 = arith.constant -1.000000e+30 : f32
    %158 = vector.broadcast %cst_89 : f32 to vector<8x8xf32>
    %159 = arith.select %157, %158, %141 : vector<8x8xi1>, vector<8x8xf32>
    %cst_90 = arith.constant dense<0xFF800000> : vector<8xf32>
    %160 = vector.multi_reduction <maximumf>, %159, %cst_90 [1] : vector<8x8xf32> to vector<8xf32>
    %161 = vector.shape_cast %160 : vector<8xf32> to vector<8x1xf32>
    %162 = vector.broadcast %161 : vector<8x1xf32> to vector<8x8xf32>
    %163 = arith.subf %159, %162 : vector<8x8xf32>
    %164 = math.exp %163 : vector<8x8xf32>
    %cst_91 = arith.constant dense<0.000000e+00> : vector<8xf32>
    %165 = vector.multi_reduction <add>, %164, %cst_91 [1] : vector<8x8xf32> to vector<8xf32>
    %166 = vector.shape_cast %165 : vector<8xf32> to vector<8x1xf32>
    %167 = tpu.reciprocal %166 {approx = true} : vector<8x1xf32> -> vector<8x1xf32>
    %168 = vector.broadcast %167 : vector<8x1xf32> to vector<8x8xf32>
    %169 = arith.mulf %164, %168 : vector<8x8xf32>
    %cst_92 = arith.constant dense<0.000000e+00> : vector<8x8xf32>
    %170 = tpu.matmul %169, %140, %cst_92 {dimension_numbers = #tpu.dot_dimension_numbers<[1], [0], [0], [1], [0, 0, 1, 1], [], []>} : vector<8x8xf32>, vector<8x8xf32>, vector<8x8xf32> -> vector<8x8xf32>
    %171 = vector.extract_strided_slice %64 {offsets = [16, 0], sizes = [8, 8], strides = [1, 1]} : vector<32x8xf32> to vector<8x8xf32>
    %172 = vector.extract_strided_slice %84 {offsets = [16, 0], sizes = [8, 8], strides = [1, 1]} : vector<32x8xf32> to vector<8x8xf32>
    %173 = vector.extract_strided_slice %104 {offsets = [16, 0], sizes = [8, 8], strides = [1, 1]} : vector<32x8xf32> to vector<8x8xf32>
    %cst_93 = arith.constant dense<0.000000e+00> : vector<8x8xf32>
    %174 = tpu.matmul %171, %172, %cst_93 {dimension_numbers = #tpu.dot_dimension_numbers<[1], [1], [0], [0], [0, 0, 1, 0], [], []>} : vector<8x8xf32>, vector<8x8xf32>, vector<8x8xf32> -> vector<8x8xf32>
    %c4_i32_94 = arith.constant 4 : i32
    %175 = arith.muli %arg0, %c4_i32_94 : i32
    %c2_i32_95 = arith.constant 2 : i32
    %176 = arith.addi %175, %c2_i32_95 : i32
    %c2_i32_96 = arith.constant 2 : i32
    %c0_i32_97 = arith.constant 0 : i32
    %177 = arith.cmpi eq, %c2_i32_96, %c0_i32_97 : i32
    %c1_i32_98 = arith.constant 1 : i32
    %178 = arith.select %177, %c1_i32_98, %c2_i32_96 : i32
    %179 = arith.remsi %176, %178 : i32
    %c0_i32_99 = arith.constant 0 : i32
    %180 = arith.cmpi ne, %179, %c0_i32_99 : i32
    %c0_i32_100 = arith.constant 0 : i32
    %181 = arith.cmpi slt, %179, %c0_i32_100 : i32
    %c0_i32_101 = arith.constant 0 : i32
    %182 = arith.cmpi slt, %178, %c0_i32_101 : i32
    %183 = arith.xori %181, %182 : i1
    %184 = arith.andi %183, %180 : i1
    %185 = arith.addi %179, %178 : i32
    %186 = arith.select %184, %185, %179 : i32
    %187 = arith.index_cast %186 : i32 to index
    %188 = memref.load %arg1[%187] : memref<2xi32, #tpu.memory_space<smem>>
    %189 = vector.broadcast %188 : i32 to vector<8x8xi32>
    %190 = arith.cmpi sge, %7, %189 : vector<8x8xi32>
    %cst_102 = arith.constant -1.000000e+30 : f32
    %191 = vector.broadcast %cst_102 : f32 to vector<8x8xf32>
    %192 = arith.select %190, %191, %174 : vector<8x8xi1>, vector<8x8xf32>
    %cst_103 = arith.constant dense<0xFF800000> : vector<8xf32>
    %193 = vector.multi_reduction <maximumf>, %192, %cst_103 [1] : vector<8x8xf32> to vector<8xf32>
    %194 = vector.shape_cast %193 : vector<8xf32> to vector<8x1xf32>
    %195 = vector.broadcast %194 : vector<8x1xf32> to vector<8x8xf32>
    %196 = arith.subf %192, %195 : vector<8x8xf32>
    %197 = math.exp %196 : vector<8x8xf32>
    %cst_104 = arith.constant dense<0.000000e+00> : vector<8xf32>
    %198 = vector.multi_reduction <add>, %197, %cst_104 [1] : vector<8x8xf32> to vector<8xf32>
    %199 = vector.shape_cast %198 : vector<8xf32> to vector<8x1xf32>
    %200 = tpu.reciprocal %199 {approx = true} : vector<8x1xf32> -> vector<8x1xf32>
    %201 = vector.broadcast %200 : vector<8x1xf32> to vector<8x8xf32>
    %202 = arith.mulf %197, %201 : vector<8x8xf32>
    %cst_105 = arith.constant dense<0.000000e+00> : vector<8x8xf32>
    %203 = tpu.matmul %202, %173, %cst_105 {dimension_numbers = #tpu.dot_dimension_numbers<[1], [0], [0], [1], [0, 0, 1, 1], [], []>} : vector<8x8xf32>, vector<8x8xf32>, vector<8x8xf32> -> vector<8x8xf32>
    %204 = vector.extract_strided_slice %64 {offsets = [24, 0], sizes = [8, 8], strides = [1, 1]} : vector<32x8xf32> to vector<8x8xf32>
    %205 = vector.extract_strided_slice %84 {offsets = [24, 0], sizes = [8, 8], strides = [1, 1]} : vector<32x8xf32> to vector<8x8xf32>
    %206 = vector.extract_strided_slice %104 {offsets = [24, 0], sizes = [8, 8], strides = [1, 1]} : vector<32x8xf32> to vector<8x8xf32>
    %cst_106 = arith.constant dense<0.000000e+00> : vector<8x8xf32>
    %207 = tpu.matmul %204, %205, %cst_106 {dimension_numbers = #tpu.dot_dimension_numbers<[1], [1], [0], [0], [0, 0, 1, 0], [], []>} : vector<8x8xf32>, vector<8x8xf32>, vector<8x8xf32> -> vector<8x8xf32>
    %c4_i32_107 = arith.constant 4 : i32
    %208 = arith.muli %arg0, %c4_i32_107 : i32
    %c3_i32 = arith.constant 3 : i32
    %209 = arith.addi %208, %c3_i32 : i32
    %c2_i32_108 = arith.constant 2 : i32
    %c0_i32_109 = arith.constant 0 : i32
    %210 = arith.cmpi eq, %c2_i32_108, %c0_i32_109 : i32
    %c1_i32_110 = arith.constant 1 : i32
    %211 = arith.select %210, %c1_i32_110, %c2_i32_108 : i32
    %212 = arith.remsi %209, %211 : i32
    %c0_i32_111 = arith.constant 0 : i32
    %213 = arith.cmpi ne, %212, %c0_i32_111 : i32
    %c0_i32_112 = arith.constant 0 : i32
    %214 = arith.cmpi slt, %212, %c0_i32_112 : i32
    %c0_i32_113 = arith.constant 0 : i32
    %215 = arith.cmpi slt, %211, %c0_i32_113 : i32
    %216 = arith.xori %214, %215 : i1
    %217 = arith.andi %216, %213 : i1
    %218 = arith.addi %212, %211 : i32
    %219 = arith.select %217, %218, %212 : i32
    %220 = arith.index_cast %219 : i32 to index
    %221 = memref.load %arg1[%220] : memref<2xi32, #tpu.memory_space<smem>>
    %222 = vector.broadcast %221 : i32 to vector<8x8xi32>
    %223 = arith.cmpi sge, %7, %222 : vector<8x8xi32>
    %cst_114 = arith.constant -1.000000e+30 : f32
    %224 = vector.broadcast %cst_114 : f32 to vector<8x8xf32>
    %225 = arith.select %223, %224, %207 : vector<8x8xi1>, vector<8x8xf32>
    %cst_115 = arith.constant dense<0xFF800000> : vector<8xf32>
    %226 = vector.multi_reduction <maximumf>, %225, %cst_115 [1] : vector<8x8xf32> to vector<8xf32>
    %227 = vector.shape_cast %226 : vector<8xf32> to vector<8x1xf32>
    %228 = vector.broadcast %227 : vector<8x1xf32> to vector<8x8xf32>
    %229 = arith.subf %225, %228 : vector<8x8xf32>
    %230 = math.exp %229 : vector<8x8xf32>
    %cst_116 = arith.constant dense<0.000000e+00> : vector<8xf32>
    %231 = vector.multi_reduction <add>, %230, %cst_116 [1] : vector<8x8xf32> to vector<8xf32>
    %232 = vector.shape_cast %231 : vector<8xf32> to vector<8x1xf32>
    %233 = tpu.reciprocal %232 {approx = true} : vector<8x1xf32> -> vector<8x1xf32>
    %234 = vector.broadcast %233 : vector<8x1xf32> to vector<8x8xf32>
    %235 = arith.mulf %230, %234 : vector<8x8xf32>
    %cst_117 = arith.constant dense<0.000000e+00> : vector<8x8xf32>
    %236 = tpu.matmul %235, %206, %cst_117 {dimension_numbers = #tpu.dot_dimension_numbers<[1], [0], [0], [1], [0, 0, 1, 1], [], []>} : vector<8x8xf32>, vector<8x8xf32>, vector<8x8xf32> -> vector<8x8xf32>
    %237 = tpu.concatenate %137, %170, %203, %236 in 0 : vector<8x8xf32>, vector<8x8xf32>, vector<8x8xf32>, vector<8x8xf32> -> vector<32x8xf32>
    %c0_118 = arith.constant 0 : index
    %c0_119 = arith.constant 0 : index
    %c0_120 = arith.constant 0 : index
    %238 = vector.load %arg8[%c0_118, %c0_119, %c0_120] : memref<4x8x32xf32, #tpu.memory_space<vmem>>, vector<1x8x32xf32>
    %239 = vector.shape_cast %238 : vector<1x8x32xf32> to vector<8x32xf32>
    %cst_121 = arith.constant dense<0.000000e+00> : vector<8x8xf32>
    %240 = tpu.matmul %239, %237, %cst_121 {dimension_numbers = #tpu.dot_dimension_numbers<[1], [0], [0], [1], [0, 0, 1, 1], [], []>} : vector<8x32xf32>, vector<32x8xf32>, vector<8x8xf32> -> vector<8x8xf32>
    %c1_122 = arith.constant 1 : index
    %c0_123 = arith.constant 0 : index
    %c0_124 = arith.constant 0 : index
    %241 = vector.load %arg8[%c1_122, %c0_123, %c0_124] : memref<4x8x32xf32, #tpu.memory_space<vmem>>, vector<1x8x32xf32>
    %242 = vector.shape_cast %241 : vector<1x8x32xf32> to vector<8x32xf32>
    %cst_125 = arith.constant dense<0.000000e+00> : vector<8x8xf32>
    %243 = tpu.matmul %242, %237, %cst_125 {dimension_numbers = #tpu.dot_dimension_numbers<[1], [0], [0], [1], [0, 0, 1, 1], [], []>} : vector<8x32xf32>, vector<32x8xf32>, vector<8x8xf32> -> vector<8x8xf32>
    %c2_126 = arith.constant 2 : index
    %c0_127 = arith.constant 0 : index
    %c0_128 = arith.constant 0 : index
    %244 = vector.load %arg8[%c2_126, %c0_127, %c0_128] : memref<4x8x32xf32, #tpu.memory_space<vmem>>, vector<1x8x32xf32>
    %245 = vector.shape_cast %244 : vector<1x8x32xf32> to vector<8x32xf32>
    %cst_129 = arith.constant dense<0.000000e+00> : vector<8x8xf32>
    %246 = tpu.matmul %245, %237, %cst_129 {dimension_numbers = #tpu.dot_dimension_numbers<[1], [0], [0], [1], [0, 0, 1, 1], [], []>} : vector<8x32xf32>, vector<32x8xf32>, vector<8x8xf32> -> vector<8x8xf32>
    %c3_130 = arith.constant 3 : index
    %c0_131 = arith.constant 0 : index
    %c0_132 = arith.constant 0 : index
    %247 = vector.load %arg8[%c3_130, %c0_131, %c0_132] : memref<4x8x32xf32, #tpu.memory_space<vmem>>, vector<1x8x32xf32>
    %248 = vector.shape_cast %247 : vector<1x8x32xf32> to vector<8x32xf32>
    %cst_133 = arith.constant dense<0.000000e+00> : vector<8x8xf32>
    %249 = tpu.matmul %248, %237, %cst_133 {dimension_numbers = #tpu.dot_dimension_numbers<[1], [0], [0], [1], [0, 0, 1, 1], [], []>} : vector<8x32xf32>, vector<32x8xf32>, vector<8x8xf32> -> vector<8x8xf32>
    %250 = tpu.concatenate %240, %243, %246, %249 in 1 : vector<8x8xf32>, vector<8x8xf32>, vector<8x8xf32>, vector<8x8xf32> -> vector<8x32xf32>
    %c0_134 = arith.constant 0 : index
    %c0_135 = arith.constant 0 : index
    %c0_136 = arith.constant 0 : index
    %251 = vector.load %arg16[%c0_134, %c0_135, %c0_136] : memref<2x32x32xf32, #tpu.memory_space<vmem>>, vector<1x32x32xf32>
    %252 = vector.shape_cast %251 : vector<1x32x32xf32> to vector<32x32xf32>
    %cst_137 = arith.constant dense<0.000000e+00> : vector<8x32xf32>
    %253 = tpu.matmul %250, %252, %cst_137 {dimension_numbers = #tpu.dot_dimension_numbers<[1], [0], [0], [1], [0, 0, 1, 1], [], []>} : vector<8x32xf32>, vector<32x32xf32>, vector<8x32xf32> -> vector<8x32xf32>
    %c0_138 = arith.constant 0 : index
    %c0_139 = arith.constant 0 : index
    %c0_140 = arith.constant 0 : index
    %254 = vector.load %arg17[%c0_138, %c0_139, %c0_140] : memref<2x1x32xf32, #tpu.memory_space<vmem>>, vector<1x1x32xf32>
    %255 = vector.shape_cast %254 : vector<1x1x32xf32> to vector<1x32xf32>
    %256 = vector.broadcast %255 : vector<1x32xf32> to vector<8x32xf32>
    %257 = arith.addf %253, %256 : vector<8x32xf32>
    %258 = arith.addf %35, %257 : vector<8x32xf32>
    %c0_141 = arith.constant 0 : index
    %c0_142 = arith.constant 0 : index
    %c0_143 = arith.constant 0 : index
    %259 = vector.load %arg18[%c0_141, %c0_142, %c0_143] : memref<2x1x32xf32, #tpu.memory_space<vmem>>, vector<1x1x32xf32>
    %260 = vector.shape_cast %259 : vector<1x1x32xf32> to vector<1x32xf32>
    %c0_144 = arith.constant 0 : index
    %c0_145 = arith.constant 0 : index
    %c0_146 = arith.constant 0 : index
    %261 = vector.load %arg19[%c0_144, %c0_145, %c0_146] : memref<2x1x32xf32, #tpu.memory_space<vmem>>, vector<1x1x32xf32>
    %262 = vector.shape_cast %261 : vector<1x1x32xf32> to vector<1x32xf32>
    %cst_147 = arith.constant dense<0.000000e+00> : vector<8xf32>
    %263 = vector.multi_reduction <add>, %258, %cst_147 [1] : vector<8x32xf32> to vector<8xf32>
    %264 = vector.shape_cast %263 : vector<8xf32> to vector<8x1xf32>
    %cst_148 = arith.constant 3.200000e+01 : f32
    %265 = vector.broadcast %cst_148 : f32 to vector<8x1xf32>
    %266 = arith.divf %264, %265 : vector<8x1xf32>
    %267 = vector.broadcast %266 : vector<8x1xf32> to vector<8x32xf32>
    %268 = arith.subf %258, %267 : vector<8x32xf32>
    %269 = vector.broadcast %266 : vector<8x1xf32> to vector<8x32xf32>
    %270 = arith.subf %258, %269 : vector<8x32xf32>
    %271 = arith.mulf %268, %270 : vector<8x32xf32>
    %cst_149 = arith.constant dense<0.000000e+00> : vector<8xf32>
    %272 = vector.multi_reduction <add>, %271, %cst_149 [1] : vector<8x32xf32> to vector<8xf32>
    %273 = vector.shape_cast %272 : vector<8xf32> to vector<8x1xf32>
    %cst_150 = arith.constant 3.200000e+01 : f32
    %274 = vector.broadcast %cst_150 : f32 to vector<8x1xf32>
    %275 = arith.divf %273, %274 : vector<8x1xf32>
    %276 = vector.broadcast %266 : vector<8x1xf32> to vector<8x32xf32>
    %277 = arith.subf %258, %276 : vector<8x32xf32>
    %cst_151 = arith.constant 9.99999974E-6 : f32
    %278 = vector.broadcast %cst_151 : f32 to vector<8x1xf32>
    %279 = arith.addf %275, %278 : vector<8x1xf32>
    %280 = math.rsqrt %279 : vector<8x1xf32>
    %281 = vector.broadcast %280 : vector<8x1xf32> to vector<8x32xf32>
    %282 = arith.mulf %277, %281 : vector<8x32xf32>
    %283 = vector.broadcast %260 : vector<1x32xf32> to vector<8x32xf32>
    %284 = arith.mulf %282, %283 : vector<8x32xf32>
    %285 = vector.broadcast %262 : vector<1x32xf32> to vector<8x32xf32>
    %286 = arith.addf %284, %285 : vector<8x32xf32>
    %c0_152 = arith.constant 0 : index
    %c0_153 = arith.constant 0 : index
    %c0_154 = arith.constant 0 : index
    %287 = vector.load %arg20[%c0_152, %c0_153, %c0_154] : memref<2x32x64xf32, #tpu.memory_space<vmem>>, vector<1x32x64xf32>
    %288 = vector.shape_cast %287 : vector<1x32x64xf32> to vector<32x64xf32>
    %cst_155 = arith.constant dense<0.000000e+00> : vector<8x64xf32>
    %289 = tpu.matmul %286, %288, %cst_155 {dimension_numbers = #tpu.dot_dimension_numbers<[1], [0], [0], [1], [0, 0, 1, 1], [], []>} : vector<8x32xf32>, vector<32x64xf32>, vector<8x64xf32> -> vector<8x64xf32>
    %c0_156 = arith.constant 0 : index
    %c0_157 = arith.constant 0 : index
    %c0_158 = arith.constant 0 : index
    %290 = vector.load %arg21[%c0_156, %c0_157, %c0_158] : memref<2x1x64xf32, #tpu.memory_space<vmem>>, vector<1x1x64xf32>
    %291 = vector.shape_cast %290 : vector<1x1x64xf32> to vector<1x64xf32>
    %292 = vector.broadcast %291 : vector<1x64xf32> to vector<8x64xf32>
    %293 = arith.addf %289, %292 : vector<8x64xf32>
    %cst_159 = arith.constant 0.000000e+00 : f32
    %294 = vector.broadcast %cst_159 : f32 to vector<8x64xf32>
    %295 = arith.maximumf %293, %294 : vector<8x64xf32>
    %c0_160 = arith.constant 0 : index
    %c0_161 = arith.constant 0 : index
    %c0_162 = arith.constant 0 : index
    %296 = vector.load %arg22[%c0_160, %c0_161, %c0_162] : memref<2x64x32xf32, #tpu.memory_space<vmem>>, vector<1x64x32xf32>
    %297 = vector.shape_cast %296 : vector<1x64x32xf32> to vector<64x32xf32>
    %cst_163 = arith.constant dense<0.000000e+00> : vector<8x32xf32>
    %298 = tpu.matmul %295, %297, %cst_163 {dimension_numbers = #tpu.dot_dimension_numbers<[1], [0], [0], [1], [0, 0, 1, 1], [], []>} : vector<8x64xf32>, vector<64x32xf32>, vector<8x32xf32> -> vector<8x32xf32>
    %c0_164 = arith.constant 0 : index
    %c0_165 = arith.constant 0 : index
    %c0_166 = arith.constant 0 : index
    %299 = vector.load %arg23[%c0_164, %c0_165, %c0_166] : memref<2x1x32xf32, #tpu.memory_space<vmem>>, vector<1x1x32xf32>
    %300 = vector.shape_cast %299 : vector<1x1x32xf32> to vector<1x32xf32>
    %301 = vector.broadcast %300 : vector<1x32xf32> to vector<8x32xf32>
    %302 = arith.addf %298, %301 : vector<8x32xf32>
    %303 = arith.addf %286, %302 : vector<8x32xf32>
    %c0_167 = arith.constant 0 : index
    %c0_168 = arith.constant 0 : index
    %c0_169 = arith.constant 0 : index
    %304 = vector.load %arg24[%c0_167, %c0_168, %c0_169] : memref<2x1x32xf32, #tpu.memory_space<vmem>>, vector<1x1x32xf32>
    %305 = vector.shape_cast %304 : vector<1x1x32xf32> to vector<1x32xf32>
    %c0_170 = arith.constant 0 : index
    %c0_171 = arith.constant 0 : index
    %c0_172 = arith.constant 0 : index
    %306 = vector.load %arg25[%c0_170, %c0_171, %c0_172] : memref<2x1x32xf32, #tpu.memory_space<vmem>>, vector<1x1x32xf32>
    %307 = vector.shape_cast %306 : vector<1x1x32xf32> to vector<1x32xf32>
    %cst_173 = arith.constant dense<0.000000e+00> : vector<8xf32>
    %308 = vector.multi_reduction <add>, %303, %cst_173 [1] : vector<8x32xf32> to vector<8xf32>
    %309 = vector.shape_cast %308 : vector<8xf32> to vector<8x1xf32>
    %cst_174 = arith.constant 3.200000e+01 : f32
    %310 = vector.broadcast %cst_174 : f32 to vector<8x1xf32>
    %311 = arith.divf %309, %310 : vector<8x1xf32>
    %312 = vector.broadcast %311 : vector<8x1xf32> to vector<8x32xf32>
    %313 = arith.subf %303, %312 : vector<8x32xf32>
    %314 = vector.broadcast %311 : vector<8x1xf32> to vector<8x32xf32>
    %315 = arith.subf %303, %314 : vector<8x32xf32>
    %316 = arith.mulf %313, %315 : vector<8x32xf32>
    %cst_175 = arith.constant dense<0.000000e+00> : vector<8xf32>
    %317 = vector.multi_reduction <add>, %316, %cst_175 [1] : vector<8x32xf32> to vector<8xf32>
    %318 = vector.shape_cast %317 : vector<8xf32> to vector<8x1xf32>
    %cst_176 = arith.constant 3.200000e+01 : f32
    %319 = vector.broadcast %cst_176 : f32 to vector<8x1xf32>
    %320 = arith.divf %318, %319 : vector<8x1xf32>
    %321 = vector.broadcast %311 : vector<8x1xf32> to vector<8x32xf32>
    %322 = arith.subf %303, %321 : vector<8x32xf32>
    %cst_177 = arith.constant 9.99999974E-6 : f32
    %323 = vector.broadcast %cst_177 : f32 to vector<8x1xf32>
    %324 = arith.addf %320, %323 : vector<8x1xf32>
    %325 = math.rsqrt %324 : vector<8x1xf32>
    %326 = vector.broadcast %325 : vector<8x1xf32> to vector<8x32xf32>
    %327 = arith.mulf %322, %326 : vector<8x32xf32>
    %328 = vector.broadcast %305 : vector<1x32xf32> to vector<8x32xf32>
    %329 = arith.mulf %327, %328 : vector<8x32xf32>
    %330 = vector.broadcast %307 : vector<1x32xf32> to vector<8x32xf32>
    %331 = arith.addf %329, %330 : vector<8x32xf32>
    %c1_178 = arith.constant 1 : index
    %c0_179 = arith.constant 0 : index
    %c0_180 = arith.constant 0 : index
    %332 = vector.load %arg14[%c1_178, %c0_179, %c0_180] : memref<2x32x96xf32, #tpu.memory_space<vmem>>, vector<1x32x96xf32>
    %333 = vector.shape_cast %332 : vector<1x32x96xf32> to vector<32x96xf32>
    %cst_181 = arith.constant dense<0.000000e+00> : vector<8x96xf32>
    %334 = tpu.matmul %331, %333, %cst_181 {dimension_numbers = #tpu.dot_dimension_numbers<[1], [0], [0], [1], [0, 0, 1, 1], [], []>} : vector<8x32xf32>, vector<32x96xf32>, vector<8x96xf32> -> vector<8x96xf32>
    %c1_182 = arith.constant 1 : index
    %c0_183 = arith.constant 0 : index
    %c0_184 = arith.constant 0 : index
    %335 = vector.load %arg15[%c1_182, %c0_183, %c0_184] : memref<2x1x96xf32, #tpu.memory_space<vmem>>, vector<1x1x96xf32>
    %336 = vector.shape_cast %335 : vector<1x1x96xf32> to vector<1x96xf32>
    %337 = vector.broadcast %336 : vector<1x96xf32> to vector<8x96xf32>
    %338 = arith.addf %334, %337 : vector<8x96xf32>
    %339 = vector.extract_strided_slice %338 {offsets = [0, 0], sizes = [8, 32], strides = [1, 1]} : vector<8x96xf32> to vector<8x32xf32>
    %cst_185 = arith.constant 0.707106769 : f32
    %340 = vector.broadcast %cst_185 : f32 to vector<8x32xf32>
    %341 = arith.mulf %339, %340 : vector<8x32xf32>
    %c0_186 = arith.constant 0 : index
    %c0_187 = arith.constant 0 : index
    %c0_188 = arith.constant 0 : index
    %342 = vector.load %arg7[%c0_186, %c0_187, %c0_188] : memref<4x32x8xf32, #tpu.memory_space<vmem>>, vector<1x32x8xf32>
    %343 = vector.shape_cast %342 : vector<1x32x8xf32> to vector<32x8xf32>
    %344 = vector.extract_strided_slice %341 {offsets = [0, 0], sizes = [8, 8], strides = [1, 1]} : vector<8x32xf32> to vector<8x8xf32>
    %cst_189 = arith.constant dense<0.000000e+00> : vector<32x8xf32>
    %345 = tpu.matmul %343, %344, %cst_189 {dimension_numbers = #tpu.dot_dimension_numbers<[1], [0], [0], [1], [0, 0, 1, 1], [], []>} : vector<32x8xf32>, vector<8x8xf32>, vector<32x8xf32> -> vector<32x8xf32>
    %c1_190 = arith.constant 1 : index
    %c0_191 = arith.constant 0 : index
    %c0_192 = arith.constant 0 : index
    %346 = vector.load %arg7[%c1_190, %c0_191, %c0_192] : memref<4x32x8xf32, #tpu.memory_space<vmem>>, vector<1x32x8xf32>
    %347 = vector.shape_cast %346 : vector<1x32x8xf32> to vector<32x8xf32>
    %348 = vector.extract_strided_slice %341 {offsets = [0, 8], sizes = [8, 8], strides = [1, 1]} : vector<8x32xf32> to vector<8x8xf32>
    %cst_193 = arith.constant dense<0.000000e+00> : vector<32x8xf32>
    %349 = tpu.matmul %347, %348, %cst_193 {dimension_numbers = #tpu.dot_dimension_numbers<[1], [0], [0], [1], [0, 0, 1, 1], [], []>} : vector<32x8xf32>, vector<8x8xf32>, vector<32x8xf32> -> vector<32x8xf32>
    %350 = arith.addf %345, %349 : vector<32x8xf32>
    %c2_194 = arith.constant 2 : index
    %c0_195 = arith.constant 0 : index
    %c0_196 = arith.constant 0 : index
    %351 = vector.load %arg7[%c2_194, %c0_195, %c0_196] : memref<4x32x8xf32, #tpu.memory_space<vmem>>, vector<1x32x8xf32>
    %352 = vector.shape_cast %351 : vector<1x32x8xf32> to vector<32x8xf32>
    %353 = vector.extract_strided_slice %341 {offsets = [0, 16], sizes = [8, 8], strides = [1, 1]} : vector<8x32xf32> to vector<8x8xf32>
    %cst_197 = arith.constant dense<0.000000e+00> : vector<32x8xf32>
    %354 = tpu.matmul %352, %353, %cst_197 {dimension_numbers = #tpu.dot_dimension_numbers<[1], [0], [0], [1], [0, 0, 1, 1], [], []>} : vector<32x8xf32>, vector<8x8xf32>, vector<32x8xf32> -> vector<32x8xf32>
    %355 = arith.addf %350, %354 : vector<32x8xf32>
    %c3_198 = arith.constant 3 : index
    %c0_199 = arith.constant 0 : index
    %c0_200 = arith.constant 0 : index
    %356 = vector.load %arg7[%c3_198, %c0_199, %c0_200] : memref<4x32x8xf32, #tpu.memory_space<vmem>>, vector<1x32x8xf32>
    %357 = vector.shape_cast %356 : vector<1x32x8xf32> to vector<32x8xf32>
    %358 = vector.extract_strided_slice %341 {offsets = [0, 24], sizes = [8, 8], strides = [1, 1]} : vector<8x32xf32> to vector<8x8xf32>
    %cst_201 = arith.constant dense<0.000000e+00> : vector<32x8xf32>
    %359 = tpu.matmul %357, %358, %cst_201 {dimension_numbers = #tpu.dot_dimension_numbers<[1], [0], [0], [1], [0, 0, 1, 1], [], []>} : vector<32x8xf32>, vector<8x8xf32>, vector<32x8xf32> -> vector<32x8xf32>
    %360 = arith.addf %355, %359 : vector<32x8xf32>
    %361 = vector.extract_strided_slice %338 {offsets = [0, 32], sizes = [8, 32], strides = [1, 1]} : vector<8x96xf32> to vector<8x32xf32>
    %c0_202 = arith.constant 0 : index
    %c0_203 = arith.constant 0 : index
    %c0_204 = arith.constant 0 : index
    %362 = vector.load %arg7[%c0_202, %c0_203, %c0_204] : memref<4x32x8xf32, #tpu.memory_space<vmem>>, vector<1x32x8xf32>
    %363 = vector.shape_cast %362 : vector<1x32x8xf32> to vector<32x8xf32>
    %364 = vector.extract_strided_slice %361 {offsets = [0, 0], sizes = [8, 8], strides = [1, 1]} : vector<8x32xf32> to vector<8x8xf32>
    %cst_205 = arith.constant dense<0.000000e+00> : vector<32x8xf32>
    %365 = tpu.matmul %363, %364, %cst_205 {dimension_numbers = #tpu.dot_dimension_numbers<[1], [0], [0], [1], [0, 0, 1, 1], [], []>} : vector<32x8xf32>, vector<8x8xf32>, vector<32x8xf32> -> vector<32x8xf32>
    %c1_206 = arith.constant 1 : index
    %c0_207 = arith.constant 0 : index
    %c0_208 = arith.constant 0 : index
    %366 = vector.load %arg7[%c1_206, %c0_207, %c0_208] : memref<4x32x8xf32, #tpu.memory_space<vmem>>, vector<1x32x8xf32>
    %367 = vector.shape_cast %366 : vector<1x32x8xf32> to vector<32x8xf32>
    %368 = vector.extract_strided_slice %361 {offsets = [0, 8], sizes = [8, 8], strides = [1, 1]} : vector<8x32xf32> to vector<8x8xf32>
    %cst_209 = arith.constant dense<0.000000e+00> : vector<32x8xf32>
    %369 = tpu.matmul %367, %368, %cst_209 {dimension_numbers = #tpu.dot_dimension_numbers<[1], [0], [0], [1], [0, 0, 1, 1], [], []>} : vector<32x8xf32>, vector<8x8xf32>, vector<32x8xf32> -> vector<32x8xf32>
    %370 = arith.addf %365, %369 : vector<32x8xf32>
    %c2_210 = arith.constant 2 : index
    %c0_211 = arith.constant 0 : index
    %c0_212 = arith.constant 0 : index
    %371 = vector.load %arg7[%c2_210, %c0_211, %c0_212] : memref<4x32x8xf32, #tpu.memory_space<vmem>>, vector<1x32x8xf32>
    %372 = vector.shape_cast %371 : vector<1x32x8xf32> to vector<32x8xf32>
    %373 = vector.extract_strided_slice %361 {offsets = [0, 16], sizes = [8, 8], strides = [1, 1]} : vector<8x32xf32> to vector<8x8xf32>
    %cst_213 = arith.constant dense<0.000000e+00> : vector<32x8xf32>
    %374 = tpu.matmul %372, %373, %cst_213 {dimension_numbers = #tpu.dot_dimension_numbers<[1], [0], [0], [1], [0, 0, 1, 1], [], []>} : vector<32x8xf32>, vector<8x8xf32>, vector<32x8xf32> -> vector<32x8xf32>
    %375 = arith.addf %370, %374 : vector<32x8xf32>
    %c3_214 = arith.constant 3 : index
    %c0_215 = arith.constant 0 : index
    %c0_216 = arith.constant 0 : index
    %376 = vector.load %arg7[%c3_214, %c0_215, %c0_216] : memref<4x32x8xf32, #tpu.memory_space<vmem>>, vector<1x32x8xf32>
    %377 = vector.shape_cast %376 : vector<1x32x8xf32> to vector<32x8xf32>
    %378 = vector.extract_strided_slice %361 {offsets = [0, 24], sizes = [8, 8], strides = [1, 1]} : vector<8x32xf32> to vector<8x8xf32>
    %cst_217 = arith.constant dense<0.000000e+00> : vector<32x8xf32>
    %379 = tpu.matmul %377, %378, %cst_217 {dimension_numbers = #tpu.dot_dimension_numbers<[1], [0], [0], [1], [0, 0, 1, 1], [], []>} : vector<32x8xf32>, vector<8x8xf32>, vector<32x8xf32> -> vector<32x8xf32>
    %380 = arith.addf %375, %379 : vector<32x8xf32>
    %381 = vector.extract_strided_slice %338 {offsets = [0, 64], sizes = [8, 32], strides = [1, 1]} : vector<8x96xf32> to vector<8x32xf32>
    %c0_218 = arith.constant 0 : index
    %c0_219 = arith.constant 0 : index
    %c0_220 = arith.constant 0 : index
    %382 = vector.load %arg7[%c0_218, %c0_219, %c0_220] : memref<4x32x8xf32, #tpu.memory_space<vmem>>, vector<1x32x8xf32>
    %383 = vector.shape_cast %382 : vector<1x32x8xf32> to vector<32x8xf32>
    %384 = vector.extract_strided_slice %381 {offsets = [0, 0], sizes = [8, 8], strides = [1, 1]} : vector<8x32xf32> to vector<8x8xf32>
    %cst_221 = arith.constant dense<0.000000e+00> : vector<32x8xf32>
    %385 = tpu.matmul %383, %384, %cst_221 {dimension_numbers = #tpu.dot_dimension_numbers<[1], [0], [0], [1], [0, 0, 1, 1], [], []>} : vector<32x8xf32>, vector<8x8xf32>, vector<32x8xf32> -> vector<32x8xf32>
    %c1_222 = arith.constant 1 : index
    %c0_223 = arith.constant 0 : index
    %c0_224 = arith.constant 0 : index
    %386 = vector.load %arg7[%c1_222, %c0_223, %c0_224] : memref<4x32x8xf32, #tpu.memory_space<vmem>>, vector<1x32x8xf32>
    %387 = vector.shape_cast %386 : vector<1x32x8xf32> to vector<32x8xf32>
    %388 = vector.extract_strided_slice %381 {offsets = [0, 8], sizes = [8, 8], strides = [1, 1]} : vector<8x32xf32> to vector<8x8xf32>
    %cst_225 = arith.constant dense<0.000000e+00> : vector<32x8xf32>
    %389 = tpu.matmul %387, %388, %cst_225 {dimension_numbers = #tpu.dot_dimension_numbers<[1], [0], [0], [1], [0, 0, 1, 1], [], []>} : vector<32x8xf32>, vector<8x8xf32>, vector<32x8xf32> -> vector<32x8xf32>
    %390 = arith.addf %385, %389 : vector<32x8xf32>
    %c2_226 = arith.constant 2 : index
    %c0_227 = arith.constant 0 : index
    %c0_228 = arith.constant 0 : index
    %391 = vector.load %arg7[%c2_226, %c0_227, %c0_228] : memref<4x32x8xf32, #tpu.memory_space<vmem>>, vector<1x32x8xf32>
    %392 = vector.shape_cast %391 : vector<1x32x8xf32> to vector<32x8xf32>
    %393 = vector.extract_strided_slice %381 {offsets = [0, 16], sizes = [8, 8], strides = [1, 1]} : vector<8x32xf32> to vector<8x8xf32>
    %cst_229 = arith.constant dense<0.000000e+00> : vector<32x8xf32>
    %394 = tpu.matmul %392, %393, %cst_229 {dimension_numbers = #tpu.dot_dimension_numbers<[1], [0], [0], [1], [0, 0, 1, 1], [], []>} : vector<32x8xf32>, vector<8x8xf32>, vector<32x8xf32> -> vector<32x8xf32>
    %395 = arith.addf %390, %394 : vector<32x8xf32>
    %c3_230 = arith.constant 3 : index
    %c0_231 = arith.constant 0 : index
    %c0_232 = arith.constant 0 : index
    %396 = vector.load %arg7[%c3_230, %c0_231, %c0_232] : memref<4x32x8xf32, #tpu.memory_space<vmem>>, vector<1x32x8xf32>
    %397 = vector.shape_cast %396 : vector<1x32x8xf32> to vector<32x8xf32>
    %398 = vector.extract_strided_slice %381 {offsets = [0, 24], sizes = [8, 8], strides = [1, 1]} : vector<8x32xf32> to vector<8x8xf32>
    %cst_233 = arith.constant dense<0.000000e+00> : vector<32x8xf32>
    %399 = tpu.matmul %397, %398, %cst_233 {dimension_numbers = #tpu.dot_dimension_numbers<[1], [0], [0], [1], [0, 0, 1, 1], [], []>} : vector<32x8xf32>, vector<8x8xf32>, vector<32x8xf32> -> vector<32x8xf32>
    %400 = arith.addf %395, %399 : vector<32x8xf32>
    %401 = vector.extract_strided_slice %360 {offsets = [0, 0], sizes = [8, 8], strides = [1, 1]} : vector<32x8xf32> to vector<8x8xf32>
    %402 = vector.extract_strided_slice %380 {offsets = [0, 0], sizes = [8, 8], strides = [1, 1]} : vector<32x8xf32> to vector<8x8xf32>
    %403 = vector.extract_strided_slice %400 {offsets = [0, 0], sizes = [8, 8], strides = [1, 1]} : vector<32x8xf32> to vector<8x8xf32>
    %cst_234 = arith.constant dense<0.000000e+00> : vector<8x8xf32>
    %404 = tpu.matmul %401, %402, %cst_234 {dimension_numbers = #tpu.dot_dimension_numbers<[1], [1], [0], [0], [0, 0, 1, 0], [], []>} : vector<8x8xf32>, vector<8x8xf32>, vector<8x8xf32> -> vector<8x8xf32>
    %c4_i32_235 = arith.constant 4 : i32
    %405 = arith.muli %arg0, %c4_i32_235 : i32
    %c0_i32_236 = arith.constant 0 : i32
    %406 = arith.addi %405, %c0_i32_236 : i32
    %c2_i32_237 = arith.constant 2 : i32
    %c0_i32_238 = arith.constant 0 : i32
    %407 = arith.cmpi eq, %c2_i32_237, %c0_i32_238 : i32
    %c1_i32_239 = arith.constant 1 : i32
    %408 = arith.select %407, %c1_i32_239, %c2_i32_237 : i32
    %409 = arith.remsi %406, %408 : i32
    %c0_i32_240 = arith.constant 0 : i32
    %410 = arith.cmpi ne, %409, %c0_i32_240 : i32
    %c0_i32_241 = arith.constant 0 : i32
    %411 = arith.cmpi slt, %409, %c0_i32_241 : i32
    %c0_i32_242 = arith.constant 0 : i32
    %412 = arith.cmpi slt, %408, %c0_i32_242 : i32
    %413 = arith.xori %411, %412 : i1
    %414 = arith.andi %413, %410 : i1
    %415 = arith.addi %409, %408 : i32
    %416 = arith.select %414, %415, %409 : i32
    %417 = arith.index_cast %416 : i32 to index
    %418 = memref.load %arg1[%417] : memref<2xi32, #tpu.memory_space<smem>>
    %419 = vector.broadcast %418 : i32 to vector<8x8xi32>
    %420 = arith.cmpi sge, %7, %419 : vector<8x8xi32>
    %cst_243 = arith.constant -1.000000e+30 : f32
    %421 = vector.broadcast %cst_243 : f32 to vector<8x8xf32>
    %422 = arith.select %420, %421, %404 : vector<8x8xi1>, vector<8x8xf32>
    %cst_244 = arith.constant dense<0xFF800000> : vector<8xf32>
    %423 = vector.multi_reduction <maximumf>, %422, %cst_244 [1] : vector<8x8xf32> to vector<8xf32>
    %424 = vector.shape_cast %423 : vector<8xf32> to vector<8x1xf32>
    %425 = vector.broadcast %424 : vector<8x1xf32> to vector<8x8xf32>
    %426 = arith.subf %422, %425 : vector<8x8xf32>
    %427 = math.exp %426 : vector<8x8xf32>
    %cst_245 = arith.constant dense<0.000000e+00> : vector<8xf32>
    %428 = vector.multi_reduction <add>, %427, %cst_245 [1] : vector<8x8xf32> to vector<8xf32>
    %429 = vector.shape_cast %428 : vector<8xf32> to vector<8x1xf32>
    %430 = tpu.reciprocal %429 {approx = true} : vector<8x1xf32> -> vector<8x1xf32>
    %431 = vector.broadcast %430 : vector<8x1xf32> to vector<8x8xf32>
    %432 = arith.mulf %427, %431 : vector<8x8xf32>
    %cst_246 = arith.constant dense<0.000000e+00> : vector<8x8xf32>
    %433 = tpu.matmul %432, %403, %cst_246 {dimension_numbers = #tpu.dot_dimension_numbers<[1], [0], [0], [1], [0, 0, 1, 1], [], []>} : vector<8x8xf32>, vector<8x8xf32>, vector<8x8xf32> -> vector<8x8xf32>
    %434 = vector.extract_strided_slice %360 {offsets = [8, 0], sizes = [8, 8], strides = [1, 1]} : vector<32x8xf32> to vector<8x8xf32>
    %435 = vector.extract_strided_slice %380 {offsets = [8, 0], sizes = [8, 8], strides = [1, 1]} : vector<32x8xf32> to vector<8x8xf32>
    %436 = vector.extract_strided_slice %400 {offsets = [8, 0], sizes = [8, 8], strides = [1, 1]} : vector<32x8xf32> to vector<8x8xf32>
    %cst_247 = arith.constant dense<0.000000e+00> : vector<8x8xf32>
    %437 = tpu.matmul %434, %435, %cst_247 {dimension_numbers = #tpu.dot_dimension_numbers<[1], [1], [0], [0], [0, 0, 1, 0], [], []>} : vector<8x8xf32>, vector<8x8xf32>, vector<8x8xf32> -> vector<8x8xf32>
    %c4_i32_248 = arith.constant 4 : i32
    %438 = arith.muli %arg0, %c4_i32_248 : i32
    %c1_i32_249 = arith.constant 1 : i32
    %439 = arith.addi %438, %c1_i32_249 : i32
    %c2_i32_250 = arith.constant 2 : i32
    %c0_i32_251 = arith.constant 0 : i32
    %440 = arith.cmpi eq, %c2_i32_250, %c0_i32_251 : i32
    %c1_i32_252 = arith.constant 1 : i32
    %441 = arith.select %440, %c1_i32_252, %c2_i32_250 : i32
    %442 = arith.remsi %439, %441 : i32
    %c0_i32_253 = arith.constant 0 : i32
    %443 = arith.cmpi ne, %442, %c0_i32_253 : i32
    %c0_i32_254 = arith.constant 0 : i32
    %444 = arith.cmpi slt, %442, %c0_i32_254 : i32
    %c0_i32_255 = arith.constant 0 : i32
    %445 = arith.cmpi slt, %441, %c0_i32_255 : i32
    %446 = arith.xori %444, %445 : i1
    %447 = arith.andi %446, %443 : i1
    %448 = arith.addi %442, %441 : i32
    %449 = arith.select %447, %448, %442 : i32
    %450 = arith.index_cast %449 : i32 to index
    %451 = memref.load %arg1[%450] : memref<2xi32, #tpu.memory_space<smem>>
    %452 = vector.broadcast %451 : i32 to vector<8x8xi32>
    %453 = arith.cmpi sge, %7, %452 : vector<8x8xi32>
    %cst_256 = arith.constant -1.000000e+30 : f32
    %454 = vector.broadcast %cst_256 : f32 to vector<8x8xf32>
    %455 = arith.select %453, %454, %437 : vector<8x8xi1>, vector<8x8xf32>
    %cst_257 = arith.constant dense<0xFF800000> : vector<8xf32>
    %456 = vector.multi_reduction <maximumf>, %455, %cst_257 [1] : vector<8x8xf32> to vector<8xf32>
    %457 = vector.shape_cast %456 : vector<8xf32> to vector<8x1xf32>
    %458 = vector.broadcast %457 : vector<8x1xf32> to vector<8x8xf32>
    %459 = arith.subf %455, %458 : vector<8x8xf32>
    %460 = math.exp %459 : vector<8x8xf32>
    %cst_258 = arith.constant dense<0.000000e+00> : vector<8xf32>
    %461 = vector.multi_reduction <add>, %460, %cst_258 [1] : vector<8x8xf32> to vector<8xf32>
    %462 = vector.shape_cast %461 : vector<8xf32> to vector<8x1xf32>
    %463 = tpu.reciprocal %462 {approx = true} : vector<8x1xf32> -> vector<8x1xf32>
    %464 = vector.broadcast %463 : vector<8x1xf32> to vector<8x8xf32>
    %465 = arith.mulf %460, %464 : vector<8x8xf32>
    %cst_259 = arith.constant dense<0.000000e+00> : vector<8x8xf32>
    %466 = tpu.matmul %465, %436, %cst_259 {dimension_numbers = #tpu.dot_dimension_numbers<[1], [0], [0], [1], [0, 0, 1, 1], [], []>} : vector<8x8xf32>, vector<8x8xf32>, vector<8x8xf32> -> vector<8x8xf32>
    %467 = vector.extract_strided_slice %360 {offsets = [16, 0], sizes = [8, 8], strides = [1, 1]} : vector<32x8xf32> to vector<8x8xf32>
    %468 = vector.extract_strided_slice %380 {offsets = [16, 0], sizes = [8, 8], strides = [1, 1]} : vector<32x8xf32> to vector<8x8xf32>
    %469 = vector.extract_strided_slice %400 {offsets = [16, 0], sizes = [8, 8], strides = [1, 1]} : vector<32x8xf32> to vector<8x8xf32>
    %cst_260 = arith.constant dense<0.000000e+00> : vector<8x8xf32>
    %470 = tpu.matmul %467, %468, %cst_260 {dimension_numbers = #tpu.dot_dimension_numbers<[1], [1], [0], [0], [0, 0, 1, 0], [], []>} : vector<8x8xf32>, vector<8x8xf32>, vector<8x8xf32> -> vector<8x8xf32>
    %c4_i32_261 = arith.constant 4 : i32
    %471 = arith.muli %arg0, %c4_i32_261 : i32
    %c2_i32_262 = arith.constant 2 : i32
    %472 = arith.addi %471, %c2_i32_262 : i32
    %c2_i32_263 = arith.constant 2 : i32
    %c0_i32_264 = arith.constant 0 : i32
    %473 = arith.cmpi eq, %c2_i32_263, %c0_i32_264 : i32
    %c1_i32_265 = arith.constant 1 : i32
    %474 = arith.select %473, %c1_i32_265, %c2_i32_263 : i32
    %475 = arith.remsi %472, %474 : i32
    %c0_i32_266 = arith.constant 0 : i32
    %476 = arith.cmpi ne, %475, %c0_i32_266 : i32
    %c0_i32_267 = arith.constant 0 : i32
    %477 = arith.cmpi slt, %475, %c0_i32_267 : i32
    %c0_i32_268 = arith.constant 0 : i32
    %478 = arith.cmpi slt, %474, %c0_i32_268 : i32
    %479 = arith.xori %477, %478 : i1
    %480 = arith.andi %479, %476 : i1
    %481 = arith.addi %475, %474 : i32
    %482 = arith.select %480, %481, %475 : i32
    %483 = arith.index_cast %482 : i32 to index
    %484 = memref.load %arg1[%483] : memref<2xi32, #tpu.memory_space<smem>>
    %485 = vector.broadcast %484 : i32 to vector<8x8xi32>
    %486 = arith.cmpi sge, %7, %485 : vector<8x8xi32>
    %cst_269 = arith.constant -1.000000e+30 : f32
    %487 = vector.broadcast %cst_269 : f32 to vector<8x8xf32>
    %488 = arith.select %486, %487, %470 : vector<8x8xi1>, vector<8x8xf32>
    %cst_270 = arith.constant dense<0xFF800000> : vector<8xf32>
    %489 = vector.multi_reduction <maximumf>, %488, %cst_270 [1] : vector<8x8xf32> to vector<8xf32>
    %490 = vector.shape_cast %489 : vector<8xf32> to vector<8x1xf32>
    %491 = vector.broadcast %490 : vector<8x1xf32> to vector<8x8xf32>
    %492 = arith.subf %488, %491 : vector<8x8xf32>
    %493 = math.exp %492 : vector<8x8xf32>
    %cst_271 = arith.constant dense<0.000000e+00> : vector<8xf32>
    %494 = vector.multi_reduction <add>, %493, %cst_271 [1] : vector<8x8xf32> to vector<8xf32>
    %495 = vector.shape_cast %494 : vector<8xf32> to vector<8x1xf32>
    %496 = tpu.reciprocal %495 {approx = true} : vector<8x1xf32> -> vector<8x1xf32>
    %497 = vector.broadcast %496 : vector<8x1xf32> to vector<8x8xf32>
    %498 = arith.mulf %493, %497 : vector<8x8xf32>
    %cst_272 = arith.constant dense<0.000000e+00> : vector<8x8xf32>
    %499 = tpu.matmul %498, %469, %cst_272 {dimension_numbers = #tpu.dot_dimension_numbers<[1], [0], [0], [1], [0, 0, 1, 1], [], []>} : vector<8x8xf32>, vector<8x8xf32>, vector<8x8xf32> -> vector<8x8xf32>
    %500 = vector.extract_strided_slice %360 {offsets = [24, 0], sizes = [8, 8], strides = [1, 1]} : vector<32x8xf32> to vector<8x8xf32>
    %501 = vector.extract_strided_slice %380 {offsets = [24, 0], sizes = [8, 8], strides = [1, 1]} : vector<32x8xf32> to vector<8x8xf32>
    %502 = vector.extract_strided_slice %400 {offsets = [24, 0], sizes = [8, 8], strides = [1, 1]} : vector<32x8xf32> to vector<8x8xf32>
    %cst_273 = arith.constant dense<0.000000e+00> : vector<8x8xf32>
    %503 = tpu.matmul %500, %501, %cst_273 {dimension_numbers = #tpu.dot_dimension_numbers<[1], [1], [0], [0], [0, 0, 1, 0], [], []>} : vector<8x8xf32>, vector<8x8xf32>, vector<8x8xf32> -> vector<8x8xf32>
    %c4_i32_274 = arith.constant 4 : i32
    %504 = arith.muli %arg0, %c4_i32_274 : i32
    %c3_i32_275 = arith.constant 3 : i32
    %505 = arith.addi %504, %c3_i32_275 : i32
    %c2_i32_276 = arith.constant 2 : i32
    %c0_i32_277 = arith.constant 0 : i32
    %506 = arith.cmpi eq, %c2_i32_276, %c0_i32_277 : i32
    %c1_i32_278 = arith.constant 1 : i32
    %507 = arith.select %506, %c1_i32_278, %c2_i32_276 : i32
    %508 = arith.remsi %505, %507 : i32
    %c0_i32_279 = arith.constant 0 : i32
    %509 = arith.cmpi ne, %508, %c0_i32_279 : i32
    %c0_i32_280 = arith.constant 0 : i32
    %510 = arith.cmpi slt, %508, %c0_i32_280 : i32
    %c0_i32_281 = arith.constant 0 : i32
    %511 = arith.cmpi slt, %507, %c0_i32_281 : i32
    %512 = arith.xori %510, %511 : i1
    %513 = arith.andi %512, %509 : i1
    %514 = arith.addi %508, %507 : i32
    %515 = arith.select %513, %514, %508 : i32
    %516 = arith.index_cast %515 : i32 to index
    %517 = memref.load %arg1[%516] : memref<2xi32, #tpu.memory_space<smem>>
    %518 = vector.broadcast %517 : i32 to vector<8x8xi32>
    %519 = arith.cmpi sge, %7, %518 : vector<8x8xi32>
    %cst_282 = arith.constant -1.000000e+30 : f32
    %520 = vector.broadcast %cst_282 : f32 to vector<8x8xf32>
    %521 = arith.select %519, %520, %503 : vector<8x8xi1>, vector<8x8xf32>
    %cst_283 = arith.constant dense<0xFF800000> : vector<8xf32>
    %522 = vector.multi_reduction <maximumf>, %521, %cst_283 [1] : vector<8x8xf32> to vector<8xf32>
    %523 = vector.shape_cast %522 : vector<8xf32> to vector<8x1xf32>
    %524 = vector.broadcast %523 : vector<8x1xf32> to vector<8x8xf32>
    %525 = arith.subf %521, %524 : vector<8x8xf32>
    %526 = math.exp %525 : vector<8x8xf32>
    %cst_284 = arith.constant dense<0.000000e+00> : vector<8xf32>
    %527 = vector.multi_reduction <add>, %526, %cst_284 [1] : vector<8x8xf32> to vector<8xf32>
    %528 = vector.shape_cast %527 : vector<8xf32> to vector<8x1xf32>
    %529 = tpu.reciprocal %528 {approx = true} : vector<8x1xf32> -> vector<8x1xf32>
    %530 = vector.broadcast %529 : vector<8x1xf32> to vector<8x8xf32>
    %531 = arith.mulf %526, %530 : vector<8x8xf32>
    %cst_285 = arith.constant dense<0.000000e+00> : vector<8x8xf32>
    %532 = tpu.matmul %531, %502, %cst_285 {dimension_numbers = #tpu.dot_dimension_numbers<[1], [0], [0], [1], [0, 0, 1, 1], [], []>} : vector<8x8xf32>, vector<8x8xf32>, vector<8x8xf32> -> vector<8x8xf32>
    %533 = tpu.concatenate %433, %466, %499, %532 in 0 : vector<8x8xf32>, vector<8x8xf32>, vector<8x8xf32>, vector<8x8xf32> -> vector<32x8xf32>
    %c0_286 = arith.constant 0 : index
    %c0_287 = arith.constant 0 : index
    %c0_288 = arith.constant 0 : index
    %534 = vector.load %arg8[%c0_286, %c0_287, %c0_288] : memref<4x8x32xf32, #tpu.memory_space<vmem>>, vector<1x8x32xf32>
    %535 = vector.shape_cast %534 : vector<1x8x32xf32> to vector<8x32xf32>
    %cst_289 = arith.constant dense<0.000000e+00> : vector<8x8xf32>
    %536 = tpu.matmul %535, %533, %cst_289 {dimension_numbers = #tpu.dot_dimension_numbers<[1], [0], [0], [1], [0, 0, 1, 1], [], []>} : vector<8x32xf32>, vector<32x8xf32>, vector<8x8xf32> -> vector<8x8xf32>
    %c1_290 = arith.constant 1 : index
    %c0_291 = arith.constant 0 : index
    %c0_292 = arith.constant 0 : index
    %537 = vector.load %arg8[%c1_290, %c0_291, %c0_292] : memref<4x8x32xf32, #tpu.memory_space<vmem>>, vector<1x8x32xf32>
    %538 = vector.shape_cast %537 : vector<1x8x32xf32> to vector<8x32xf32>
    %cst_293 = arith.constant dense<0.000000e+00> : vector<8x8xf32>
    %539 = tpu.matmul %538, %533, %cst_293 {dimension_numbers = #tpu.dot_dimension_numbers<[1], [0], [0], [1], [0, 0, 1, 1], [], []>} : vector<8x32xf32>, vector<32x8xf32>, vector<8x8xf32> -> vector<8x8xf32>
    %c2_294 = arith.constant 2 : index
    %c0_295 = arith.constant 0 : index
    %c0_296 = arith.constant 0 : index
    %540 = vector.load %arg8[%c2_294, %c0_295, %c0_296] : memref<4x8x32xf32, #tpu.memory_space<vmem>>, vector<1x8x32xf32>
    %541 = vector.shape_cast %540 : vector<1x8x32xf32> to vector<8x32xf32>
    %cst_297 = arith.constant dense<0.000000e+00> : vector<8x8xf32>
    %542 = tpu.matmul %541, %533, %cst_297 {dimension_numbers = #tpu.dot_dimension_numbers<[1], [0], [0], [1], [0, 0, 1, 1], [], []>} : vector<8x32xf32>, vector<32x8xf32>, vector<8x8xf32> -> vector<8x8xf32>
    %c3_298 = arith.constant 3 : index
    %c0_299 = arith.constant 0 : index
    %c0_300 = arith.constant 0 : index
    %543 = vector.load %arg8[%c3_298, %c0_299, %c0_300] : memref<4x8x32xf32, #tpu.memory_space<vmem>>, vector<1x8x32xf32>
    %544 = vector.shape_cast %543 : vector<1x8x32xf32> to vector<8x32xf32>
    %cst_301 = arith.constant dense<0.000000e+00> : vector<8x8xf32>
    %545 = tpu.matmul %544, %533, %cst_301 {dimension_numbers = #tpu.dot_dimension_numbers<[1], [0], [0], [1], [0, 0, 1, 1], [], []>} : vector<8x32xf32>, vector<32x8xf32>, vector<8x8xf32> -> vector<8x8xf32>
    %546 = tpu.concatenate %536, %539, %542, %545 in 1 : vector<8x8xf32>, vector<8x8xf32>, vector<8x8xf32>, vector<8x8xf32> -> vector<8x32xf32>
    %c1_302 = arith.constant 1 : index
    %c0_303 = arith.constant 0 : index
    %c0_304 = arith.constant 0 : index
    %547 = vector.load %arg16[%c1_302, %c0_303, %c0_304] : memref<2x32x32xf32, #tpu.memory_space<vmem>>, vector<1x32x32xf32>
    %548 = vector.shape_cast %547 : vector<1x32x32xf32> to vector<32x32xf32>
    %cst_305 = arith.constant dense<0.000000e+00> : vector<8x32xf32>
    %549 = tpu.matmul %546, %548, %cst_305 {dimension_numbers = #tpu.dot_dimension_numbers<[1], [0], [0], [1], [0, 0, 1, 1], [], []>} : vector<8x32xf32>, vector<32x32xf32>, vector<8x32xf32> -> vector<8x32xf32>
    %c1_306 = arith.constant 1 : index
    %c0_307 = arith.constant 0 : index
    %c0_308 = arith.constant 0 : index
    %550 = vector.load %arg17[%c1_306, %c0_307, %c0_308] : memref<2x1x32xf32, #tpu.memory_space<vmem>>, vector<1x1x32xf32>
    %551 = vector.shape_cast %550 : vector<1x1x32xf32> to vector<1x32xf32>
    %552 = vector.broadcast %551 : vector<1x32xf32> to vector<8x32xf32>
    %553 = arith.addf %549, %552 : vector<8x32xf32>
    %554 = arith.addf %331, %553 : vector<8x32xf32>
    %c1_309 = arith.constant 1 : index
    %c0_310 = arith.constant 0 : index
    %c0_311 = arith.constant 0 : index
    %555 = vector.load %arg18[%c1_309, %c0_310, %c0_311] : memref<2x1x32xf32, #tpu.memory_space<vmem>>, vector<1x1x32xf32>
    %556 = vector.shape_cast %555 : vector<1x1x32xf32> to vector<1x32xf32>
    %c1_312 = arith.constant 1 : index
    %c0_313 = arith.constant 0 : index
    %c0_314 = arith.constant 0 : index
    %557 = vector.load %arg19[%c1_312, %c0_313, %c0_314] : memref<2x1x32xf32, #tpu.memory_space<vmem>>, vector<1x1x32xf32>
    %558 = vector.shape_cast %557 : vector<1x1x32xf32> to vector<1x32xf32>
    %cst_315 = arith.constant dense<0.000000e+00> : vector<8xf32>
    %559 = vector.multi_reduction <add>, %554, %cst_315 [1] : vector<8x32xf32> to vector<8xf32>
    %560 = vector.shape_cast %559 : vector<8xf32> to vector<8x1xf32>
    %cst_316 = arith.constant 3.200000e+01 : f32
    %561 = vector.broadcast %cst_316 : f32 to vector<8x1xf32>
    %562 = arith.divf %560, %561 : vector<8x1xf32>
    %563 = vector.broadcast %562 : vector<8x1xf32> to vector<8x32xf32>
    %564 = arith.subf %554, %563 : vector<8x32xf32>
    %565 = vector.broadcast %562 : vector<8x1xf32> to vector<8x32xf32>
    %566 = arith.subf %554, %565 : vector<8x32xf32>
    %567 = arith.mulf %564, %566 : vector<8x32xf32>
    %cst_317 = arith.constant dense<0.000000e+00> : vector<8xf32>
    %568 = vector.multi_reduction <add>, %567, %cst_317 [1] : vector<8x32xf32> to vector<8xf32>
    %569 = vector.shape_cast %568 : vector<8xf32> to vector<8x1xf32>
    %cst_318 = arith.constant 3.200000e+01 : f32
    %570 = vector.broadcast %cst_318 : f32 to vector<8x1xf32>
    %571 = arith.divf %569, %570 : vector<8x1xf32>
    %572 = vector.broadcast %562 : vector<8x1xf32> to vector<8x32xf32>
    %573 = arith.subf %554, %572 : vector<8x32xf32>
    %cst_319 = arith.constant 9.99999974E-6 : f32
    %574 = vector.broadcast %cst_319 : f32 to vector<8x1xf32>
    %575 = arith.addf %571, %574 : vector<8x1xf32>
    %576 = math.rsqrt %575 : vector<8x1xf32>
    %577 = vector.broadcast %576 : vector<8x1xf32> to vector<8x32xf32>
    %578 = arith.mulf %573, %577 : vector<8x32xf32>
    %579 = vector.broadcast %556 : vector<1x32xf32> to vector<8x32xf32>
    %580 = arith.mulf %578, %579 : vector<8x32xf32>
    %581 = vector.broadcast %558 : vector<1x32xf32> to vector<8x32xf32>
    %582 = arith.addf %580, %581 : vector<8x32xf32>
    %c1_320 = arith.constant 1 : index
    %c0_321 = arith.constant 0 : index
    %c0_322 = arith.constant 0 : index
    %583 = vector.load %arg20[%c1_320, %c0_321, %c0_322] : memref<2x32x64xf32, #tpu.memory_space<vmem>>, vector<1x32x64xf32>
    %584 = vector.shape_cast %583 : vector<1x32x64xf32> to vector<32x64xf32>
    %cst_323 = arith.constant dense<0.000000e+00> : vector<8x64xf32>
    %585 = tpu.matmul %582, %584, %cst_323 {dimension_numbers = #tpu.dot_dimension_numbers<[1], [0], [0], [1], [0, 0, 1, 1], [], []>} : vector<8x32xf32>, vector<32x64xf32>, vector<8x64xf32> -> vector<8x64xf32>
    %c1_324 = arith.constant 1 : index
    %c0_325 = arith.constant 0 : index
    %c0_326 = arith.constant 0 : index
    %586 = vector.load %arg21[%c1_324, %c0_325, %c0_326] : memref<2x1x64xf32, #tpu.memory_space<vmem>>, vector<1x1x64xf32>
    %587 = vector.shape_cast %586 : vector<1x1x64xf32> to vector<1x64xf32>
    %588 = vector.broadcast %587 : vector<1x64xf32> to vector<8x64xf32>
    %589 = arith.addf %585, %588 : vector<8x64xf32>
    %cst_327 = arith.constant 0.000000e+00 : f32
    %590 = vector.broadcast %cst_327 : f32 to vector<8x64xf32>
    %591 = arith.maximumf %589, %590 : vector<8x64xf32>
    %c1_328 = arith.constant 1 : index
    %c0_329 = arith.constant 0 : index
    %c0_330 = arith.constant 0 : index
    %592 = vector.load %arg22[%c1_328, %c0_329, %c0_330] : memref<2x64x32xf32, #tpu.memory_space<vmem>>, vector<1x64x32xf32>
    %593 = vector.shape_cast %592 : vector<1x64x32xf32> to vector<64x32xf32>
    %cst_331 = arith.constant dense<0.000000e+00> : vector<8x32xf32>
    %594 = tpu.matmul %591, %593, %cst_331 {dimension_numbers = #tpu.dot_dimension_numbers<[1], [0], [0], [1], [0, 0, 1, 1], [], []>} : vector<8x64xf32>, vector<64x32xf32>, vector<8x32xf32> -> vector<8x32xf32>
    %c1_332 = arith.constant 1 : index
    %c0_333 = arith.constant 0 : index
    %c0_334 = arith.constant 0 : index
    %595 = vector.load %arg23[%c1_332, %c0_333, %c0_334] : memref<2x1x32xf32, #tpu.memory_space<vmem>>, vector<1x1x32xf32>
    %596 = vector.shape_cast %595 : vector<1x1x32xf32> to vector<1x32xf32>
    %597 = vector.broadcast %596 : vector<1x32xf32> to vector<8x32xf32>
    %598 = arith.addf %594, %597 : vector<8x32xf32>
    %599 = arith.addf %582, %598 : vector<8x32xf32>
    %c1_335 = arith.constant 1 : index
    %c0_336 = arith.constant 0 : index
    %c0_337 = arith.constant 0 : index
    %600 = vector.load %arg24[%c1_335, %c0_336, %c0_337] : memref<2x1x32xf32, #tpu.memory_space<vmem>>, vector<1x1x32xf32>
    %601 = vector.shape_cast %600 : vector<1x1x32xf32> to vector<1x32xf32>
    %c1_338 = arith.constant 1 : index
    %c0_339 = arith.constant 0 : index
    %c0_340 = arith.constant 0 : index
    %602 = vector.load %arg25[%c1_338, %c0_339, %c0_340] : memref<2x1x32xf32, #tpu.memory_space<vmem>>, vector<1x1x32xf32>
    %603 = vector.shape_cast %602 : vector<1x1x32xf32> to vector<1x32xf32>
    %cst_341 = arith.constant dense<0.000000e+00> : vector<8xf32>
    %604 = vector.multi_reduction <add>, %599, %cst_341 [1] : vector<8x32xf32> to vector<8xf32>
    %605 = vector.shape_cast %604 : vector<8xf32> to vector<8x1xf32>
    %cst_342 = arith.constant 3.200000e+01 : f32
    %606 = vector.broadcast %cst_342 : f32 to vector<8x1xf32>
    %607 = arith.divf %605, %606 : vector<8x1xf32>
    %608 = vector.broadcast %607 : vector<8x1xf32> to vector<8x32xf32>
    %609 = arith.subf %599, %608 : vector<8x32xf32>
    %610 = vector.broadcast %607 : vector<8x1xf32> to vector<8x32xf32>
    %611 = arith.subf %599, %610 : vector<8x32xf32>
    %612 = arith.mulf %609, %611 : vector<8x32xf32>
    %cst_343 = arith.constant dense<0.000000e+00> : vector<8xf32>
    %613 = vector.multi_reduction <add>, %612, %cst_343 [1] : vector<8x32xf32> to vector<8xf32>
    %614 = vector.shape_cast %613 : vector<8xf32> to vector<8x1xf32>
    %cst_344 = arith.constant 3.200000e+01 : f32
    %615 = vector.broadcast %cst_344 : f32 to vector<8x1xf32>
    %616 = arith.divf %614, %615 : vector<8x1xf32>
    %617 = vector.broadcast %607 : vector<8x1xf32> to vector<8x32xf32>
    %618 = arith.subf %599, %617 : vector<8x32xf32>
    %cst_345 = arith.constant 9.99999974E-6 : f32
    %619 = vector.broadcast %cst_345 : f32 to vector<8x1xf32>
    %620 = arith.addf %616, %619 : vector<8x1xf32>
    %621 = math.rsqrt %620 : vector<8x1xf32>
    %622 = vector.broadcast %621 : vector<8x1xf32> to vector<8x32xf32>
    %623 = arith.mulf %618, %622 : vector<8x32xf32>
    %624 = vector.broadcast %601 : vector<1x32xf32> to vector<8x32xf32>
    %625 = arith.mulf %623, %624 : vector<8x32xf32>
    %626 = vector.broadcast %603 : vector<1x32xf32> to vector<8x32xf32>
    %627 = arith.addf %625, %626 : vector<8x32xf32>
    %c0_346 = arith.constant 0 : index
    %c0_347 = arith.constant 0 : index
    %628 = vector.load %arg26[%c0_346, %c0_347] : memref<1x16xf32, #tpu.memory_space<vmem>>, vector<1x16xf32>
    %629 = vector.broadcast %9 : vector<8x1xf32> to vector<8x16xf32>
    %630 = vector.broadcast %628 : vector<1x16xf32> to vector<8x16xf32>
    %631 = arith.mulf %629, %630 : vector<8x16xf32>
    %c0_348 = arith.constant 0 : index
    %c0_349 = arith.constant 0 : index
    %632 = vector.load %arg27[%c0_348, %c0_349] : memref<1x16xf32, #tpu.memory_space<vmem>>, vector<1x16xf32>
    %633 = vector.broadcast %632 : vector<1x16xf32> to vector<8x16xf32>
    %634 = arith.addf %631, %633 : vector<8x16xf32>
    %635 = arith.mulf %634, %634 : vector<8x16xf32>
    %636 = math.tanh %635 : vector<8x16xf32>
    %cst_350 = arith.constant 1.000000e+00 : f32
    %637 = vector.broadcast %cst_350 : f32 to vector<8x16xf32>
    %638 = arith.subf %637, %636 : vector<8x16xf32>
    %c0_351 = arith.constant 0 : index
    %c0_352 = arith.constant 0 : index
    %639 = vector.load %arg28[%c0_351, %c0_352] : memref<16x8xf32, #tpu.memory_space<vmem>>, vector<16x8xf32>
    %cst_353 = arith.constant dense<0.000000e+00> : vector<8x8xf32>
    %640 = tpu.matmul %638, %639, %cst_353 {dimension_numbers = #tpu.dot_dimension_numbers<[1], [0], [0], [1], [0, 0, 1, 1], [], []>} : vector<8x16xf32>, vector<16x8xf32>, vector<8x8xf32> -> vector<8x8xf32>
    %c0_354 = arith.constant 0 : index
    %c0_355 = arith.constant 0 : index
    %641 = vector.load %arg29[%c0_354, %c0_355] : memref<1x8xf32, #tpu.memory_space<vmem>>, vector<1x8xf32>
    %642 = vector.broadcast %641 : vector<1x8xf32> to vector<8x8xf32>
    %643 = arith.addf %640, %642 : vector<8x8xf32>
    %cst_356 = arith.constant 0.000000e+00 : f32
    %644 = vector.broadcast %cst_356 : f32 to vector<8x8xf32>
    %645 = arith.maximumf %643, %644 : vector<8x8xf32>
    %c0_357 = arith.constant 0 : index
    %c0_358 = arith.constant 0 : index
    %c0_359 = arith.constant 0 : index
    %646 = vector.load %arg4[%c0_357, %c0_358, %c0_359] : memref<1x8x1xf32, #tpu.memory_space<vmem>>, vector<1x8x1xf32>
    %647 = vector.shape_cast %646 : vector<1x8x1xf32> to vector<8x1xf32>
    %c0_360 = arith.constant 0 : index
    %c0_361 = arith.constant 0 : index
    %c0_362 = arith.constant 0 : index
    %648 = vector.load %arg5[%c0_360, %c0_361, %c0_362] : memref<1x8x1xf32, #tpu.memory_space<vmem>>, vector<1x8x1xf32>
    %649 = vector.shape_cast %648 : vector<1x8x1xf32> to vector<8x1xf32>
    %cst_363 = arith.constant 5.000000e-01 : f32
    %650 = vector.broadcast %cst_363 : f32 to vector<8x1xf32>
    %651 = arith.cmpf ogt, %647, %650 : vector<8x1xf32>
    %c0_364 = arith.constant 0 : index
    %c0_365 = arith.constant 0 : index
    %652 = vector.load %arg31[%c0_364, %c0_365] : memref<1x11xf32, #tpu.memory_space<vmem>>, vector<1x11xf32>
    %c0_366 = arith.constant 0 : index
    %c0_367 = arith.constant 0 : index
    %653 = vector.load %arg30[%c0_366, %c0_367] : memref<32x11xf32, #tpu.memory_space<vmem>>, vector<32x11xf32>
    %cst_368 = arith.constant dense<0.000000e+00> : vector<8x11xf32>
    %654 = tpu.matmul %627, %653, %cst_368 {dimension_numbers = #tpu.dot_dimension_numbers<[1], [0], [0], [1], [0, 0, 1, 1], [], []>} : vector<8x32xf32>, vector<32x11xf32>, vector<8x11xf32> -> vector<8x11xf32>
    %655 = vector.broadcast %649 : vector<8x1xf32> to vector<8x11xf32>
    %656 = arith.mulf %654, %655 : vector<8x11xf32>
    %cst_369 = arith.constant dense<0.000000e+00> : vector<11xf32>
    %657 = vector.multi_reduction <add>, %656, %cst_369 [0] : vector<8x11xf32> to vector<11xf32>
    %658 = vector.shape_cast %657 : vector<11xf32> to vector<1x11xf32>
    %659 = arith.addf %658, %652 : vector<1x11xf32>
    %660 = vector.extract_strided_slice %654 {offsets = [0, 0], sizes = [8, 1], strides = [1, 1]} : vector<8x11xf32> to vector<8x1xf32>
    %661 = vector.extract_strided_slice %652 {offsets = [0, 0], sizes = [1, 1], strides = [1, 1]} : vector<1x11xf32> to vector<1x1xf32>
    %662 = vector.broadcast %661 : vector<1x1xf32> to vector<8x1xf32>
    %663 = arith.addf %660, %662 : vector<8x1xf32>
    %664 = vector.extract_strided_slice %659 {offsets = [0, 1], sizes = [1, 8], strides = [1, 1]} : vector<1x11xf32> to vector<1x8xf32>
    %cst_370 = arith.constant 0.000000e+00 : f32
    %665 = vector.broadcast %cst_370 : f32 to vector<1x8xf32>
    %666 = arith.maximumf %664, %665 : vector<1x8xf32>
    %667 = vector.extract_strided_slice %659 {offsets = [0, 9], sizes = [1, 2], strides = [1, 1]} : vector<1x11xf32> to vector<1x2xf32>
    %cst_371 = arith.constant -1.000000e+30 : f32
    %668 = vector.broadcast %cst_371 : f32 to vector<8x1xf32>
    %669 = arith.select %651, %668, %663 : vector<8x1xi1>, vector<8x1xf32>
    %cst_372 = arith.constant dense<0xFF800000> : vector<1xf32>
    %670 = vector.multi_reduction <maximumf>, %669, %cst_372 [0] : vector<8x1xf32> to vector<1xf32>
    %671 = vector.shape_cast %670 : vector<1xf32> to vector<1x1xf32>
    %672 = vector.broadcast %671 : vector<1x1xf32> to vector<8x1xf32>
    %673 = arith.subf %669, %672 : vector<8x1xf32>
    %674 = math.exp %673 : vector<8x1xf32>
    %cst_373 = arith.constant dense<0.000000e+00> : vector<1xf32>
    %675 = vector.multi_reduction <add>, %674, %cst_373 [0] : vector<8x1xf32> to vector<1xf32>
    %676 = vector.shape_cast %675 : vector<1xf32> to vector<1x1xf32>
    %677 = tpu.reciprocal %676 {approx = true} : vector<1x1xf32> -> vector<1x1xf32>
    %678 = vector.broadcast %677 : vector<1x1xf32> to vector<8x1xf32>
    %679 = arith.mulf %674, %678 : vector<8x1xf32>
    %680 = vector.broadcast %666 : vector<1x8xf32> to vector<8x8xf32>
    %681 = arith.mulf %645, %680 : vector<8x8xf32>
    %cst_374 = arith.constant dense<0.000000e+00> : vector<8xf32>
    %682 = vector.multi_reduction <add>, %681, %cst_374 [1] : vector<8x8xf32> to vector<8xf32>
    %683 = vector.shape_cast %682 : vector<8xf32> to vector<8x1xf32>
    %cst_375 = arith.constant 0.353553385 : f32
    %684 = vector.broadcast %cst_375 : f32 to vector<8x1xf32>
    %685 = arith.mulf %683, %684 : vector<8x1xf32>
    %cst_376 = arith.constant -1.000000e+30 : f32
    %686 = vector.broadcast %cst_376 : f32 to vector<8x1xf32>
    %687 = arith.select %651, %686, %685 : vector<8x1xi1>, vector<8x1xf32>
    %cst_377 = arith.constant dense<0xFF800000> : vector<1xf32>
    %688 = vector.multi_reduction <maximumf>, %687, %cst_377 [0] : vector<8x1xf32> to vector<1xf32>
    %689 = vector.shape_cast %688 : vector<1xf32> to vector<1x1xf32>
    %690 = vector.broadcast %689 : vector<1x1xf32> to vector<8x1xf32>
    %691 = arith.subf %687, %690 : vector<8x1xf32>
    %692 = math.exp %691 : vector<8x1xf32>
    %cst_378 = arith.constant dense<0.000000e+00> : vector<1xf32>
    %693 = vector.multi_reduction <add>, %692, %cst_378 [0] : vector<8x1xf32> to vector<1xf32>
    %694 = vector.shape_cast %693 : vector<1xf32> to vector<1x1xf32>
    %695 = tpu.reciprocal %694 {approx = true} : vector<1x1xf32> -> vector<1x1xf32>
    %696 = vector.broadcast %695 : vector<1x1xf32> to vector<8x1xf32>
    %697 = arith.mulf %692, %696 : vector<8x1xf32>
    %cst_379 = arith.constant dense<0xFF800000> : vector<1xf32>
    %698 = vector.multi_reduction <maximumf>, %667, %cst_379 [1] : vector<1x2xf32> to vector<1xf32>
    %699 = vector.shape_cast %698 : vector<1xf32> to vector<1x1xf32>
    %700 = vector.broadcast %699 : vector<1x1xf32> to vector<1x2xf32>
    %701 = arith.subf %667, %700 : vector<1x2xf32>
    %702 = math.exp %701 : vector<1x2xf32>
    %cst_380 = arith.constant dense<0.000000e+00> : vector<1xf32>
    %703 = vector.multi_reduction <add>, %702, %cst_380 [1] : vector<1x2xf32> to vector<1xf32>
    %704 = vector.shape_cast %703 : vector<1xf32> to vector<1x1xf32>
    %705 = tpu.reciprocal %704 {approx = true} : vector<1x1xf32> -> vector<1x1xf32>
    %706 = vector.broadcast %705 : vector<1x1xf32> to vector<1x2xf32>
    %707 = arith.mulf %702, %706 : vector<1x2xf32>
    %708 = vector.extract_strided_slice %707 {offsets = [0, 0], sizes = [1, 1], strides = [1, 1]} : vector<1x2xf32> to vector<1x1xf32>
    %709 = vector.broadcast %708 : vector<1x1xf32> to vector<8x1xf32>
    %710 = arith.mulf %697, %709 : vector<8x1xf32>
    %711 = vector.extract_strided_slice %707 {offsets = [0, 1], sizes = [1, 1], strides = [1, 1]} : vector<1x2xf32> to vector<1x1xf32>
    %712 = vector.broadcast %711 : vector<1x1xf32> to vector<8x1xf32>
    %713 = arith.mulf %679, %712 : vector<8x1xf32>
    %714 = arith.addf %710, %713 : vector<8x1xf32>
    %cst_381 = arith.constant dense<0.000000e+00> : vector<1xf32>
    %715 = vector.multi_reduction <add>, %714, %cst_381 [0] : vector<8x1xf32> to vector<1xf32>
    %716 = vector.shape_cast %715 : vector<1xf32> to vector<1x1xf32>
    %cst_382 = arith.constant 9.99999974E-6 : f32
    %717 = vector.broadcast %cst_382 : f32 to vector<1x1xf32>
    %718 = arith.addf %716, %717 : vector<1x1xf32>
    %719 = tpu.reciprocal %718 {approx = true} : vector<1x1xf32> -> vector<1x1xf32>
    %720 = vector.broadcast %719 : vector<1x1xf32> to vector<8x1xf32>
    %721 = arith.mulf %714, %720 : vector<8x1xf32>
    %722 = vector.broadcast %721 : vector<8x1xf32> to vector<8x32xf32>
    %723 = arith.mulf %627, %722 : vector<8x32xf32>
    %cst_383 = arith.constant dense<0.000000e+00> : vector<32xf32>
    %724 = vector.multi_reduction <add>, %723, %cst_383 [0] : vector<8x32xf32> to vector<32xf32>
    %725 = vector.shape_cast %724 : vector<32xf32> to vector<1x32xf32>
    %726 = vector.shape_cast %725 : vector<1x32xf32> to vector<1x1x32xf32>
    %c0_384 = arith.constant 0 : index
    %c0_385 = arith.constant 0 : index
    %c0_386 = arith.constant 0 : index
    %727 = vector.load %arg32[%c0_384, %c0_385, %c0_386] : memref<1x1x32xf32, #tpu.memory_space<vmem>>, vector<1x1x32xf32>
    tpu.vector_store %arg32[%c0_384, %c0_385, %c0_386], %726 {strides = array<i32>} : memref<1x1x32xf32, #tpu.memory_space<vmem>>, vector<1x1x32xf32>,
    %728 = vector.shape_cast %679 : vector<8x1xf32> to vector<1x8x1xf32>
    %c0_387 = arith.constant 0 : index
    %c0_388 = arith.constant 0 : index
    %c0_389 = arith.constant 0 : index
    %729 = vector.load %arg33[%c0_387, %c0_388, %c0_389] : memref<1x8x1xf32, #tpu.memory_space<vmem>>, vector<1x8x1xf32>
    tpu.vector_store %arg33[%c0_387, %c0_388, %c0_389], %728 {strides = array<i32>} : memref<1x8x1xf32, #tpu.memory_space<vmem>>, vector<1x8x1xf32>,
    return
  }
  func.func @transform_0(%arg0: i32, %arg1: memref<2xi32, #tpu.memory_space<smem>>) -> (i32, i32, i32) {
    %c0_i32 = arith.constant 0 : i32
    %c0_i32_0 = arith.constant 0 : i32
    %c0_i32_1 = arith.constant 0 : i32
    return %arg0, %c0_i32, %c0_i32_0 : i32, i32, i32
  }
  func.func @transform_1(%arg0: i32, %arg1: memref<2xi32, #tpu.memory_space<smem>>) -> (i32, i32, i32) {
    %c0_i32 = arith.constant 0 : i32
    %c0_i32_0 = arith.constant 0 : i32
    %c0_i32_1 = arith.constant 0 : i32
    return %arg0, %c0_i32, %c0_i32_0 : i32, i32, i32
  }
  func.func @transform_2(%arg0: i32, %arg1: memref<2xi32, #tpu.memory_space<smem>>) -> (i32, i32, i32) {
    %c0_i32 = arith.constant 0 : i32
    %c0_i32_0 = arith.constant 0 : i32
    %c0_i32_1 = arith.constant 0 : i32
    return %arg0, %c0_i32, %c0_i32_0 : i32, i32, i32
  }
  func.func @transform_3(%arg0: i32, %arg1: memref<2xi32, #tpu.memory_space<smem>>) -> (i32, i32, i32) {
    %c0_i32 = arith.constant 0 : i32
    %c0_i32_0 = arith.constant 0 : i32
    %c0_i32_1 = arith.constant 0 : i32
    return %arg0, %c0_i32, %c0_i32_0 : i32, i32, i32
  }
  func.func @transform_4(%arg0: i32, %arg1: memref<2xi32, #tpu.memory_space<smem>>) -> (i32, i32) {
    %c0_i32 = arith.constant 0 : i32
    %c0_i32_0 = arith.constant 0 : i32
    %c0_i32_1 = arith.constant 0 : i32
    return %c0_i32, %c0_i32_0 : i32, i32
  }
  func.func @transform_5(%arg0: i32, %arg1: memref<2xi32, #tpu.memory_space<smem>>) -> (i32, i32, i32) {
    %c0_i32 = arith.constant 0 : i32
    %c0_i32_0 = arith.constant 0 : i32
    %c0_i32_1 = arith.constant 0 : i32
    %c0_i32_2 = arith.constant 0 : i32
    return %c0_i32, %c0_i32_0, %c0_i32_1 : i32, i32, i32
  }
  func.func @transform_6(%arg0: i32, %arg1: memref<2xi32, #tpu.memory_space<smem>>) -> (i32, i32, i32) {
    %c0_i32 = arith.constant 0 : i32
    %c0_i32_0 = arith.constant 0 : i32
    %c0_i32_1 = arith.constant 0 : i32
    %c0_i32_2 = arith.constant 0 : i32
    return %c0_i32, %c0_i32_0, %c0_i32_1 : i32, i32, i32
  }
  func.func @transform_7(%arg0: i32, %arg1: memref<2xi32, #tpu.memory_space<smem>>) -> (i32, i32) {
    %c0_i32 = arith.constant 0 : i32
    %c0_i32_0 = arith.constant 0 : i32
    %c0_i32_1 = arith.constant 0 : i32
    return %c0_i32, %c0_i32_0 : i32, i32
  }
  func.func @transform_8(%arg0: i32, %arg1: memref<2xi32, #tpu.memory_space<smem>>) -> (i32, i32) {
    %c0_i32 = arith.constant 0 : i32
    %c0_i32_0 = arith.constant 0 : i32
    %c0_i32_1 = arith.constant 0 : i32
    return %c0_i32, %c0_i32_0 : i32, i32
  }
  func.func @transform_9(%arg0: i32, %arg1: memref<2xi32, #tpu.memory_space<smem>>) -> (i32, i32) {
    %c0_i32 = arith.constant 0 : i32
    %c0_i32_0 = arith.constant 0 : i32
    %c0_i32_1 = arith.constant 0 : i32
    return %c0_i32, %c0_i32_0 : i32, i32
  }
  func.func @transform_10(%arg0: i32, %arg1: memref<2xi32, #tpu.memory_space<smem>>) -> (i32, i32) {
    %c0_i32 = arith.constant 0 : i32
    %c0_i32_0 = arith.constant 0 : i32
    %c0_i32_1 = arith.constant 0 : i32
    return %c0_i32, %c0_i32_0 : i32, i32
  }
  func.func @transform_11(%arg0: i32, %arg1: memref<2xi32, #tpu.memory_space<smem>>) -> (i32, i32) {
    %c0_i32 = arith.constant 0 : i32
    %c0_i32_0 = arith.constant 0 : i32
    %c0_i32_1 = arith.constant 0 : i32
    return %c0_i32, %c0_i32_0 : i32, i32
  }
  func.func @transform_12(%arg0: i32, %arg1: memref<2xi32, #tpu.memory_space<smem>>) -> (i32, i32, i32) {
    %c0_i32 = arith.constant 0 : i32
    %c0_i32_0 = arith.constant 0 : i32
    %c0_i32_1 = arith.constant 0 : i32
    %c0_i32_2 = arith.constant 0 : i32
    return %c0_i32, %c0_i32_0, %c0_i32_1 : i32, i32, i32
  }
  func.func @transform_13(%arg0: i32, %arg1: memref<2xi32, #tpu.memory_space<smem>>) -> (i32, i32, i32) {
    %c0_i32 = arith.constant 0 : i32
    %c0_i32_0 = arith.constant 0 : i32
    %c0_i32_1 = arith.constant 0 : i32
    %c0_i32_2 = arith.constant 0 : i32
    return %c0_i32, %c0_i32_0, %c0_i32_1 : i32, i32, i32
  }
  func.func @transform_14(%arg0: i32, %arg1: memref<2xi32, #tpu.memory_space<smem>>) -> (i32, i32, i32) {
    %c0_i32 = arith.constant 0 : i32
    %c0_i32_0 = arith.constant 0 : i32
    %c0_i32_1 = arith.constant 0 : i32
    %c0_i32_2 = arith.constant 0 : i32
    return %c0_i32, %c0_i32_0, %c0_i32_1 : i32, i32, i32
  }
  func.func @transform_15(%arg0: i32, %arg1: memref<2xi32, #tpu.memory_space<smem>>) -> (i32, i32, i32) {
    %c0_i32 = arith.constant 0 : i32
    %c0_i32_0 = arith.constant 0 : i32
    %c0_i32_1 = arith.constant 0 : i32
    %c0_i32_2 = arith.constant 0 : i32
    return %c0_i32, %c0_i32_0, %c0_i32_1 : i32, i32, i32
  }
  func.func @transform_16(%arg0: i32, %arg1: memref<2xi32, #tpu.memory_space<smem>>) -> (i32, i32, i32) {
    %c0_i32 = arith.constant 0 : i32
    %c0_i32_0 = arith.constant 0 : i32
    %c0_i32_1 = arith.constant 0 : i32
    %c0_i32_2 = arith.constant 0 : i32
    return %c0_i32, %c0_i32_0, %c0_i32_1 : i32, i32, i32
  }
  func.func @transform_17(%arg0: i32, %arg1: memref<2xi32, #tpu.memory_space<smem>>) -> (i32, i32, i32) {
    %c0_i32 = arith.constant 0 : i32
    %c0_i32_0 = arith.constant 0 : i32
    %c0_i32_1 = arith.constant 0 : i32
    %c0_i32_2 = arith.constant 0 : i32
    return %c0_i32, %c0_i32_0, %c0_i32_1 : i32, i32, i32
  }
  func.func @transform_18(%arg0: i32, %arg1: memref<2xi32, #tpu.memory_space<smem>>) -> (i32, i32, i32) {
    %c0_i32 = arith.constant 0 : i32
    %c0_i32_0 = arith.constant 0 : i32
    %c0_i32_1 = arith.constant 0 : i32
    %c0_i32_2 = arith.constant 0 : i32
    return %c0_i32, %c0_i32_0, %c0_i32_1 : i32, i32, i32
  }
  func.func @transform_19(%arg0: i32, %arg1: memref<2xi32, #tpu.memory_space<smem>>) -> (i32, i32, i32) {
    %c0_i32 = arith.constant 0 : i32
    %c0_i32_0 = arith.constant 0 : i32
    %c0_i32_1 = arith.constant 0 : i32
    %c0_i32_2 = arith.constant 0 : i32
    return %c0_i32, %c0_i32_0, %c0_i32_1 : i32, i32, i32
  }
  func.func @transform_20(%arg0: i32, %arg1: memref<2xi32, #tpu.memory_space<smem>>) -> (i32, i32, i32) {
    %c0_i32 = arith.constant 0 : i32
    %c0_i32_0 = arith.constant 0 : i32
    %c0_i32_1 = arith.constant 0 : i32
    %c0_i32_2 = arith.constant 0 : i32
    return %c0_i32, %c0_i32_0, %c0_i32_1 : i32, i32, i32
  }
  func.func @transform_21(%arg0: i32, %arg1: memref<2xi32, #tpu.memory_space<smem>>) -> (i32, i32, i32) {
    %c0_i32 = arith.constant 0 : i32
    %c0_i32_0 = arith.constant 0 : i32
    %c0_i32_1 = arith.constant 0 : i32
    %c0_i32_2 = arith.constant 0 : i32
    return %c0_i32, %c0_i32_0, %c0_i32_1 : i32, i32, i32
  }
  func.func @transform_22(%arg0: i32, %arg1: memref<2xi32, #tpu.memory_space<smem>>) -> (i32, i32, i32) {
    %c0_i32 = arith.constant 0 : i32
    %c0_i32_0 = arith.constant 0 : i32
    %c0_i32_1 = arith.constant 0 : i32
    %c0_i32_2 = arith.constant 0 : i32
    return %c0_i32, %c0_i32_0, %c0_i32_1 : i32, i32, i32
  }
  func.func @transform_23(%arg0: i32, %arg1: memref<2xi32, #tpu.memory_space<smem>>) -> (i32, i32, i32) {
    %c0_i32 = arith.constant 0 : i32
    %c0_i32_0 = arith.constant 0 : i32
    %c0_i32_1 = arith.constant 0 : i32
    %c0_i32_2 = arith.constant 0 : i32
    return %c0_i32, %c0_i32_0, %c0_i32_1 : i32, i32, i32
  }
  func.func @transform_24(%arg0: i32, %arg1: memref<2xi32, #tpu.memory_space<smem>>) -> (i32, i32) {
    %c0_i32 = arith.constant 0 : i32
    %c0_i32_0 = arith.constant 0 : i32
    %c0_i32_1 = arith.constant 0 : i32
    return %c0_i32, %c0_i32_0 : i32, i32
  }
  func.func @transform_25(%arg0: i32, %arg1: memref<2xi32, #tpu.memory_space<smem>>) -> (i32, i32) {
    %c0_i32 = arith.constant 0 : i32
    %c0_i32_0 = arith.constant 0 : i32
    %c0_i32_1 = arith.constant 0 : i32
    return %c0_i32, %c0_i32_0 : i32, i32
  }
  func.func @transform_26(%arg0: i32, %arg1: memref<2xi32, #tpu.memory_space<smem>>) -> (i32, i32) {
    %c0_i32 = arith.constant 0 : i32
    %c0_i32_0 = arith.constant 0 : i32
    %c0_i32_1 = arith.constant 0 : i32
    return %c0_i32, %c0_i32_0 : i32, i32
  }
  func.func @transform_27(%arg0: i32, %arg1: memref<2xi32, #tpu.memory_space<smem>>) -> (i32, i32) {
    %c0_i32 = arith.constant 0 : i32
    %c0_i32_0 = arith.constant 0 : i32
    %c0_i32_1 = arith.constant 0 : i32
    return %c0_i32, %c0_i32_0 : i32, i32
  }
  func.func @transform_28(%arg0: i32, %arg1: memref<2xi32, #tpu.memory_space<smem>>) -> (i32, i32) {
    %c0_i32 = arith.constant 0 : i32
    %c0_i32_0 = arith.constant 0 : i32
    %c0_i32_1 = arith.constant 0 : i32
    return %c0_i32, %c0_i32_0 : i32, i32
  }
  func.func @transform_29(%arg0: i32, %arg1: memref<2xi32, #tpu.memory_space<smem>>) -> (i32, i32) {
    %c0_i32 = arith.constant 0 : i32
    %c0_i32_0 = arith.constant 0 : i32
    %c0_i32_1 = arith.constant 0 : i32
    return %c0_i32, %c0_i32_0 : i32, i32
  }
  func.func @transform_30(%arg0: i32, %arg1: memref<2xi32, #tpu.memory_space<smem>>) -> (i32, i32, i32) {
    %c0_i32 = arith.constant 0 : i32
    %c0_i32_0 = arith.constant 0 : i32
    %c0_i32_1 = arith.constant 0 : i32
    return %arg0, %c0_i32, %c0_i32_0 : i32, i32, i32
  }
  func.func @transform_31(%arg0: i32, %arg1: memref<2xi32, #tpu.memory_space<smem>>) -> (i32, i32, i32) {
    %c0_i32 = arith.constant 0 : i32
    %c0_i32_0 = arith.constant 0 : i32
    %c0_i32_1 = arith.constant 0 : i32
    return %arg0, %c0_i32, %c0_i32_0 : i32, i32, i32
  }
}

</mosaic_0001>

<bundles_post_ra>
// kernel: transformer_time_forward.1
= control target key start
LH: loop header
LB: loop body
LE: loop exit
PB: predicated region body
PF: predicated region fallthrough
CT: control target
= control target key end

     0   :  { %s3989_s6 = smov 1   ;;  %s3990_s10 = smov 2   ;;  %s4816_s0 = inlined_call_operand.smem [shape: u32[33], index: -1, kind: input, shape index: {}] }
   0x1   :  { %s4050_s5 = sld [smem:[%s4816_s0]]   ;;  %s3991_s14 = smov 3  }
   0x2   :  { %s4055_s9 = sld [smem:[%s4816_s0 + %s3989_s6]]   ;;  %s3992_s18 = smov 4  }
   0x3   :  { %s4060_s13 = sld [smem:[%s4816_s0 + %s3990_s10]]   ;;  %s3993_s22 = smov 5  }
   0x4   :  { %s4065_s17 = sld [smem:[%s4816_s0 + %s3991_s14]]   ;;  %s3994_s26 = smov 6  }
   0x5   :  { %s4070_s21 = sld [smem:[%s4816_s0 + %s3992_s18]]   ;;  %s3995_s30 = smov 7  }
   0x6   :  { %s4075_s25 = sld [smem:[%s4816_s0 + %s3993_s22]]   ;;  %s3996_s4 = smov 8  }
   0x7   :  { %s4080_s29 = sld [smem:[%s4816_s0 + %s3994_s26]]   ;;  %s3997_s10 = smov 9  }
   0x8   :  { %4847 = sst [smem:[#allocation8_spill]] %s4055_s9  ;;  %s3998_s15 = smov 10  }
   0x9   :  { %4848 = sst [smem:[#allocation9_spill]] %s4060_s13  ;;  %s3999_s20 = smov 11  }
   0xa   :  { %4849 = sst [smem:[#allocation10_spill]] %s4065_s17  ;;  %s4000_s26 = smov 12  }
   0xb   :  { %4850 = sst [smem:[#allocation11_spill]] %s4070_s21  ;;  %s4001_s1 = smov 13  }
   0xc   :  { %4851 = sst [smem:[#allocation12_spill]] %s4075_s25  ;;  %s4002_s7 = smov 14  }
   0xd   :  { %s4085_s3 = sld [smem:[%s4816_s0 + %s3995_s30]]   ;;  %s4004_s22 = smov 16  }
   0xe   :  { %s4090_s8 = sld [smem:[%s4816_s0 + %s3996_s4]]   ;;  %s4005_s28 = smov 17  }
   0xf   :  { %s4095_s14 = sld [smem:[%s4816_s0 + %s3997_s10]]   ;;  %s4019_s18 = smov 31  }
  0x10   :  { %s4100_s19 = sld [smem:[%s4816_s0 + %s3998_s15]]   ;;  %s4003_s15 = smov 15  }
  0x11   :  { %s4105_s24 = sld [smem:[%s4816_s0 + %s3999_s20]]  }
  0x12   :  { %s4110_s30 = sld [smem:[%s4816_s0 + %s4000_s26]]   ;;  %s4020_s26 = smov 32  }
  0x13   :  { %4852 = sst [smem:[#allocation13_spill]] %s4085_s3 }
  0x14   :  { %4853 = sst [smem:[#allocation14_spill]] %s4090_s8 }
  0x15   :  { %4854 = sst [smem:[#allocation15_spill]] %s4095_s14 }
  0x16   :  { %4855 = sst [smem:[#allocation16_spill]] %s4100_s19 }
  0x17   :  { %4856 = sst [smem:[#allocation17_spill]] %s4105_s24 }
  0x18   :  { %4857 = sst [smem:[#allocation18_spill]] %s4110_s30 }
  0x19   :  { %s4115_s6 = sld [smem:[%s4816_s0 + %s4001_s1]]  }
  0x1a   :  { %s4120_s12 = sld [smem:[%s4816_s0 + %s4002_s7]]   ;;  %s4006_s7 = smov 18  }
  0x1b   :  { %s4125_s20 = sld [smem:[%s4816_s0 + %s4003_s15]]   ;;  %s4007_s15 = smov 19  }
  0x1c   :  { %s4130_s27 = sld [smem:[%s4816_s0 + %s4004_s22]]   ;;  %s4008_s22 = smov 20  }
  0x1d   :  { %s4135_s4 = sld [smem:[%s4816_s0 + %s4005_s28]]   ;;  %s4009_s28 = smov 21  }
  0x1e   :  { %s4140_s17 = sld [smem:[%s4816_s0 + %s4006_s7]]   ;;  %s4010_s7 = smov 22  }
  0x1f   :  { %s4145_s21 = sld [smem:[%s4816_s0 + %s4007_s15]]   ;;  %s4011_s15 = smov 23  }
  0x20   :  { %s4165_s23 = sld [smem:[%s4816_s0 + %s4011_s15]]   ;;  %s4015_s15 = smov 27  }
  0x22   :  { %4858 = sst [smem:[#allocation19_spill]] %s4130_s27 }
  0x23   :  { %4859 = sst [smem:[#allocation20_spill]] %s4135_s4 }
  0x24   :  { %4860 = sst [smem:[#allocation21_spill]] %s4140_s17 }
  0x25   :  { %4861 = sst [smem:[#allocation22_spill]] %s4145_s21 }
  0x26   :  { %s4150_s27 = sld [smem:[%s4816_s0 + %s4008_s22]]   ;;  %s4012_s22 = smov 24  }
  0x27   :  { %s4155_s4 = sld [smem:[%s4816_s0 + %s4009_s28]]   ;;  %s4013_s28 = smov 25  }
  0x28   :  { %s4160_s17 = sld [smem:[%s4816_s0 + %s4010_s7]]   ;;  %s4014_s7 = smov 26  }
  0x29   :  { %4865 = sst [smem:[#allocation26_spill]] %s4165_s23 }
  0x2a   :  { %s4170_s1 = sld [smem:[%s4816_s0 + %s4012_s22]]  }
  0x2b   :  { %s4175_s10 = sld [smem:[%s4816_s0 + %s4013_s28]]   ;;  %s4017_s28 = smov 29  }
  0x2c   :  { %4862 = sst [smem:[#allocation23_spill]] %s4150_s27  ;;  %s4016_s27 = smov 28  }
  0x2d   :  { %4863 = sst [smem:[#allocation24_spill]] %s4155_s4 }
  0x2e   :  { %4864 = sst [smem:[#allocation25_spill]] %s4160_s17 }
  0x2f   :  { %s4180_s16 = sld [smem:[%s4816_s0 + %s4014_s7]]   ;;  %s4018_s7 = smov 30  }
  0x30   :  { %4866 = sst [smem:[#allocation27_spill]] %s4170_s1 }
  0x31   :  { %4867 = sst [smem:[#allocation28_spill]] %s4175_s10 }
  0x32   :  { %s4185_s21 = sld [smem:[%s4816_s0 + %s4015_s15]]   ;;  %s72_s15 = sshll.u32 %s4050_s5, 4  ;;  %s73_s15 = int_to_ptr.vmem [resolvable:$true] %s72_s15 }
  0x33   :  { %s4190_s4 = sld [smem:[%s4816_s0 + %s4016_s27]]  }
  0x34   :  { %s4195_s17 = sld [smem:[%s4816_s0 + %s4017_s28]]   ;;  %s3911_s28 = sshra.s32 %s73_s15, 4  ;;  %s3912_s28 = int_to_ptr.vmem [resolvable:$true] %s3911_s28 }
  0x35   :  { %4868 = sst [smem:[#allocation29_spill]] %s4180_s16  ;;  %s3913_s2 = scalar_lea.vmem %s3912_s28, 1 }
  0x36   :  { %s4200_s23 = sld [smem:[%s4816_s0 + %s4018_s7]]   ;;  %p3914_p0 = scmp.ne.s32.totalorder %s3912_s28, %s3913_s2 }
  0x37   :  { %s4206_s27 = sld [smem:[%s4816_s0 + %s4019_s18]]   ;;  %s3915_s16 = scalar_lea.vmem %s4050_s5, 1 }
  0x38   :  { %4869 = sst [smem:[#allocation30_spill]] %s4185_s21  ;;  %p3916_p1 = scmp.lt.s32.totalorder %s3912_s28, %s4050_s5 }
  0x39   :  { %4870 = sst [smem:[#allocation31_spill]] %s4190_s4  ;;  %p3917_p2 = scmp.lt.s32.totalorder %s3915_s16, %s3913_s2 }
  0x3a   :  { %s4211_s10 = sld [smem:[%s4816_s0 + %s4020_s26]]  }
  0x3b   :  { %p3918_p3 = por %p3917_p2, %p3916_p1 }
  0x3d   :  { %p3919_p4 = pnand %p3918_p3, %p3914_p0 }
  0x3f   :  { %3922 = shalt.err (!%p3919_p4)  }
  0x40   :  { %s4021_s21 = smov [#allocation3]  }
  0x41   :  { %75 = dma.vmem_to_smem %s73_s15, 16, %s4021_s21, [#allocation2] }
  0x42   :  { %3967 = dma.done.wait [#allocation2], 16 }
  0x43   :  { %3968 = vsyncadd [#allocation2], 4294967280 }
  0x44   :  { %78 = sfence }
  0x45   :  { %79 = vsyncpa [#allocation5], 0 }
  0x46   :  { %81 = vsyncpa [#allocation5 + $0x1], 0  ;;  %s4215_s1 = smov 0   ;;  %s4217_s0 = smov 0  }
  0x47   :  { %s4219_s4 = smov 0   ;;  %s4221_s7 = smov 0  }
  0x48 LB: > { %s4871_s3 = sld [smem:[#allocation13_spill]]  ;;  %s4236_s5 = sadd.s32 4294967295, %s3987_s7   ;;  %s3979_s0 = sphi %s4217_s0, %s4928_s0   ;;  %s3975_s1 = sphi %s4215_s1, %s4927_s1   ;;  %s3987_s7 = sphi %s4221_s7, %s4924_s7   ;;  %s3983_s4 = sphi %s4219_s4, %s4926_s4  }
  0x49   : > { %s4872_s19 = sld [smem:[#allocation16_spill]]  ;;  %s3516_s11 = sadd.s32 4294967294, %s3987_s7  }
  0x4a   : > { %4873 = sst [smem:[#allocation32_spill]] %s3983_s4  ;;  %s4240_s15 = sadd.s32 1, %s3987_s7  }
  0x4b   : > { %4874 = sst [smem:[#allocation33_spill]] %s4240_s15  ;;  %s744_s18 = sadd.s32 1, %s3983_s4 }
  0x4c   : > { %s741_s22 = ssub.s32 %s3987_s7, %s4240_s15  ;;  %p754_p5 = scmp.ne.s32.totalorder %s3983_s4, %s3979_s0 }
  0x4d   : > { %p742_p6 = scmp.eq.s32.totalorder %s741_s22, 0  ;;  %p755_p7 = scmp.eq.s32.totalorder %s4236_s5, 1 }
  0x4e   : > { %p760_p8 = scmp.ne.s32.totalorder %s3979_s0, %s3975_s1  ;;  %p761_p9 = scmp.eq.s32.totalorder %s3516_s11, 1 }
  0x4f   : > { %s4251_s26 = scalar_select %p742_p6, %s3983_s4, %s744_s18  }
  0x50   : > { %p4253_p10 = por %p755_p7, %p754_p5  ;;  %p4257_p11 = por %p761_p9, %p760_p8 }
  0x51   : > { %4875 = sst [smem:[#allocation34_spill]] %s4251_s26  ;;  %p3519_p12 = scmp.ge.s32.totalorder %s3987_s7, 1 }
  0x52   : > { %s4877_s2 = scalar_select %p4257_p11, 1, 0 }
  0x53   : > { %p911_p13 = scmp.lt.s32.totalorder %s3987_s7, 3 }
  0x54   : > { %4878 = sst [smem:[#allocation35_spill]] %s4877_s2 }
  0x55   : > { %p912_p0 = pnand %p3519_p12, %p911_p13 }
  0x56   : > { %s4879_s13 = sld [smem:[#allocation9_spill]] (!%p912_p0)  ;;  %p1005_p1 = scmp.lt.s32.totalorder (!%p912_p0), %s4236_s5, 1 }
  0x57   : > { %915 = sbr.rel (%p912_p0) target bundleno = 5826 (0x16c2), region = 140  ;;  %s4880_s8 = sld [smem:[#allocation14_spill]] (!%p912_p0) }
  0x58   : > { %s4881_s14 = sld [smem:[#allocation15_spill]] (!%p912_p0) }
  0x59   : > { %s4882_s9 = sld [smem:[#allocation8_spill]] (!%p912_p0) }
  0x5a   : > { %s4883_s30 = sld [smem:[#allocation18_spill]] (!%p912_p0) }
  0x5b   : > { %s4884_s24 = sld [smem:[#allocation17_spill]] (!%p912_p0) }
  0x5c   : > { %v4022_v0 = vmov 0   ;;  %s1006_s16 = scalar_select %p1005_p1, %s4236_s5, 1  ;;  %v1055_v2 = vld [vmem:[%s4872_s19 + $0x8] sm:$0xff]  ;;  %v1054_v3 = vld [vmem:[%s4872_s19] sm:$0xff]  ;;  %vm1060_vm0 = vcmask 130048   ;;  %v1096_v12 = vld [vmem:[%s4115_s6 + $0x18] sm:$0xff]  ;;  %v1026_v16 = vlaneseq }
  0x5d   : > { %3815 = vset.pattern.permute.xlu0 %v4022_v0  ;;  %3816 = vset.pattern.permute.xlu2 %v4022_v0  ;;  %v3818_v4 = vld [vmem:[%s4880_s8] ss:$0 sm:$0xff]  ;;  %v1095_v13 = vld [vmem:[%s4115_s6 + $0x10] sm:$0xff]  ;;  %s4885_s25 = sld [smem:[#allocation12_spill]]  ;;  %v1094_v14 = vld [vmem:[%s4115_s6 + $0x8] sm:$0xff]  ;;  %v4023_v22 = vmov 0.0  }
  0x5e   : > { %3817 = vset.pattern.permute.xlu1 %v4022_v0  ;;  %s4265_s21 = sshll.u32 %s1006_s16, 3  ;;  %1078 = vmatpush.msra.mxu0 %v1055_v2  ;;  %v3819_v5 = vld [vmem:[%s4881_s14] ss:$0 sm:$0xff]  ;;  %s1025_s18 = sld [smem:[#allocation3 + %s4236_s5]]  ;;  %v1027_v17 = vshrl.u32 %v1026_v16, 7  ;;  %vm1101_vm2 = vcmask 261120  }
  0x5f   : > { %s1012_s11 = scalar_lea.vmem %s4879_s13, %s4265_s21  ;;  %1117 = vmatpush.msra.mxu1 %v1096_v12  ;;  %v1093_v15 = vld [vmem:[%s4115_s6] sm:$0xff]  ;;  %s1008_s22 = scalar_lea.vmem %s4882_s9, %s4265_s21  ;;  %vm1139_vm3 = vcmask 64512   ;;  %v4310_v37 = vld [vmem:[%s4080_s29 + $0x8] sm:$0xff]  ;;  %v4315_v39 = vld [vmem:[%s4080_s29 + $0x10] sm:$0xff]  ;;  %vm2022_vm8 = vcmask 195584   ;;  %vm2139_vm13 = vcmask 523264  }
  0x60   : > { %v1034_v1 = vld [vmem:[%s1012_s11] sm:$0xff]  ;;  %1079 = vmatpush.msra.mxu0 %v1054_v3  ;;  %s4827_s16 = smov 88   ;;  %s4828_s11 = smov 112   ;;  %v4320_v40 = vld [vmem:[%s4080_s29 + $0x18] sm:$0xff]  ;;  %v4337_v46 = vld [vmem:[%s4080_s29 + $0x28] sm:$0xff] }
  0x61   : > { %1039 = vperm.xlu0 %3815, %v1034_v1   ;;  %1118 = vmatpush.msra.mxu1 %v1095_v13  ;;  %v3823_v19 = vld [vmem:[%s4883_s30] ss:$0 sm:$0xff]  ;;  %s4830_s8 = smov 104   ;;  %s4835_s9 = smov 80   ;;  %v4343_v50 = vld [vmem:[%s4080_s29 + $0x48] sm:$0xff]  ;;  %v4354_v51 = vld [vmem:[%s4080_s29 + $0x30] sm:$0xff] }
  0x62   : > { %v1035_v20 = vld [vmem:[%s1008_s22] sm:$0xff]  ;;  %s4829_s22 = smov 96   ;;  %s4836_s13 = smov 72   ;;  %v4357_v54 = vld [vmem:[%s4080_s29 + $0x68] sm:$0xff]  ;;  %v4360_v55 = vld [vmem:[%s4080_s29 + $0x50] sm:$0xff] }
  0x63   : > { %1119 = vmatpush.msra.mxu1 %v1094_v14  ;;  %v3822_v21 = vld [vmem:[%s4884_s24] ss:$0 sm:$0xff]  ;;  %v1090_v25 = vadd.f32 %v3823_v19, %v1035_v20  ;;  %v4371_v57 = vld [vmem:[%s4080_s29 + $0x38] sm:$0xff]  ;;  %v4374_v59 = vld [vmem:[%s4080_s29 + $0x70] sm:$0xff] }
  0x64   : > { %v1028_v18 = vstv %s1025_s18  ;;  %v1084_v24 = vld [vmem:[%s4885_s25] sm:$0xff]  ;;  %s4837_s18 = smov 120   ;;  %v4377_v60 = vld [vmem:[%s4080_s29 + $0x58] sm:$0xff] }
  0x65   : > { %1120 = vmatpush.msra.mxu1 %v1093_v15  ;;  %vm1029_vm1 = vcmp.lt.s32.totalorder %v1027_v17, %v1028_v18  ;;  %v3824_v31 = vld [vmem:[%s4120_s12] ss:$0 sm:$0xff]  ;;  %v4388_v61 = vld [vmem:[%s4080_s29 + $0x78] sm:$0xff] }
  0x66   : > { %v3525_v23 = vsel %vm1029_vm1, 1.0, %v4023_v22  ;;  %v4305_v35 = vld [vmem:[%s4080_s29] sm:$0xff] }
  0x67   : > { %v1085_v28 = vmul.f32 %v3525_v23, %v1084_v24  ;;  %v4325_v41 = vld [vmem:[%s4080_s29 + $0x20] sm:$0xff] }
  0x68   : > { %v4328_v42 = vld [vmem:[%s4080_s29 + $0x40] sm:$0xff] }
  0x69   : > { %v4340_v47 = vld [vmem:[%s4080_s29 + $0x60] sm:$0xff] }
  0xd3   : > { %v4273_v6 = vpop.permute.xlu0 %1039 }
  0xd4   : > { %v1045_v7 = vmul.f32 %v3818_v4, %v4273_v6 }
  0xd6   : > { %v1050_v8 = vadd.f32 %v3819_v5, %v1045_v7 }
  0xd8   : > { %v1051_v9 = vmul.f32 %v1050_v8, %v1050_v8 }
  0xda   : > { %3842 = vtanh.f32 %v1051_v9 }
  0xe0   : > { %v3843_v10 = vpop.eup %3842 }
  0xe1   : > { %v1053_v11 = vsub.f32 1.0, %v3843_v10 }
  0xe3   : > { %3526 = vmatmul.msk.f32.vlgmr.msra.gmra.mxu0 %vm1060_vm0, %v1053_v11 }
 0x160   : > { %v1081_v26 = vpop.f32.mrf.mxu0 }
 0x161   : > { %v1082_v27 = vadd.f32 %v3822_v21, %v1081_v26 }
 0x163   : > { %v1091_v29 = vadd.f32 %v1090_v25, %v1082_v27 }
 0x165   : > { %v4288_v30 = vadd.f32 %v1091_v29, %v1085_v28 }
 0x167   : > { %3527 = vmatmul.msk.f32.vlgmr.msra.gmra.mxu1 %vm1101_vm2, %v4288_v30 }
 0x1e4   : > { %v1122_v32 = vpop.f32.mrf.mxu1 }
 0x1e5   : > { %v1123_v33 = vadd.f32 %v3824_v31, %v1122_v32 }
 0x1e7   : > { %1329 = vrot.lane.b32.xlu2 %v1123_v33, %s4827_s16  ;;  %v1125_v34 = vmul.f32 0.70710677, %v1123_v33  ;;  %s4833_s16 = smov 56  }
 0x1e9   : > { %1227 = vrot.lane.b32.xlu1 %v1125_v34, %s4828_s11  ;;  %1136 = vrot.lane.b32.xlu0 %v1125_v34, %s4837_s18  ;;  %s4831_s11 = smov 48  }
 0x1ea   : > { %1208 = vmatpush.msra.mxu3 %v1125_v34 }
 0x1eb   : > { %3536 = vmatmul.msk.f32.vlgmr.msra.gmra.mxu3 %vm1139_vm3, %v4305_v35 }
 0x1ef   : > { %1361 = vrot.lane.b32.xlu2 %v1123_v33, %s4829_s22  ;;  %s4834_s22 = smov 40  }
 0x1f1   : > { %1280 = vrot.lane.b32.xlu1 %v1125_v34, %s4830_s8  ;;  %1393 = vrot.lane.b32.xlu0 %v1123_v33, %s4835_s9  ;;  %s4832_s8 = smov 64  }
 0x1f3   : > { %3537 = vmatmul.msk.f32.gmra.mxu3 %vm1139_vm3, %v4310_v37 }
 0x1f7   : > { %1465 = vrot.lane.b32.xlu2 %v1123_v33, %s4833_s16 }
 0x1f9   : > { %1429 = vrot.lane.b32.xlu1 %v1123_v33, %s4836_s13  ;;  %1529 = vrot.lane.b32.xlu0 %v1123_v33, %s4831_s11  ;;  %s3590_s11 = sshll.u32 %s4236_s5, 2 }
 0x1fa   : > { %s1704_s9 = sadd.s32 1, %s3590_s11  ;;  %p1628_p2 = scmp.lt.s32.totalorder %s3590_s11, 0 }
 0x1fb   : > { %3538 = vmatmul.msk.f32.gmra.mxu3 %vm1139_vm3, %v4315_v39  ;;  %s1706_s18 = ssub.s32 0, %s1704_s9  ;;  %p1705_p4 = scmp.lt.s32.totalorder %s1704_s9, 0 }
 0x1fc   : > { %s3597_s14 = smin.u32 %s1706_s18, %s1704_s9  ;;  %s1858_s30 = sadd.s32 3, %s3590_s11 }
 0x1fd   : > { %s1708_s19 = sand.u32 1, %s3597_s14   ;;  %s1781_s4 = sadd.s32 2, %s3590_s11 }
 0x1fe   : > { %s1709_s25 = ssub.s32 0, %s1708_s19  ;;  %s1860_s15 = ssub.s32 0, %s1858_s30 }
 0x1ff   : > { %1565 = vrot.lane.b32.xlu2 %v1123_v33, %s4834_s22  ;;  %s4934_s25 = smov (!%p1705_p4, %s1709_s25), %s1708_s19  ;;  %s3609_s2 = smin.u32 %s1860_s15, %s1858_s30 }
 0x200   : > { %p3599_p5 = scmp.lt.s32.totalorder %s4934_s25, 0  ;;  %p1859_p6 = scmp.lt.s32.totalorder %s1858_s30, 0 }
 0x201   : > { %1497 = vrot.lane.b32.xlu1 %v1123_v33, %s4832_s8  ;;  %s1629_s8 = ssub.s32 0, %s3590_s11  ;;  %p1782_p7 = scmp.lt.s32.totalorder %s1781_s4, 0 }
 0x202   : > { %s3591_s16 = smin.u32 %s3590_s11, %s1629_s8  ;;  %s1715_s8 = sadd.s32 2, %s4934_s25 }
 0x203   : > { %3539 = vmatmul.msk.f32.gmra.mxu3 %vm1139_vm3, %v4320_v40  ;;  %s1631_s22 = sand.u32 1, %s3591_s16   ;;  %s1783_s16 = ssub.s32 0, %s1781_s4 }
 0x204   : > { %s1632_s13 = ssub.s32 0, %s1631_s22  ;;  %s4936_s8 = smov (!%p3599_p5, %s1715_s8), %s4934_s25 }
 0x205   : > { %s4930_s13 = smov (!%p1628_p2, %s1632_s13), %s1631_s22  ;;  %s1862_s22 = sand.u32 1, %s3609_s2  }
 0x206   : > { %p3593_p3 = scmp.lt.s32.totalorder %s4930_s13, 0  ;;  %s1638_s24 = sadd.s32 2, %s4930_s13 }
 0x207   : > { %s3603_s14 = smin.u32 %s1783_s16, %s1781_s4  ;;  %s1717_s9 = sld [smem:[#allocation3 + %s4936_s8]] }
 0x208   : > { %s4932_s24 = smov (!%p3593_p3, %s1638_s24), %s4930_s13  ;;  %s1863_s13 = ssub.s32 0, %s1862_s22 }
 0x209   : > { %s1640_s26 = sld [smem:[#allocation3 + %s4932_s24]]  ;;  %s1785_s19 = sand.u32 1, %s3603_s14  }
 0x20a   : > { %s4938_s13 = smov (!%p1859_p6, %s1863_s13), %s1862_s22  ;;  %s1786_s25 = ssub.s32 0, %s1785_s19 }
 0x20b   : > { %p3611_p8 = scmp.lt.s32.totalorder %s4938_s13, 0  ;;  %s1869_s24 = sadd.s32 2, %s4938_s13 }
 0x20c   : > { %s4940_s25 = smov (!%p1782_p7, %s1786_s25), %s1785_s19  ;;  %s4845_s2 = smov 24  }
 0x20d   : > { %s4942_s24 = smov (!%p3611_p8, %s1869_s24), %s4938_s13  ;;  %p3605_p9 = scmp.lt.s32.totalorder %s4940_s25, 0 }
 0x20e   : > { %s1792_s30 = sadd.s32 2, %s4940_s25  ;;  %s1871_s4 = sld [smem:[#allocation3 + %s4942_s24]] }
 0x20f   : > { %s4944_s30 = smov (!%p3605_p9, %s1792_s30), %s4940_s25  ;;  %s4894_s11 = sld [smem:[#allocation19_spill]] }
 0x210   : > { %s1794_s15 = sld [smem:[#allocation3 + %s4944_s30]]  ;;  %s4844_s18 = smov 16  }
 0x211   : > { %s4895_s8 = sld [smem:[#allocation22_spill]]  ;;  %s4903_s24 = smov 120  }
 0x212   : > { %s4896_s16 = sld [smem:[#allocation24_spill]]  ;;  %s4904_s30 = smov 104  }
 0x213   : > { %s4897_s22 = sld [smem:[#allocation20_spill]] }
 0x214   : > { %s4898_s14 = sld [smem:[#allocation21_spill]] }
 0x215   : > { %s4900_s13 = sld [smem:[#allocation25_spill]] }
 0x216   : > { %s4901_s19 = sld [smem:[#allocation26_spill]] }
 0x217   : > { %s4902_s25 = sld [smem:[#allocation27_spill]] }
 0x241   : > { %v1330_v36 = vpop.permute.xlu2 %1329 }
 0x249   : > { %v1362_v38 = vpop.permute.xlu2 %1361 }
 0x24a   : > { %1379 = vmatpush.msrb.mxu3 %v1362_v38 }
 0x24b   : > { %3560 = vmatmul.msk.f32.vlgmr.msrb.gmra.mxu3 %vm1139_vm3, %v4305_v35 }
 0x251   : > { %v1466_v45 = vpop.permute.xlu2 %1465 }
 0x253   : > { %3561 = vmatmul.msk.f32.gmra.mxu3 %vm1139_vm3, %v4310_v37 }
 0x259   : > { %v1566_v56 = vpop.permute.xlu2 %1565 }
 0x25b   : > { %v1228_v43 = vpop.permute.xlu1 %1227  ;;  %v1137_v44 = vpop.permute.xlu0 %1136  ;;  %3562 = vmatmul.msk.f32.gmra.mxu3 %vm1139_vm3, %v4315_v39 }
 0x25c   : > { %1167 = vmatpush.msra.mxu2 %v1137_v44  ;;  %1257 = vmatpush.msrb.mxu0 %v1228_v43 }
 0x25d   : > { %3532 = vmatmul.msk.f32.vlgmr.msra.gmra.mxu2 %vm1139_vm3, %v4325_v41  ;;  %3544 = vmatmul.msk.f32.vlgmr.msrb.gmra.mxu0 %vm1139_vm3, %v4328_v42 }
 0x25e   : > { %1347 = vmatpush.msrb.mxu2 %v1330_v36 }
 0x260   : > { %1483 = vmatpush.msra.mxu2 %v1466_v45 }
 0x263   : > { %v1281_v48 = vpop.permute.xlu1 %1280  ;;  %v1394_v49 = vpop.permute.xlu0 %1393  ;;  %3563 = vmatmul.msk.f32.gmra.mxu3 %vm1139_vm3, %v4320_v40 }
 0x264   : > { %1310 = vmatpush.msrb.mxu1 %v1281_v48  ;;  %1411 = vmatpush.msra.mxu0 %v1394_v49 }
 0x265   : > { %3533 = vmatmul.msk.f32.gmra.mxu2 %vm1139_vm3, %v4337_v46  ;;  %3552 = vmatmul.msk.f32.vlgmr.msrb.gmra.mxu1 %vm1139_vm3, %v4340_v47 }
 0x266   : > { %3545 = vmatmul.msk.f32.gmra.mxu0 %vm1139_vm3, %v4343_v50 }
 0x26b   : > { %v1430_v52 = vpop.permute.xlu1 %1429  ;;  %v1530_v53 = vpop.permute.xlu0 %1529 }
 0x26c   : > { %1447 = vmatpush.msra.mxu1 %v1430_v52  ;;  %1547 = vmatpush.msrb.mxu0 %v1530_v53 }
 0x26d   : > { %3534 = vmatmul.msk.f32.gmra.mxu2 %vm1139_vm3, %v4354_v51  ;;  %3553 = vmatmul.msk.f32.gmra.mxu1 %vm1139_vm3, %v4357_v54 }
 0x26e   : > { %1583 = vmatpush.msrb.mxu1 %v1566_v56  ;;  %3546 = vmatmul.msk.f32.gmra.mxu0 %vm1139_vm3, %v4360_v55  ;;  %v1210_v62 = vpop.f32.mrf.mxu3 }
 0x273   : > { %v1498_v58 = vpop.permute.xlu1 %1497 }
 0x274   : > { %1515 = vmatpush.msra.mxu3 %v1498_v58 }
 0x275   : > { %3535 = vmatmul.msk.f32.gmra.mxu2 %vm1139_vm3, %v4371_v57  ;;  %3554 = vmatmul.msk.f32.gmra.mxu1 %vm1139_vm3, %v4374_v59 }
 0x276   : > { %3547 = vmatmul.msk.f32.gmra.mxu0 %vm1139_vm3, %v4377_v60  ;;  %3576 = vmatmul.msk.f32.vlgmr.msra.gmra.mxu3 %vm1139_vm3, %v4305_v35  ;;  %v1213_v63 = vpop.f32.mrf.mxu3 }
 0x27d   : > { %3556 = vmatmul.msk.f32.vlgmr.msrb.gmra.mxu2 %vm1139_vm3, %v4325_v41  ;;  %3555 = vmatmul.msk.f32.gmra.mxu1 %vm1139_vm3, %v4388_v61 }
 0x27e   : > { %3564 = vmatmul.msk.f32.vlgmr.msra.gmra.mxu0 %vm1139_vm3, %v4328_v42  ;;  %3577 = vmatmul.msk.f32.gmra.mxu3 %vm1139_vm3, %v4310_v37  ;;  %v1216_v2 = vpop.f32.mrf.mxu3 }
 0x285   : > { %3557 = vmatmul.msk.f32.gmra.mxu2 %vm1139_vm3, %v4337_v46  ;;  %3568 = vmatmul.msk.f32.vlgmr.msra.gmra.mxu1 %vm1139_vm3, %v4340_v47 }
 0x286   : > { %3565 = vmatmul.msk.f32.gmra.mxu0 %vm1139_vm3, %v4343_v50  ;;  %3578 = vmatmul.msk.f32.gmra.mxu3 %vm1139_vm3, %v4315_v39  ;;  %v1219_v7 = vpop.f32.mrf.mxu3 }
 0x28d   : > { %3558 = vmatmul.msk.f32.gmra.mxu2 %vm1139_vm3, %v4354_v51  ;;  %3569 = vmatmul.msk.f32.gmra.mxu1 %vm1139_vm3, %v4357_v54 }
 0x28e   : > { %3566 = vmatmul.msk.f32.gmra.mxu0 %vm1139_vm3, %v4360_v55  ;;  %3579 = vmatmul.msk.f32.gmra.mxu3 %vm1139_vm3, %v4320_v40 }
 0x295   : > { %3559 = vmatmul.msk.f32.gmra.mxu2 %vm1139_vm3, %v4371_v57  ;;  %3570 = vmatmul.msk.f32.gmra.mxu1 %vm1139_vm3, %v4374_v59 }
 0x296   : > { %3567 = vmatmul.msk.f32.gmra.mxu0 %vm1139_vm3, %v4377_v60 }
 0x29d   : > { %3572 = vmatmul.msk.f32.vlgmr.msra.gmra.mxu2 %vm1139_vm3, %v4325_v41  ;;  %3571 = vmatmul.msk.f32.gmra.mxu1 %vm1139_vm3, %v4388_v61 }
 0x29e   : > { %3580 = vmatmul.msk.f32.vlgmr.msrb.gmra.mxu0 %vm1139_vm3, %v4328_v42 }
 0x2a5   : > { %3573 = vmatmul.msk.f32.gmra.mxu2 %vm1139_vm3, %v4337_v46  ;;  %3584 = vmatmul.msk.f32.vlgmr.msrb.gmra.mxu1 %vm1139_vm3, %v4340_v47 }
 0x2a6   : > { %3581 = vmatmul.msk.f32.gmra.mxu0 %vm1139_vm3, %v4343_v50 }
 0x2ad   : > { %3574 = vmatmul.msk.f32.gmra.mxu2 %vm1139_vm3, %v4354_v51  ;;  %3585 = vmatmul.msk.f32.gmra.mxu1 %vm1139_vm3, %v4357_v54 }
 0x2ae   : > { %3582 = vmatmul.msk.f32.gmra.mxu0 %vm1139_vm3, %v4360_v55 }
 0x2b5   : > { %3575 = vmatmul.msk.f32.gmra.mxu2 %vm1139_vm3, %v4371_v57  ;;  %3586 = vmatmul.msk.f32.gmra.mxu1 %vm1139_vm3, %v4374_v59 }
 0x2b6   : > { %3583 = vmatmul.msk.f32.gmra.mxu0 %vm1139_vm3, %v4377_v60 }
 0x2bd   : > { %3587 = vmatmul.msk.f32.gmra.mxu1 %vm1139_vm3, %v4388_v61 }
 0x2ce   : > { %v1381_v13 = vpop.f32.mrf.mxu3 }
 0x2d6   : > { %v1384_v18 = vpop.f32.mrf.mxu3 }
 0x2da   : > { %v1259_v0 = vpop.f32.mrf.mxu0 }
 0x2de   : > { %v1387_v31 = vpop.f32.mrf.mxu3 }
 0x2e0   : > { %v1169_v1 = vpop.f32.mrf.mxu2 }
 0x2e1   : > { %v1211_v19 = vadd.f32 %v1210_v62, %v1169_v1 }
 0x2e2   : > { %v1312_v3 = vpop.f32.mrf.mxu1 }
 0x2e3   : > { %v1262_v4 = vpop.f32.mrf.mxu0  ;;  %v1271_v25 = vadd.f32 %v1259_v0, %v1211_v19 }
 0x2e5   : > { %v1324_v27 = vadd.f32 %v1312_v3, %v1271_v25 }
 0x2e6   : > { %v1390_v52 = vpop.f32.mrf.mxu3 }
 0x2e8   : > { %v1172_v5 = vpop.f32.mrf.mxu2 }
 0x2e9   : > { %v1214_v28 = vadd.f32 %v1213_v63, %v1172_v5 }
 0x2ea   : > { %v1315_v8 = vpop.f32.mrf.mxu1 }
 0x2eb   : > { %v1265_v9 = vpop.f32.mrf.mxu0  ;;  %v1272_v38 = vadd.f32 %v1262_v4, %v1214_v28 }
 0x2ed   : > { %v1325_v44 = vadd.f32 %v1315_v8, %v1272_v38 }
 0x2f0   : > { %v1175_v10 = vpop.f32.mrf.mxu2 }
 0x2f1   : > { %v1217_v45 = vadd.f32 %v1216_v2, %v1175_v10 }
 0x2f2   : > { %v1318_v11 = vpop.f32.mrf.mxu1 }
 0x2f3   : > { %v1268_v12 = vpop.f32.mrf.mxu0  ;;  %v1273_v58 = vadd.f32 %v1265_v9, %v1217_v45 }
 0x2f5   : > { %v1326_v0 = vadd.f32 %v1318_v11, %v1273_v58  ;;  %v1872_v58 = vstv %s1871_s4  ;;  %s4905_s4 = smov 112  }
 0x2f8   : > { %v1178_v14 = vpop.f32.mrf.mxu2 }
 0x2f9   : > { %v1220_v1 = vadd.f32 %v1219_v7, %v1178_v14  ;;  %v1517_v5 = vpop.f32.mrf.mxu3 }
 0x2fa   : > { %v1321_v15 = vpop.f32.mrf.mxu1 }
 0x2fb   : > { %v1413_v17 = vpop.f32.mrf.mxu0  ;;  %v1274_v10 = vadd.f32 %v1268_v12, %v1220_v1 }
 0x300   : > { %v1349_v20 = vpop.f32.mrf.mxu2 }
 0x301   : > { %v1382_v21 = vadd.f32 %v1381_v13, %v1349_v20  ;;  %v1520_v7 = vpop.f32.mrf.mxu3 }
 0x302   : > { %v1449_v23 = vpop.f32.mrf.mxu1 }
 0x303   : > { %v1425_v22 = vadd.f32 %v1413_v17, %v1382_v21  ;;  %v1416_v24 = vpop.f32.mrf.mxu0 }
 0x305   : > { %v1461_v26 = vadd.f32 %v1449_v23, %v1425_v22 }
 0x307   : > { %3588 = vmatpush.xpose.msk.msrb.mxu2 %vm1139_vm3, %v1461_v26 }
 0x308   : > { %v1352_v29 = vpop.f32.mrf.mxu2 }
 0x309   : > { %v1385_v32 = vadd.f32 %v1384_v18, %v1352_v29  ;;  %v1327_v18 = vadd.f32 %v1321_v15, %v1274_v10  ;;  %v1523_v26 = vpop.f32.mrf.mxu3 }
 0x30a   : > { %3589 = vmatmul.msk.f32.vlgmr.msrb.gmra.mxu2 %vm1139_vm3, %v1324_v27  ;;  %v1452_v34 = vpop.f32.mrf.mxu1 }
 0x30b   : > { %v1426_v33 = vadd.f32 %v1416_v24, %v1385_v32  ;;  %v1419_v36 = vpop.f32.mrf.mxu0 }
 0x30d   : > { %v1462_v43 = vadd.f32 %v1452_v34, %v1426_v33  ;;  %v1033_v34 = vand.u32 127, %v1026_v16  ;;  %v1718_v16 = vstv %s1717_s9  ;;  %s4899_s9 = sld [smem:[#allocation23_spill]] }
 0x30f   : > { %3595 = vmatpush.xpose.msk.msra.mxu2 %vm1139_vm3, %v1462_v43  ;;  %vm4467_vm5 = vcmp.ge.s32.totalorder %v1033_v34, %v1718_v16  ;;  %vm4474_vm6 = vcmp.ge.s32.totalorder %v1033_v34, %v1872_v58 }
 0x310   : > { %v1355_v48 = vpop.f32.mrf.mxu2 }
 0x311   : > { %v1388_v49 = vadd.f32 %v1387_v31, %v1355_v48 }
 0x312   : > { %3596 = vmatmul.msk.f32.vlgmr.msra.gmra.mxu2 %vm1139_vm3, %v1325_v44  ;;  %v1455_v56 = vpop.f32.mrf.mxu1 }
 0x313   : > { %v1427_v53 = vadd.f32 %v1419_v36, %v1388_v49  ;;  %v1422_v62 = vpop.f32.mrf.mxu0  ;;  %v1641_v36 = vstv %s1640_s26  ;;  %s4843_s26 = smov 8  }
 0x314   : > { %vm4460_vm4 = vcmp.ge.s32.totalorder %v1033_v34, %v1641_v36 }
 0x315   : > { %v1463_v63 = vadd.f32 %v1455_v56, %v1427_v53 }
 0x317   : > { %3601 = vmatpush.xpose.msk.msra.mxu0 %vm1139_vm3, %v1463_v63 }
 0x318   : > { %v1358_v3 = vpop.f32.mrf.mxu2 }
 0x319   : > { %v1391_v4 = vadd.f32 %v1390_v52, %v1358_v3 }
 0x31a   : > { %3602 = vmatmul.msk.f32.vlgmr.msra.gmra.mxu0 %vm1139_vm3, %v1326_v0  ;;  %v1458_v8 = vpop.f32.mrf.mxu1  ;;  %v1795_v0 = vstv %s1794_s15  ;;  %s4906_s15 = smov 96  }
 0x31b   : > { %v1428_v2 = vadd.f32 %v1422_v62, %v1391_v4  ;;  %v1549_v13 = vpop.f32.mrf.mxu0  ;;  %vm4481_vm7 = vcmp.ge.s32.totalorder %v1033_v34, %v1795_v0 }
 0x31d   : > { %v1464_v17 = vadd.f32 %v1458_v8, %v1428_v2 }
 0x31f   : > { %3607 = vmatpush.xpose.msk.msrb.mxu2 %vm1139_vm3, %v1464_v17 }
 0x320   : > { %v1485_v9 = vpop.f32.mrf.mxu2 }
 0x321   : > { %v1518_v19 = vadd.f32 %v1517_v5, %v1485_v9 }
 0x322   : > { %3608 = vmatmul.msk.f32.vlgmr.msrb.gmra.mxu2 %vm1139_vm3, %v1327_v18  ;;  %v1585_v11 = vpop.f32.mrf.mxu1 }
 0x323   : > { %v1561_v20 = vadd.f32 %v1549_v13, %v1518_v19  ;;  %v1552_v21 = vpop.f32.mrf.mxu0 }
 0x325   : > { %v1597_v14 = vadd.f32 %v1585_v11, %v1561_v20 }
 0x327   : > { %1673 = vmatpush.msrb.mxu3 %v1597_v14 }
 0x328   : > { %v1488_v22 = vpop.f32.mrf.mxu2 }
 0x329   : > { %v1521_v23 = vadd.f32 %v1520_v7, %v1488_v22 }
 0x32a   : > { %v1588_v12 = vpop.f32.mrf.mxu1 }
 0x32b   : > { %v1562_v24 = vadd.f32 %v1552_v21, %v1521_v23  ;;  %v1555_v15 = vpop.f32.mrf.mxu0 }
 0x32d   : > { %v1598_v25 = vadd.f32 %v1588_v12, %v1562_v24 }
 0x32f   : > { %1750 = vmatpush.msra.mxu3 %v1598_v25 }
 0x330   : > { %v1491_v27 = vpop.f32.mrf.mxu2 }
 0x331   : > { %v1524_v28 = vadd.f32 %v1523_v26, %v1491_v27 }
 0x332   : > { %v1591_v31 = vpop.f32.mrf.mxu1 }
 0x333   : > { %v1563_v29 = vadd.f32 %v1555_v15, %v1524_v28  ;;  %v1558_v56 = vpop.f32.mrf.mxu0 }
 0x335   : > { %v1599_v32 = vadd.f32 %v1591_v31, %v1563_v29  ;;  %v1526_v29 = vpop.f32.mrf.mxu3 }
 0x337   : > { %1827 = vmatpush.msra.mxu1 %v1599_v32 }
 0x338   : > { %v4457_v33 = vpop.f32.mrf.mxu2 }
 0x339   : > { %v1527_v32 = vadd.f32 %v1526_v29, %v4457_v33 }
 0x33a   : > { %v1594_v36 = vpop.f32.mrf.mxu1 }
 0x33b   : > { %v1564_v34 = vadd.f32 %v1558_v56, %v1527_v32  ;;  %v4038_v32 = vmov 32.0  }
 0x33d   : > { %v1600_v16 = vadd.f32 %v1594_v36, %v1564_v34 }
 0x38d   : > { %v1624_v43 = vpop.f32.mrf.mxu2 }
 0x38e   : > { %v1643_v44 = vsel %vm4460_vm4, -1e+30, %v1624_v43 }
 0x38f   : > { %v1644_v45 = vsel %vm1139_vm3, %v1643_v44, -inf }
 0x390   : > { %1645 = vmax.xlane.f32.xlu0 %v1644_v45 }
 0x395   : > { %v1701_v49 = vpop.f32.mrf.mxu2 }
 0x396   : > { %v1720_v52 = vsel %vm4467_vm5, -1e+30, %v1701_v49 }
 0x397   : > { %v1721_v53 = vsel %vm1139_vm3, %v1720_v52, -inf  ;;  %v1778_v4 = vpop.f32.mrf.mxu0 }
 0x398   : > { %1722 = vmax.xlane.f32.xlu1 %v1721_v53  ;;  %v1797_v2 = vsel %vm4481_vm7, -1e+30, %v1778_v4 }
 0x399   : > { %v1798_v8 = vsel %vm1139_vm3, %v1797_v2, -inf }
 0x3a5   : > { %v1855_v63 = vpop.f32.mrf.mxu2 }
 0x3a6   : > { %v1874_v1 = vsel %vm4474_vm6, -1e+30, %v1855_v63 }
 0x3a7   : > { %v1875_v3 = vsel %vm1139_vm3, %v1874_v1, -inf }
 0x3a8   : > { %1876 = vmax.xlane.f32.xlu2 %v1875_v3 }
 0x3b0   : > { %1799 = vmax.xlane.f32.xlu2 %v1798_v8  ;;  %v4498_v8 = vld [vmem:[%s4871_s3 + $0x18] sm:$0xff] }
 0x403   : > { %v1646_v10 = vpop.xlane.xlu0 %1645 }
 0x404   : > { %v1647_v13 = vsub.f32 %v1643_v44, %v1646_v10  ;;  %v4501_v10 = vld [vmem:[%s4871_s3 + $0x8] sm:$0xff] }
 0x406   : > { %v1648_v17 = vmul.f32 1.442695, %v1647_v13  ;;  %v4504_v13 = vld [vmem:[%s4871_s3 + $0x10] sm:$0xff] }
 0x408   : > { %3844 = vpow2.f32 %v1648_v17  ;;  %v4507_v17 = vld [vmem:[%s4871_s3] sm:$0xff]  ;;  %s4913_s3 = smov 48  }
 0x40b   : > { %v1723_v18 = vpop.xlane.xlu1 %1722 }
 0x40c   : > { %v1724_v9 = vsub.f32 %v1720_v52, %v1723_v18  ;;  %v2027_v18 = vld [vmem:[%s4125_s20 + $0x18] sm:$0xff] }
 0x40e   : > { %v3845_v19 = vpop.eup %3844  ;;  %v1725_v20 = vmul.f32 1.442695, %v1724_v9  ;;  %v2026_v9 = vld [vmem:[%s4125_s20 + $0x10] sm:$0xff] }
 0x40f   : > { %v1650_v11 = vsel %vm1139_vm3, %v3845_v19, 0.0 }
 0x410   : > { %3846 = vpow2.f32 %v1725_v20  ;;  %1651 = vadd.xlane.f32.xlu0 %v1650_v11 }
 0x416   : > { %v3847_v7 = vpop.eup %3846 }
 0x417   : > { %v1727_v14 = vsel %vm1139_vm3, %v3847_v7, 0.0 }
 0x418   : > { %1728 = vadd.xlane.f32.xlu1 %v1727_v14  ;;  %v2024_v14 = vld [vmem:[%s4125_s20] sm:$0xff] }
 0x41b   : > { %v1877_v21 = vpop.xlane.xlu2 %1876 }
 0x41c   : > { %v1878_v22 = vsub.f32 %v1874_v1, %v1877_v21 }
 0x41e   : > { %v1879_v23 = vmul.f32 1.442695, %v1878_v22 }
 0x420   : > { %3848 = vpow2.f32 %v1879_v23 }
 0x423   : > { %v1800_v24 = vpop.xlane.xlu2 %1799 }
 0x424   : > { %v1801_v12 = vsub.f32 %v1797_v2, %v1800_v24 }
 0x426   : > { %v3849_v25 = vpop.eup %3848  ;;  %v1802_v26 = vmul.f32 1.442695, %v1801_v12 }
 0x427   : > { %v1881_v27 = vsel %vm1139_vm3, %v3849_v25, 0.0 }
 0x428   : > { %3850 = vpow2.f32 %v1802_v26  ;;  %1882 = vadd.xlane.f32.xlu2 %v1881_v27  ;;  %v3825_v27 = vld [vmem:[%s4894_s11] ss:$0 sm:$0xff] }
 0x42e   : > { %v3851_v15 = vpop.eup %3850 }
 0x42f   : > { %v1804_v28 = vsel %vm1139_vm3, %v3851_v15, 0.0 }
 0x430   : > { %1805 = vadd.xlane.f32.xlu0 %v1804_v28 }
 0x483   : > { %v1652_v31 = vpop.xlane.xlu0 %1651 }
 0x484   : > { %3852 = vrcp.f32 %v1652_v31 }
 0x48a   : > { %v3853_v43 = vpop.eup %3852 }
 0x48b   : > { %v1654_v44 = vmul.f32 %v3853_v43, %v3845_v19  ;;  %v1729_v45 = vpop.xlane.xlu1 %1728 }
 0x48c   : > { %3854 = vrcp.f32 %v1729_v45 }
 0x48d   : > { %3594 = vmatmul.msk.f32.vlgmr.msrb.gmra.mxu3 %vm1139_vm3, %v1654_v44 }
 0x48e   : > { %1904 = vmatpush.msrb.mxu3 %v1600_v16 }
 0x492   : > { %v3855_v49 = vpop.eup %3854 }
 0x493   : > { %v1731_v52 = vmul.f32 %v3855_v49, %v3847_v7  ;;  %v2025_v7 = vld [vmem:[%s4125_s20 + $0x8] sm:$0xff] }
 0x495   : > { %3600 = vmatmul.msk.f32.vlgmr.msra.gmra.mxu3 %vm1139_vm3, %v1731_v52 }
 0x49b   : > { %v1883_v53 = vpop.xlane.xlu2 %1882 }
 0x49c   : > { %3856 = vrcp.f32 %v1883_v53 }
 0x4a2   : > { %v3857_v58 = vpop.eup %3856 }
 0x4a3   : > { %v1885_v63 = vmul.f32 %v3857_v58, %v3849_v25  ;;  %v1806_v33 = vpop.xlane.xlu0 %1805 }
 0x4a4   : > { %3858 = vrcp.f32 %v1806_v33  ;;  %v2097_v33 = vld [vmem:[%s4895_s8 + $0x10] sm:$0xff] }
 0x4a5   : > { %3612 = vmatmul.msk.f32.vlgmr.msrb.gmra.mxu3 %vm1139_vm3, %v1885_v63  ;;  %3860 = vrcp.f32 %v4038_v32  ;;  %v2098_v63 = vld [vmem:[%s4895_s8 + $0x18] sm:$0xff]  ;;  %v3828_v32 = vld [vmem:[%s4899_s9] ss:$0 sm:$0xff] }
 0x4aa   : > { %v3859_v56 = vpop.eup %3858 }
 0x4ab   : > { %v1808_v0 = vmul.f32 %v3859_v56, %v3851_v15  ;;  %v3861_v34 = vpop.eup %3860  ;;  %v2096_v56 = vld [vmem:[%s4895_s8 + $0x8] sm:$0xff] }
 0x4ac   : > { %v2062_v36 = vmul.f32 32.0, %v3861_v34  ;;  %vm2066_vm9 = vweird.f32 %v3861_v34 }
 0x4ad   : > { %3606 = vmatmul.msk.f32.vlgmr.msra.gmra.mxu1 %vm1139_vm3, %v1808_v0  ;;  %v2095_v0 = vld [vmem:[%s4895_s8] sm:$0xff] }
 0x4ae   : > { %v2063_v43 = vsub.f32 1.0, %v2062_v36 }
 0x4b0   : > { %v2064_v44 = vmul.f32 %v3861_v34, %v2063_v43 }
 0x4b2   : > { %v2065_v45 = vadd.f32 %v3861_v34, %v2064_v44  ;;  %v3829_v44 = vld [vmem:[%s4900_s13] ss:$0 sm:$0xff] }
 0x4b4   : > { %v4531_v16 = vsel %vm2066_vm9, %v3861_v34, %v2065_v45 }
 0x510   : > { %v1675_v1 = vpop.f32.mrf.mxu3 }
 0x518   : > { %v1752_v3 = vpop.f32.mrf.mxu3 }
 0x528   : > { %v1906_v4 = vpop.f32.mrf.mxu3 }
 0x529   : > { %1925 = vmatpush.msrb.mxu0 %v1906_v4  ;;  %1950 = vmatpush.msrb.mxu1 %v1906_v4 }
 0x52a   : > { %1975 = vmatpush.msra.mxu2 %v1906_v4  ;;  %2000 = vmatpush.msra.mxu3 %v1906_v4  ;;  %v1829_v2 = vpop.f32.mrf.mxu1  ;;  %v2132_v4 = vld [vmem:[%s4896_s16 + $0x28] sm:$0xff] }
 0x52b   : > { %1926 = vmatpush.msrb.mxu0 %v1829_v2  ;;  %1951 = vmatpush.msrb.mxu1 %v1829_v2 }
 0x52c   : > { %1976 = vmatpush.msra.mxu2 %v1829_v2  ;;  %2001 = vmatpush.msra.mxu3 %v1829_v2 }
 0x52d   : > { %1927 = vmatpush.msrb.mxu0 %v1752_v3  ;;  %1952 = vmatpush.msrb.mxu1 %v1752_v3 }
 0x52e   : > { %1977 = vmatpush.msra.mxu2 %v1752_v3  ;;  %2002 = vmatpush.msra.mxu3 %v1752_v3  ;;  %v2133_v3 = vld [vmem:[%s4896_s16 + $0x30] sm:$0xff] }
 0x52f   : > { %1928 = vmatpush.msrb.mxu0 %v1675_v1  ;;  %1953 = vmatpush.msrb.mxu1 %v1675_v1 }
 0x530   : > { %1978 = vmatpush.msra.mxu2 %v1675_v1  ;;  %2003 = vmatpush.msra.mxu3 %v1675_v1  ;;  %v2134_v1 = vld [vmem:[%s4896_s16 + $0x38] sm:$0xff] }
 0x531   : > { %3619 = vmatmul.msk.f32.vlgmr.msra.gmra.mxu3 %vm1101_vm2, %v4498_v8  ;;  %3615 = vmatmul.msk.f32.vlgmr.msrb.gmra.mxu1 %vm1101_vm2, %v4501_v10 }
 0x532   : > { %3617 = vmatmul.msk.f32.vlgmr.msra.gmra.mxu2 %vm1101_vm2, %v4504_v13  ;;  %3613 = vmatmul.msk.f32.vlgmr.msrb.gmra.mxu0 %vm1101_vm2, %v4507_v17 }
 0x533   : > { %2047 = vmatpush.msra.mxu0 %v2027_v18  ;;  %2118 = vmatpush.msra.mxu1 %v2098_v63 }
 0x534   : > { %2151 = vmatpush.msrb.mxu2 %v2134_v1  ;;  %v3625_v1 = vld [vmem:[%s4115_s6 + $0x30] sm:$0xff] }
 0x535   : > { %2048 = vmatpush.msra.mxu0 %v2026_v9  ;;  %2119 = vmatpush.msra.mxu1 %v2097_v33  ;;  %v2131_v9 = vld [vmem:[%s4896_s16 + $0x20] sm:$0xff] }
 0x536   : > { %2152 = vmatpush.msrb.mxu2 %v2133_v3  ;;  %v3624_v3 = vld [vmem:[%s4115_s6 + $0x28] sm:$0xff] }
 0x537   : > { %2049 = vmatpush.msra.mxu0 %v2025_v7  ;;  %2120 = vmatpush.msra.mxu1 %v2096_v56 }
 0x538   : > { %2153 = vmatpush.msrb.mxu2 %v2132_v4  ;;  %v3623_v4 = vld [vmem:[%s4115_s6 + $0x20] sm:$0xff] }
 0x539   : > { %2050 = vmatpush.msra.mxu0 %v2024_v14  ;;  %2121 = vmatpush.msra.mxu1 %v2095_v0  ;;  %v3626_v0 = vld [vmem:[%s4115_s6 + $0x38] sm:$0xff] }
 0x53a   : > { %2154 = vmatpush.msrb.mxu2 %v2131_v9  ;;  %2221 = vmatpush.msrb.mxu3 %v3626_v0 }
 0x53c   : > { %2222 = vmatpush.msrb.mxu3 %v3625_v1 }
 0x53e   : > { %2223 = vmatpush.msrb.mxu3 %v3624_v3 }
 0x540   : > { %2224 = vmatpush.msrb.mxu3 %v3623_v4 }
 0x5ae   : > { %v1955_v19 = vpop.f32.mrf.mxu1 }
 0x5af   : > { %2009 = vrot.lane.b32.xlu1 %v1955_v19, %s4843_s26  ;;  %v1930_v21 = vpop.f32.mrf.mxu0  ;;  %s4907_s26 = smov 72  }
 0x5b4   : > { %v2005_v20 = vpop.f32.mrf.mxu3 }
 0x5b5   : > { %2017 = vrot.lane.b32.xlu0 %v2005_v20, %s4845_s2  ;;  %v1980_v11 = vpop.f32.mrf.mxu2  ;;  %v2130_v20 = vld [vmem:[%s4896_s16 + $0x18] sm:$0xff]  ;;  %s4909_s2 = smov 40  }
 0x5b6   : > { %2013 = vrot.lane.b32.xlu2 %v1980_v11, %s4844_s18  ;;  %2155 = vmatpush.msrb.mxu2 %v2130_v20  ;;  %s4908_s18 = smov 80  }
 0x610   : > { %v2014_v24 = vpop.permute.xlu2 %2013 }
 0x621   : > { %v2010_v22 = vpop.permute.xlu1 %2009 }
 0x622   : > { %v2020_v23 = vsel %vm1139_vm3, %v1930_v21, %v2010_v22 }
 0x623   : > { %v2021_v12 = vsel %vm1060_vm0, %v2020_v23, %v2014_v24  ;;  %v3826_v24 = vld [vmem:[%s4897_s22] ss:$0 sm:$0xff] }
 0x627   : > { %v2018_v25 = vpop.permute.xlu0 %2017 }
 0x628   : > { %v2023_v26 = vsel %vm2022_vm8, %v2021_v12, %v2018_v25 }
 0x629   : > { %3620 = vmatmul.msk.f32.vlgmr.msra.gmra.mxu0 %vm1101_vm2, %v2023_v26  ;;  %v3827_v26 = vld [vmem:[%s4898_s14] ss:$0 sm:$0xff] }
 0x6a6   : > { %v2052_v15 = vpop.f32.mrf.mxu0 }
 0x6a7   : > { %v2053_v28 = vadd.f32 %v3825_v27, %v2052_v15 }
 0x6a9   : > { %v2055_v29 = vadd.f32 %v2053_v28, %v4288_v30  ;;  %v2129_v28 = vld [vmem:[%s4896_s16 + $0x10] sm:$0xff] }
 0x6aa   : > { %2156 = vmatpush.msrb.mxu2 %v2129_v28 }
 0x6ab   : > { %v2058_v31 = vsel %vm1101_vm2, %v2055_v29, 0.0 }
 0x6ac   : > { %2059 = vadd.xlane.f32.xlu1 %v2058_v31  ;;  %v2127_v31 = vld [vmem:[%s4896_s16] sm:$0xff] }
 0x71f   : > { %v2060_v30 = vpop.xlane.xlu1 %2059 }
 0x720   : > { %v2068_v49 = vmul.f32 %v4531_v16, %v2060_v30 }
 0x722   : > { %v2069_v52 = vsub.f32 %v2055_v29, %v2068_v49  ;;  %v2128_v29 = vld [vmem:[%s4896_s16 + $0x8] sm:$0xff] }
 0x723   : > { %2157 = vmatpush.msrb.mxu2 %v2128_v29 }
 0x724   : > { %v2070_v53 = vmul.f32 %v2069_v52, %v2069_v52 }
 0x725   : > { %2158 = vmatpush.msrb.mxu2 %v2127_v31 }
 0x726   : > { %v2071_v58 = vsel %vm1101_vm2, %v2070_v53, 0.0 }
 0x727   : > { %2072 = vadd.xlane.f32.xlu0 %v2071_v58 }
 0x79a   : > { %v2073_v2 = vpop.xlane.xlu0 %2072 }
 0x79b   : > { %v2074_v18 = vmul.f32 %v2073_v2, %v4531_v16 }
 0x79d   : > { %v2075_v19 = vadd.f32 1e-05, %v2074_v18 }
 0x79f   : > { %3862 = vrsqrt.f32 %v2075_v19  ;;  %vm2082_vm11 = vweird.f32 %v2075_v19 }
 0x7a5   : > { %v3863_v11 = vpop.eup %3862 }
 0x7a6   : > { %v2077_v7 = vmul.f32 %v3863_v11, %v2075_v19  ;;  %vm2083_vm10 = vweird.f32 %v3863_v11 }
 0x7a7   : > { %vm2084_vm12 = vmor %vm2082_vm11, %vm2083_vm10  ;;  %vm3230_vm10 = vcmask 89088   ;;  %vm3245_vm11 = vcmask 7168  }
 0x7a8   : > { %v2078_v14 = vmul.f32 %v3863_v11, %v2077_v7 }
 0x7aa   : > { %v2079_v21 = vmul.f32 0.5, %v2078_v14 }
 0x7ac   : > { %v2080_v22 = vsub.f32 1.5, %v2079_v21 }
 0x7ae   : > { %v2081_v23 = vmul.f32 %v3863_v11, %v2080_v22  ;;  %v3830_v22 = vld [vmem:[%s4901_s19] ss:$0 sm:$0xff] }
 0x7b0   : > { %v2085_v12 = vsel %vm2084_vm12, %v3863_v11, %v2081_v23  ;;  %vm3295_vm12 = vcmask 81992  }
 0x7b1   : > { %v2086_v25 = vmul.f32 %v2085_v12, %v2069_v52  ;;  %v3831_v12 = vld [vmem:[%s4902_s25] ss:$0 sm:$0xff] }
 0x7b3   : > { %v2090_v27 = vmul.f32 %v3826_v24, %v2086_v25 }
 0x7b5   : > { %v2094_v15 = vadd.f32 %v3827_v26, %v2090_v27  ;;  %v3832_v27 = vld [vmem:[%s4120_s12 + $0x1] ss:$0 sm:$0xff] }
 0x7b7   : > { %3621 = vmatmul.msk.f32.vlgmr.msra.gmra.mxu1 %vm1101_vm2, %v2094_v15 }
 0x834   : > { %v2123_v34 = vpop.f32.mrf.mxu1 }
 0x835   : > { %v2124_v36 = vadd.f32 %v3828_v32, %v2123_v34 }
 0x837   : > { %v2126_v43 = vmax.f32 %v2124_v36, 0.0 }
 0x839   : > { %3622 = vmatmul.msk.f32.vlgmr.msrb.gmra.mxu2 %vm2139_vm13, %v2126_v43 }
 0x8bc   : > { %v2160_v45 = vpop.f32.mrf.mxu2 }
 0x8bd   : > { %v2161_v30 = vadd.f32 %v3829_v44, %v2160_v45  ;;  %v3902_v44 = vld [vmem:[%s4080_s29 + $0x8] sm:$0xff]  ;;  %v3903_v45 = vld [vmem:[%s4080_s29 + $0x10] sm:$0xff] }
 0x8bf   : > { %v2163_v49 = vadd.f32 %v2161_v30, %v2094_v15  ;;  %v3904_v30 = vld [vmem:[%s4080_s29 + $0x40] sm:$0xff] }
 0x8c1   : > { %v2166_v52 = vsel %vm1101_vm2, %v2163_v49, 0.0 }
 0x8c2   : > { %2167 = vadd.xlane.f32.xlu2 %v2166_v52  ;;  %v3906_v52 = vld [vmem:[%s4080_s29 + $0x18] sm:$0xff] }
 0x935   : > { %v2168_v53 = vpop.xlane.xlu2 %2167 }
 0x936   : > { %v2169_v58 = vmul.f32 %v2168_v53, %v4531_v16  ;;  %v3907_v53 = vld [vmem:[%s4080_s29] sm:$0xff] }
 0x938   : > { %v2170_v63 = vsub.f32 %v2163_v49, %v2169_v58  ;;  %v3905_v49 = vld [vmem:[%s4080_s29 + $0x20] sm:$0xff] }
 0x93a   : > { %v2171_v33 = vmul.f32 %v2170_v63, %v2170_v63 }
 0x93c   : > { %v2172_v56 = vsel %vm1101_vm2, %v2171_v33, 0.0 }
 0x93d   : > { %2173 = vadd.xlane.f32.xlu1 %v2172_v56 }
 0x9b0   : > { %v2174_v2 = vpop.xlane.xlu1 %2173 }
 0x9b1   : > { %v2175_v18 = vmul.f32 %v2174_v2, %v4531_v16 }
 0x9b3   : > { %v2176_v9 = vadd.f32 1e-05, %v2175_v18 }
 0x9b5   : > { %3864 = vrsqrt.f32 %v2176_v9  ;;  %vm2183_vm15 = vweird.f32 %v2176_v9 }
 0x9bb   : > { %v3865_v19 = vpop.eup %3864 }
 0x9bc   : > { %v2178_v20 = vmul.f32 %v3865_v19, %v2176_v9  ;;  %vm2184_vm14 = vweird.f32 %v3865_v19 }
 0x9bd   : > { %vm2185_vm1 = vmor %vm2183_vm15, %vm2184_vm14 }
 0x9be   : > { %v2179_v11 = vmul.f32 %v3865_v19, %v2178_v20 }
 0x9c0   : > { %v2180_v7 = vmul.f32 0.5, %v2179_v11 }
 0x9c2   : > { %v2181_v14 = vsub.f32 1.5, %v2180_v7 }
 0x9c4   : > { %v2182_v21 = vmul.f32 %v3865_v19, %v2181_v14 }
 0x9c6   : > { %v2186_v23 = vsel %vm2185_vm1, %v3865_v19, %v2182_v21 }
 0x9c7   : > { %v2187_v24 = vmul.f32 %v2186_v23, %v2170_v63 }
 0x9c9   : > { %v2191_v25 = vmul.f32 %v3830_v22, %v2187_v24 }
 0x9cb   : > { %v4564_v26 = vadd.f32 %v3831_v12, %v2191_v25 }
 0x9cd   : > { %3628 = vmatmul.msk.f32.vlgmr.msrb.gmra.mxu3 %vm1101_vm2, %v4564_v26 }
 0xa50   : > { %v2226_v15 = vpop.f32.mrf.mxu3 }
 0xa51   : > { %v2227_v28 = vadd.f32 %v3832_v27, %v2226_v15 }
 0xa53   : > { %v2229_v29 = vmul.f32 0.70710677, %v2227_v28 }
 0xa55   : > { %2231 = vrot.lane.b32.xlu1 %v2229_v29, %s4903_s24  ;;  %2328 = vrot.lane.b32.xlu2 %v2229_v29, %s4904_s30  ;;  %s4910_s24 = smov 56   ;;  %s4911_s30 = smov 88  }
 0xa56   : > { %2292 = vrot.lane.b32.xlu0 %v2229_v29, %s4905_s4  ;;  %2278 = vmatpush.msrb.mxu1 %v2229_v29  ;;  %s4912_s4 = smov 64  }
 0xa57   : > { %3633 = vmatmul.msk.f32.vlgmr.msrb.gmra.mxu1 %vm1139_vm3, %v4305_v35 }
 0xa5d   : > { %2397 = vrot.lane.b32.xlu1 %v2227_v28, %s4906_s15  ;;  %2465 = vrot.lane.b32.xlu2 %v2227_v28, %s4907_s26  ;;  %s4915_s26 = sld [smem:[#allocation29_spill]]  ;;  %s4918_s15 = smov 16  }
 0xa5e   : > { %2429 = vrot.lane.b32.xlu0 %v2227_v28, %s4908_s18  ;;  %s4917_s18 = smov 24  }
 0xa5f   : > { %3634 = vmatmul.msk.f32.gmra.mxu1 %vm1139_vm3, %v4310_v37 }
 0xa65   : > { %2601 = vrot.lane.b32.xlu1 %v2227_v28, %s4909_s2  ;;  %2501 = vrot.lane.b32.xlu2 %v2227_v28, %s4910_s24  ;;  %s4916_s2 = sld [smem:[#allocation30_spill]]  ;;  %s4919_s24 = smov 8  }
 0xa66   : > { %2365 = vrot.lane.b32.xlu0 %v2227_v28, %s4911_s30  ;;  %s4920_s30 = sld [smem:[#allocation11_spill]] }
 0xa67   : > { %3635 = vmatmul.msk.f32.gmra.mxu1 %vm1139_vm3, %v4315_v39 }
 0xa6d   : > { %2533 = vrot.lane.b32.xlu2 %v2227_v28, %s4912_s4  ;;  %s1020_s4 = scalar_lea.vmem %s4920_s30, %s4265_s21  ;;  %s4040_s30 = smov 119  }
 0xa6e   : > { %2565 = vrot.lane.b32.xlu0 %v2227_v28, %s4913_s3  ;;  %s4914_s3 = sld [smem:[#allocation28_spill]] }
 0xa6f   : > { %3636 = vmatmul.msk.f32.gmra.mxu1 %vm1139_vm3, %v4320_v40 }
 0xaaf   : > { %v2329_v31 = vpop.permute.xlu2 %2328 }
 0xab0   : > { %2346 = vmatpush.msra.mxu2 %v2329_v31 }
 0xab1   : > { %3641 = vmatmul.msk.f32.vlgmr.msra.gmra.mxu2 %vm1139_vm3, %v4340_v47 }
 0xab7   : > { %v2466_v37 = vpop.permute.xlu2 %2465 }
 0xab8   : > { %2483 = vmatpush.msrb.mxu2 %v2466_v37 }
 0xab9   : > { %3642 = vmatmul.msk.f32.gmra.mxu2 %vm1139_vm3, %v4357_v54 }
 0xabf   : > { %v2502_v39 = vpop.permute.xlu2 %2501 }
 0xac1   : > { %3643 = vmatmul.msk.f32.gmra.mxu2 %vm1139_vm3, %v4374_v59 }
 0xac7   : > { %v2232_v32 = vpop.permute.xlu1 %2231  ;;  %v2534_v36 = vpop.permute.xlu2 %2533 }
 0xac8   : > { %v2293_v34 = vpop.permute.xlu0 %2292  ;;  %2249 = vmatpush.msrb.mxu0 %v2232_v32 }
 0xac9   : > { %2310 = vmatpush.msra.mxu3 %v2293_v34  ;;  %3629 = vmatmul.msk.f32.vlgmr.msrb.gmra.mxu0 %vm1139_vm3, %v4325_v41 }
 0xaca   : > { %3637 = vmatmul.msk.f32.vlgmr.msra.gmra.mxu3 %vm1139_vm3, %v4328_v42  ;;  %3644 = vmatmul.msk.f32.gmra.mxu2 %vm1139_vm3, %v4388_v61 }
 0xacf   : > { %v2398_v40 = vpop.permute.xlu1 %2397 }
 0xad0   : > { %v2430_v43 = vpop.permute.xlu0 %2429  ;;  %2415 = vmatpush.msra.mxu1 %v2398_v40 }
 0xad1   : > { %2447 = vmatpush.msrb.mxu3 %v2430_v43  ;;  %3630 = vmatmul.msk.f32.gmra.mxu0 %vm1139_vm3, %v4337_v46 }
 0xad2   : > { %2551 = vmatpush.msrb.mxu1 %v2534_v36  ;;  %3638 = vmatmul.msk.f32.gmra.mxu3 %vm1139_vm3, %v4343_v50 }
 0xad3   : > { %3657 = vmatmul.msk.f32.vlgmr.msrb.gmra.mxu2 %vm1139_vm3, %v4340_v47  ;;  %3649 = vmatmul.msk.f32.vlgmr.msra.gmra.mxu1 %vm1139_vm3, %v4305_v35 }
 0xad7   : > { %v2602_v41 = vpop.permute.xlu1 %2601 }
 0xad8   : > { %v2366_v42 = vpop.permute.xlu0 %2365  ;;  %2619 = vmatpush.msra.mxu2 %v2602_v41 }
 0xad9   : > { %2383 = vmatpush.msra.mxu0 %v2366_v42 }
 0xada   : > { %3639 = vmatmul.msk.f32.gmra.mxu3 %vm1139_vm3, %v4360_v55  ;;  %3631 = vmatmul.msk.f32.gmra.mxu0 %vm1139_vm3, %v4354_v51 }
 0xadb   : > { %2519 = vmatpush.msrb.mxu0 %v2502_v39  ;;  %3658 = vmatmul.msk.f32.gmra.mxu2 %vm1139_vm3, %v4357_v54 }
 0xadc   : > { %3650 = vmatmul.msk.f32.gmra.mxu1 %vm1139_vm3, %v3902_v44 }
 0xae0   : > { %v2566_v35 = vpop.permute.xlu0 %2565 }
 0xae1   : > { %2583 = vmatpush.msra.mxu3 %v2566_v35 }
 0xae2   : > { %3640 = vmatmul.msk.f32.gmra.mxu3 %vm1139_vm3, %v4377_v60  ;;  %3632 = vmatmul.msk.f32.gmra.mxu0 %vm1139_vm3, %v4371_v57 }
 0xae3   : > { %3659 = vmatmul.msk.f32.gmra.mxu2 %vm1139_vm3, %v4374_v59 }
 0xae4   : > { %3651 = vmatmul.msk.f32.gmra.mxu1 %vm1139_vm3, %v3903_v45 }
 0xaea   : > { %3653 = vmatmul.msk.f32.vlgmr.msrb.gmra.mxu3 %vm1139_vm3, %v3904_v30  ;;  %3645 = vmatmul.msk.f32.vlgmr.msra.gmra.mxu0 %vm1139_vm3, %v3905_v49 }
 0xaeb   : > { %3660 = vmatmul.msk.f32.gmra.mxu2 %vm1139_vm3, %v4388_v61 }
 0xaec   : > { %3652 = vmatmul.msk.f32.gmra.mxu1 %vm1139_vm3, %v3906_v52 }
 0xaf2   : > { %3654 = vmatmul.msk.f32.gmra.mxu3 %vm1139_vm3, %v4343_v50  ;;  %3646 = vmatmul.msk.f32.gmra.mxu0 %vm1139_vm3, %v4337_v46  ;;  %v3908_v46 = vld [vmem:[%s4080_s29 + $0x48] sm:$0xff]  ;;  %v3910_v50 = vld [vmem:[%s4080_s29 + $0x30] sm:$0xff] }
 0xaf3   : > { %3673 = vmatmul.msk.f32.vlgmr.msra.gmra.mxu2 %vm1139_vm3, %v4340_v47  ;;  %v3909_v47 = vld [vmem:[%s4080_s29 + $0x28] sm:$0xff] }
 0xaf4   : > { %3665 = vmatmul.msk.f32.vlgmr.msrb.gmra.mxu1 %vm1139_vm3, %v3907_v53 }
 0xafa   : > { %3655 = vmatmul.msk.f32.gmra.mxu3 %vm1139_vm3, %v4360_v55  ;;  %3647 = vmatmul.msk.f32.gmra.mxu0 %vm1139_vm3, %v4354_v51  ;;  %v2280_v51 = vpop.f32.mrf.mxu1 }
 0xafb   : > { %3674 = vmatmul.msk.f32.gmra.mxu2 %vm1139_vm3, %v4357_v54 }
 0xafc   : > { %3666 = vmatmul.msk.f32.gmra.mxu1 %vm1139_vm3, %v3902_v44 }
 0xb02   : > { %3656 = vmatmul.msk.f32.gmra.mxu3 %vm1139_vm3, %v4377_v60  ;;  %3648 = vmatmul.msk.f32.gmra.mxu0 %vm1139_vm3, %v4371_v57 }
 0xb03   : > { %3675 = vmatmul.msk.f32.gmra.mxu2 %vm1139_vm3, %v4374_v59  ;;  %v2283_v59 = vpop.f32.mrf.mxu1 }
 0xb04   : > { %3667 = vmatmul.msk.f32.gmra.mxu1 %vm1139_vm3, %v3903_v45 }
 0xb0a   : > { %3669 = vmatmul.msk.f32.vlgmr.msra.gmra.mxu3 %vm1139_vm3, %v3904_v30  ;;  %3661 = vmatmul.msk.f32.vlgmr.msrb.gmra.mxu0 %vm1139_vm3, %v3905_v49 }
 0xb0b   : > { %3676 = vmatmul.msk.f32.gmra.mxu2 %vm1139_vm3, %v4388_v61  ;;  %v2286_v33 = vpop.f32.mrf.mxu1 }
 0xb0c   : > { %3668 = vmatmul.msk.f32.gmra.mxu1 %vm1139_vm3, %v3906_v52 }
 0xb12   : > { %3670 = vmatmul.msk.f32.gmra.mxu3 %vm1139_vm3, %v3908_v46  ;;  %3662 = vmatmul.msk.f32.gmra.mxu0 %vm1139_vm3, %v3909_v47 }
 0xb1a   : > { %3671 = vmatmul.msk.f32.gmra.mxu3 %vm1139_vm3, %v4360_v55  ;;  %3663 = vmatmul.msk.f32.gmra.mxu0 %vm1139_vm3, %v3910_v50  ;;  %v2289_v55 = vpop.f32.mrf.mxu1 }
 0xb22   : > { %3672 = vmatmul.msk.f32.gmra.mxu3 %vm1139_vm3, %v4377_v60  ;;  %3664 = vmatmul.msk.f32.gmra.mxu0 %vm1139_vm3, %v4371_v57 }
 0xb34   : > { %v2348_v54 = vpop.f32.mrf.mxu2 }
 0xb3c   : > { %v2351_v58 = vpop.f32.mrf.mxu2 }
 0xb44   : > { %v2354_v0 = vpop.f32.mrf.mxu2 }
 0xb46   : > { %v2251_v61 = vpop.f32.mrf.mxu0 }
 0xb47   : > { %v2281_v21 = vadd.f32 %v2280_v51, %v2251_v61 }
 0xb4d   : > { %v2312_v63 = vpop.f32.mrf.mxu3  ;;  %v2357_v18 = vpop.f32.mrf.mxu2 }
 0xb4e   : > { %v2254_v56 = vpop.f32.mrf.mxu0  ;;  %v2324_v12 = vadd.f32 %v2312_v63, %v2281_v21 }
 0xb4f   : > { %v2284_v31 = vadd.f32 %v2283_v59, %v2254_v56 }
 0xb50   : > { %v2417_v57 = vpop.f32.mrf.mxu1  ;;  %v2360_v29 = vadd.f32 %v2348_v54, %v2324_v12 }
 0xb55   : > { %v2315_v1 = vpop.f32.mrf.mxu3 }
 0xb56   : > { %v2485_v11 = vpop.f32.mrf.mxu2  ;;  %v2325_v34 = vadd.f32 %v2315_v1, %v2284_v31 }
 0xb57   : > { %v2257_v3 = vpop.f32.mrf.mxu0 }
 0xb58   : > { %v2287_v4 = vadd.f32 %v2286_v33, %v2257_v3  ;;  %v2361_v43 = vadd.f32 %v2351_v58, %v2325_v34 }
 0xb59   : > { %v2420_v22 = vpop.f32.mrf.mxu1 }
 0xb5d   : > { %v2318_v2 = vpop.f32.mrf.mxu3 }
 0xb5e   : > { %v2326_v9 = vadd.f32 %v2318_v2, %v2287_v4  ;;  %v2488_v15 = vpop.f32.mrf.mxu2 }
 0xb5f   : > { %v2260_v19 = vpop.f32.mrf.mxu0 }
 0xb60   : > { %v4671_v60 = vadd.f32 %v2354_v0, %v2326_v9  ;;  %v2290_v30 = vadd.f32 %v2289_v55, %v2260_v19 }
 0xb61   : > { %v2423_v39 = vpop.f32.mrf.mxu1 }
 0xb65   : > { %v2321_v20 = vpop.f32.mrf.mxu3 }
 0xb66   : > { %v2491_v41 = vpop.f32.mrf.mxu2  ;;  %v2327_v46 = vadd.f32 %v2321_v20, %v2290_v30 }
 0xb67   : > { %v2385_v7 = vpop.f32.mrf.mxu0 }
 0xb68   : > { %v2418_v14 = vadd.f32 %v2417_v57, %v2385_v7  ;;  %v2363_v61 = vadd.f32 %v2357_v18, %v2327_v46 }
 0xb69   : > { %v2426_v44 = vpop.f32.mrf.mxu1 }
 0xb6d   : > { %v2449_v23 = vpop.f32.mrf.mxu3 }
 0xb6e   : > { %v2461_v24 = vadd.f32 %v2449_v23, %v2418_v14  ;;  %v2494_v52 = vpop.f32.mrf.mxu2 }
 0xb6f   : > { %v2388_v27 = vpop.f32.mrf.mxu0 }
 0xb70   : > { %v2497_v25 = vadd.f32 %v2485_v11, %v2461_v24  ;;  %v2421_v28 = vadd.f32 %v2420_v22, %v2388_v27 }
 0xb71   : > { %v2553_v50 = vpop.f32.mrf.mxu1 }
 0xb72   : > { %3677 = vmatpush.xpose.msk.msra.mxu0 %vm1139_vm3, %v2497_v25 }
 0xb75   : > { %v2452_v37 = vpop.f32.mrf.mxu3  ;;  %3678 = vmatmul.msk.f32.vlgmr.msra.gmra.mxu0 %vm1139_vm3, %v2360_v29 }
 0xb76   : > { %v2462_v32 = vadd.f32 %v2452_v37, %v2421_v28  ;;  %v2621_v33 = vpop.f32.mrf.mxu2 }
 0xb77   : > { %v2391_v36 = vpop.f32.mrf.mxu0 }
 0xb78   : > { %v2498_v40 = vadd.f32 %v2488_v15, %v2462_v32  ;;  %v2424_v47 = vadd.f32 %v2423_v39, %v2391_v36 }
 0xb79   : > { %v2556_v4 = vpop.f32.mrf.mxu1 }
 0xb7a   : > { %3680 = vmatpush.xpose.msk.msrb.mxu3 %vm1139_vm3, %v2498_v40 }
 0xb7d   : > { %v2455_v42 = vpop.f32.mrf.mxu3  ;;  %3681 = vmatmul.msk.f32.vlgmr.msrb.gmra.mxu3 %vm1139_vm3, %v2361_v43 }
 0xb7e   : > { %v2463_v58 = vadd.f32 %v2455_v42, %v2424_v47  ;;  %v2624_v57 = vpop.f32.mrf.mxu2 }
 0xb7f   : > { %v2394_v35 = vpop.f32.mrf.mxu0 }
 0xb80   : > { %v2427_v45 = vadd.f32 %v2426_v44, %v2394_v35  ;;  %v2499_v0 = vadd.f32 %v2491_v41, %v2463_v58 }
 0xb81   : > { %v2559_v11 = vpop.f32.mrf.mxu1 }
 0xb85   : > { %v2458_v49 = vpop.f32.mrf.mxu3 }
 0xb86   : > { %v2464_v53 = vadd.f32 %v2458_v49, %v2427_v45  ;;  %v2627_v21 = vpop.f32.mrf.mxu2 }
 0xb87   : > { %v2521_v54 = vpop.f32.mrf.mxu0 }
 0xb88   : > { %v2500_v51 = vadd.f32 %v2494_v52, %v2464_v53  ;;  %v2554_v59 = vadd.f32 %v2553_v50, %v2521_v54 }
 0xb89   : > { %v2562_v24 = vpop.f32.mrf.mxu1 }
 0xb8a   : > { %3686 = vmatpush.xpose.msk.msra.mxu3 %vm1139_vm3, %v2500_v51 }
 0xb8d   : > { %3687 = vmatmul.msk.f32.vlgmr.msra.gmra.mxu3 %vm1139_vm3, %v2363_v61  ;;  %v2585_v63 = vpop.f32.mrf.mxu3 }
 0xb8e   : > { %v2597_v56 = vadd.f32 %v2585_v63, %v2554_v59  ;;  %v2630_v15 = vpop.f32.mrf.mxu2 }
 0xb8f   : > { %v2524_v55 = vpop.f32.mrf.mxu0 }
 0xb90   : > { %v2633_v1 = vadd.f32 %v2621_v33, %v2597_v56  ;;  %v2557_v2 = vadd.f32 %v2556_v4, %v2524_v55 }
 0xb92   : > { %2693 = vmatpush.msra.mxu1 %v2633_v1 }
 0xb94   : > { %3683 = vmatpush.xpose.msk.msrb.mxu1 %vm1139_vm3, %v2499_v0 }
 0xb95   : > { %v2588_v3 = vpop.f32.mrf.mxu3 }
 0xb96   : > { %v2598_v9 = vadd.f32 %v2588_v3, %v2557_v2 }
 0xb97   : > { %v2527_v19 = vpop.f32.mrf.mxu0 }
 0xb98   : > { %v2634_v20 = vadd.f32 %v2624_v57, %v2598_v9  ;;  %v2560_v7 = vadd.f32 %v2559_v11, %v2527_v19 }
 0xb9a   : > { %2754 = vmatpush.msrb.mxu0 %v2634_v20 }
 0xb9d   : > { %v2591_v18 = vpop.f32.mrf.mxu3 }
 0xb9e   : > { %v2599_v14 = vadd.f32 %v2591_v18, %v2560_v7 }
 0xb9f   : > { %v2530_v23 = vpop.f32.mrf.mxu0 }
 0xba0   : > { %v2635_v22 = vadd.f32 %v2627_v21, %v2599_v14  ;;  %v2563_v12 = vadd.f32 %v2562_v24, %v2530_v23  ;;  %v3820_v14 = vld [vmem:[%s4914_s3] ss:$0 sm:$0xff]  ;;  %s4921_s3 = sld [smem:[#allocation10_spill]] }
 0xba1   : > { %v3821_v21 = vld [vmem:[%s4915_s26] ss:$0 sm:$0xff] }
 0xba2   : > { %2815 = vmatpush.msrb.mxu2 %v2635_v22  ;;  %v3154_v22 = vmul.f32 %v3820_v14, %v4273_v6  ;;  %v3163_v6 = vld [vmem:[%s4916_s2] sm:$0xff] }
 0xba4   : > { %v3159_v23 = vadd.f32 %v3821_v21, %v3154_v22  ;;  %v3838_v22 = vld [vmem:[%s4900_s13 + $0x1] ss:$0 sm:$0xff] }
 0xba5   : > { %v2594_v25 = vpop.f32.mrf.mxu3 }
 0xba6   : > { %v2600_v27 = vadd.f32 %v2594_v25, %v2563_v12  ;;  %v3160_v24 = vmul.f32 %v3159_v23, %v3159_v23  ;;  %v3164_v25 = vld [vmem:[%s4916_s2 + $0x8] sm:$0xff]  ;;  %s1016_s26 = scalar_lea.vmem %s4921_s3, %s4265_s21  ;;  %s3362_s3 = scalar_lea.hbm %s4206_s27, %s4236_s5 }
 0xba7   : > { %s3943_s5 = scalar_lea.hbm %s4206_s27, 2 }
 0xba8   : > { %v2636_v28 = vadd.f32 %v2630_v15, %v2600_v27 }
 0xbaa   : > { %2876 = vmatpush.msra.mxu0 %v2636_v28  ;;  %v3696_v28 = vld [vmem:[%s4125_s20 + $0x38] sm:$0xff] }
 0xbf2   : > { %v2660_v29 = vpop.f32.mrf.mxu0 }
 0xbf3   : > { %v2663_v31 = vsel %vm4460_vm4, -1e+30, %v2660_v29 }
 0xbf4   : > { %v2664_v37 = vsel %vm1139_vm3, %v2663_v31, -inf }
 0xbf5   : > { %2665 = vmax.xlane.f32.xlu0 %v2664_v37 }
 0xc00   : > { %v2721_v39 = vpop.f32.mrf.mxu3 }
 0xc01   : > { %v2724_v32 = vsel %vm4467_vm5, -1e+30, %v2721_v39 }
 0xc02   : > { %v2725_v34 = vsel %vm1139_vm3, %v2724_v32, -inf }
 0xc03   : > { %2726 = vmax.xlane.f32.xlu2 %v2725_v34 }
 0xc10   : > { %v2843_v38 = vpop.f32.mrf.mxu3 }
 0xc11   : > { %v2846_v45 = vsel %vm4474_vm6, -1e+30, %v2843_v38 }
 0xc12   : > { %v2847_v48 = vsel %vm1139_vm3, %v2846_v45, -inf }
 0xc68   : > { %v2666_v40 = vpop.xlane.xlu0 %2665 }
 0xc69   : > { %v2667_v36 = vsub.f32 %v2663_v31, %v2666_v40  ;;  %v3693_v31 = vld [vmem:[%s4125_s20 + $0x20] sm:$0xff] }
 0xc6b   : > { %v2668_v43 = vmul.f32 1.442695, %v2667_v36 }
 0xc6d   : > { %3866 = vpow2.f32 %v2668_v43 }
 0xc73   : > { %v3867_v41 = vpop.eup %3866 }
 0xc74   : > { %v2670_v42 = vsel %vm1139_vm3, %v3867_v41, 0.0 }
 0xc75   : > { %2671 = vadd.xlane.f32.xlu1 %v2670_v42 }
 0xc76   : > { %v2727_v44 = vpop.xlane.xlu2 %2726 }
 0xc77   : > { %v2728_v35 = vsub.f32 %v2724_v32, %v2727_v44 }
 0xc79   : > { %v2729_v30 = vmul.f32 1.442695, %v2728_v35 }
 0xc7b   : > { %3868 = vpow2.f32 %v2729_v30 }
 0xc7d   : > { %2848 = vmax.xlane.f32.xlu1 %v2847_v48 }
 0xc81   : > { %v3869_v49 = vpop.eup %3868 }
 0xc82   : > { %v2731_v52 = vsel %vm1139_vm3, %v3869_v49, 0.0 }
 0xc83   : > { %2732 = vadd.xlane.f32.xlu2 %v2731_v52 }
 0xce8   : > { %v2672_v53 = vpop.xlane.xlu1 %2671 }
 0xce9   : > { %3870 = vrcp.f32 %v2672_v53  ;;  %v3704_v53 = vld [vmem:[%s4895_s8 + $0x38] sm:$0xff] }
 0xcef   : > { %v3871_v46 = vpop.eup %3870 }
 0xcf0   : > { %v2674_v47 = vmul.f32 %v3871_v46, %v3867_v41  ;;  %v2849_v50 = vpop.xlane.xlu1 %2848  ;;  %v3834_v41 = vld [vmem:[%s4894_s11 + $0x1] ss:$0 sm:$0xff]  ;;  %v3703_v46 = vld [vmem:[%s4895_s8 + $0x30] sm:$0xff] }
 0xcf1   : > { %v2850_v51 = vsub.f32 %v2846_v45, %v2849_v50  ;;  %v3714_v50 = vld [vmem:[%s4896_s16 + $0x78] sm:$0xff] }
 0xcf2   : > { %3679 = vmatmul.msk.f32.vlgmr.msra.gmra.mxu1 %vm1139_vm3, %v2674_v47  ;;  %v3701_v47 = vld [vmem:[%s4895_s8 + $0x20] sm:$0xff] }
 0xcf3   : > { %v2851_v54 = vmul.f32 1.442695, %v2850_v51  ;;  %v3713_v51 = vld [vmem:[%s4896_s16 + $0x70] sm:$0xff] }
 0xcf5   : > { %3872 = vpow2.f32 %v2851_v54  ;;  %v3712_v54 = vld [vmem:[%s4896_s16 + $0x68] sm:$0xff] }
 0xcf6   : > { %v2733_v62 = vpop.xlane.xlu2 %2732 }
 0xcf7   : > { %3874 = vrcp.f32 %v2733_v62 }
 0xcfa   : > { %3684 = vmatmul.msk.f32.vlgmr.msrb.gmra.mxu1 %vm1139_vm3, %v4671_v60 }
 0xcfb   : > { %v3873_v59 = vpop.eup %3872 }
 0xcfc   : > { %v2853_v61 = vsel %vm1139_vm3, %v3873_v59, 0.0 }
 0xcfd   : > { %v3875_v58 = vpop.eup %3874  ;;  %2854 = vadd.xlane.f32.xlu1 %v2853_v61  ;;  %v3711_v61 = vld [vmem:[%s4896_s16 + $0x60] sm:$0xff] }
 0xcfe   : > { %v2735_v63 = vmul.f32 %v3875_v58, %v3869_v49 }
 0xd00   : > { %3682 = vmatmul.msk.f32.vlgmr.msrb.gmra.mxu0 %vm1139_vm3, %v2735_v63  ;;  %v3710_v63 = vld [vmem:[%s4896_s16 + $0x58] sm:$0xff] }
 0xd6f   : > { %v2695_v33 = vpop.f32.mrf.mxu1 }
 0xd70   : > { %v2855_v56 = vpop.xlane.xlu1 %2854 }
 0xd71   : > { %3876 = vrcp.f32 %v2855_v56 }
 0xd77   : > { %v3877_v0 = vpop.eup %3876  ;;  %v2782_v1 = vpop.f32.mrf.mxu1 }
 0xd78   : > { %v2857_v55 = vmul.f32 %v3877_v0, %v3873_v59  ;;  %v2785_v3 = vsel %vm4481_vm7, -1e+30, %v2782_v1 }
 0xd79   : > { %v2786_v4 = vsel %vm1139_vm3, %v2785_v3, -inf }
 0xd7a   : > { %2787 = vmax.xlane.f32.xlu0 %v2786_v4  ;;  %3688 = vmatmul.msk.f32.vlgmr.msra.gmra.mxu0 %vm1139_vm3, %v2857_v55  ;;  %v3835_v4 = vld [vmem:[%s4897_s22 + $0x1] ss:$0 sm:$0xff] }
 0xd7d   : > { %v2756_v9 = vpop.f32.mrf.mxu0 }
 0xded   : > { %v2788_v60 = vpop.xlane.xlu0 %2787 }
 0xdee   : > { %v2789_v2 = vsub.f32 %v2785_v3, %v2788_v60 }
 0xdf0   : > { %v2790_v19 = vmul.f32 1.442695, %v2789_v2  ;;  %v3836_v2 = vld [vmem:[%s4898_s14 + $0x1] ss:$0 sm:$0xff] }
 0xdf2   : > { %3878 = vpow2.f32 %v2790_v19 }
 0xdf7   : > { %v2878_v57 = vpop.f32.mrf.mxu0 }
 0xdf8   : > { %v3879_v20 = vpop.eup %3878  ;;  %2893 = vmatpush.msra.mxu1 %v2878_v57  ;;  %2913 = vmatpush.msra.mxu2 %v2878_v57 }
 0xdf9   : > { %2933 = vmatpush.msrb.mxu3 %v2878_v57  ;;  %2953 = vmatpush.msrb.mxu0 %v2878_v57  ;;  %v2792_v5 = vsel %vm1139_vm3, %v3879_v20, 0.0 }
 0xdfa   : > { %2793 = vadd.xlane.f32.xlu0 %v2792_v5  ;;  %v3708_v5 = vld [vmem:[%s4896_s16 + $0x48] sm:$0xff] }
 0xe6d   : > { %v2794_v18 = vpop.xlane.xlu0 %2793 }
 0xe6e   : > { %3880 = vrcp.f32 %v2794_v18  ;;  %v3707_v18 = vld [vmem:[%s4896_s16 + $0x40] sm:$0xff] }
 0xe6f   : > { %3882 = vtanh.f32 %v3160_v24 }
 0xe74   : > { %v3881_v11 = vpop.eup %3880 }
 0xe75   : > { %v2796_v7 = vmul.f32 %v3881_v11, %v3879_v20  ;;  %v3883_v27 = vpop.eup %3882  ;;  %v3709_v20 = vld [vmem:[%s4896_s16 + $0x50] sm:$0xff]  ;;  %v3837_v11 = vld [vmem:[%s4899_s9 + $0x1] ss:$0 sm:$0xff] }
 0xe76   : > { %v3162_v15 = vsub.f32 1.0, %v3883_v27 }
 0xe77   : > { %3685 = vmatmul.msk.f32.vlgmr.msrb.gmra.mxu2 %vm1139_vm3, %v2796_v7 }
 0xefa   : > { %v2817_v12 = vpop.f32.mrf.mxu2 }
 0xefb   : > { %2894 = vmatpush.msra.mxu1 %v2817_v12  ;;  %2914 = vmatpush.msra.mxu2 %v2817_v12 }
 0xefc   : > { %2934 = vmatpush.msrb.mxu3 %v2817_v12  ;;  %2954 = vmatpush.msrb.mxu0 %v2817_v12 }
 0xefd   : > { %2895 = vmatpush.msra.mxu1 %v2756_v9  ;;  %2915 = vmatpush.msra.mxu2 %v2756_v9 }
 0xefe   : > { %2935 = vmatpush.msrb.mxu3 %v2756_v9  ;;  %2955 = vmatpush.msrb.mxu0 %v2756_v9 }
 0xeff   : > { %2896 = vmatpush.msra.mxu1 %v2695_v33  ;;  %2916 = vmatpush.msra.mxu2 %v2695_v33 }
 0xf00   : > { %2936 = vmatpush.msrb.mxu3 %v2695_v33  ;;  %2956 = vmatpush.msrb.mxu0 %v2695_v33 }
 0xf01   : > { %3691 = vmatmul.msk.f32.vlgmr.msrb.gmra.mxu3 %vm1101_vm2, %v4504_v13  ;;  %3692 = vmatmul.msk.f32.vlgmr.msrb.gmra.mxu0 %vm1101_vm2, %v4498_v8  ;;  %v3695_v13 = vld [vmem:[%s4125_s20 + $0x30] sm:$0xff] }
 0xf02   : > { %3186 = vmatpush.msra.mxu0 %v3164_v25  ;;  %3690 = vmatmul.msk.f32.vlgmr.msra.gmra.mxu2 %vm1101_vm2, %v4501_v10 }
 0xf03   : > { %3689 = vmatmul.msk.f32.vlgmr.msra.gmra.mxu1 %vm1101_vm2, %v4507_v17  ;;  %v3694_v17 = vld [vmem:[%s4125_s20 + $0x28] sm:$0xff]  ;;  %3069 = vmatpush.msrb.mxu2 %v3704_v53 }
 0xf04   : > { %3187 = vmatpush.msra.mxu0 %v3163_v6  ;;  %3001 = vmatpush.msrb.mxu1 %v3696_v28 }
 0xf05   : > { %3070 = vmatpush.msrb.mxu2 %v3703_v46  ;;  %3103 = vmatpush.msra.mxu3 %v3714_v50 }
 0xf06   : > { %3002 = vmatpush.msrb.mxu1 %v3695_v13 }
 0xf07   : > { %3104 = vmatpush.msra.mxu3 %v3713_v51 }
 0xf08   : > { %3003 = vmatpush.msrb.mxu1 %v3694_v17  ;;  %v3197_v17 = vld [vmem:[%s4195_s17] sm:$0xff] }
 0xf09   : > { %3719 = vmatmul.msk.f32.vlgmr.msra.gmra.mxu0 %vm1060_vm0, %v3162_v15  ;;  %3105 = vmatpush.msra.mxu3 %v3712_v54 }
 0xf0a   : > { %3004 = vmatpush.msrb.mxu1 %v3693_v31  ;;  %v3194_v31 = vld [vmem:[%s1020_s4] sm:$0xff]  ;;  %s997_s4 = sand.u32 1, %s3979_s0  }
 0xf0b   : > { %3106 = vmatpush.msra.mxu3 %v3711_v61 }
 0xf0d   : > { %3107 = vmatpush.msra.mxu3 %v3710_v63 }
 0xf0f   : > { %3108 = vmatpush.msra.mxu3 %v3709_v20 }
 0xf11   : > { %3109 = vmatpush.msra.mxu3 %v3708_v5 }
 0xf13   : > { %3110 = vmatpush.msra.mxu3 %v3707_v18 }
 0xf7e   : > { %v2958_v8 = vpop.f32.mrf.mxu0 }
 0xf7f   : > { %2970 = vrot.lane.b32.xlu1 %v2958_v8, %s4917_s18  ;;  %v3200_v8 = vld [vmem:[%s4195_s17 + $0x18] sm:$0xff]  ;;  %s4922_s18 = sld [smem:[#allocation31_spill]] }
 0xf80   : > { %v2898_v39 = vpop.f32.mrf.mxu1  ;;  %3216 = vmatpush.msra.mxu1 %v3200_v8 }
 0xf84   : > { %v2938_v29 = vpop.f32.mrf.mxu3 }
 0xf85   : > { %2966 = vrot.lane.b32.xlu0 %v2938_v29, %s4918_s15  ;;  %v2918_v10 = vpop.f32.mrf.mxu2  ;;  %v3199_v29 = vld [vmem:[%s4195_s17 + $0x10] sm:$0xff]  ;;  %s4039_s15 = smov 127  }
 0xf86   : > { %2962 = vrot.lane.b32.xlu2 %v2918_v10, %s4919_s24  ;;  %3217 = vmatpush.msra.mxu1 %v3199_v29  ;;  %v3198_v10 = vld [vmem:[%s4195_s17 + $0x8] sm:$0xff]  ;;  %s1024_s24 = scalar_lea.vmem %s4211_s10, %s4265_s21  ;;  %s4041_s21 = smov 118  }
 0xf88   : > { %3218 = vmatpush.msra.mxu1 %v3198_v10 }
 0xf8a   : > { %3219 = vmatpush.msra.mxu1 %v3197_v17 }
 0xfe0   : > { %v2963_v37 = vpop.permute.xlu2 %2962 }
 0xfe1   : > { %v2973_v32 = vsel %vm1139_vm3, %v2898_v39, %v2963_v37 }
 0xff1   : > { %v2971_v34 = vpop.permute.xlu1 %2970 }
 0xff7   : > { %v2967_v40 = vpop.permute.xlu0 %2966 }
 0xff8   : > { %v2974_v36 = vsel %vm1060_vm0, %v2973_v32, %v2967_v40 }
 0xff9   : > { %v2975_v43 = vsel %vm2022_vm8, %v2974_v36, %v2971_v34 }
 0xffa   : > { %3698 = vmatmul.msk.f32.vlgmr.msrb.gmra.mxu1 %vm1101_vm2, %v2975_v43 }
0x1077   : > { %v3006_v42 = vpop.f32.mrf.mxu1 }
0x1078   : > { %v3007_v38 = vadd.f32 %v3834_v41, %v3006_v42 }
0x107a   : > { %v3009_v44 = vadd.f32 %v3007_v38, %v4564_v26  ;;  %v3702_v26 = vld [vmem:[%s4895_s8 + $0x28] sm:$0xff]  ;;  %v3839_v38 = vld [vmem:[%s4901_s19 + $0x1] ss:$0 sm:$0xff] }
0x107b   : > { %3071 = vmatpush.msrb.mxu2 %v3702_v26 }
0x107c   : > { %v3014_v35 = vsel %vm1101_vm2, %v3009_v44, 0.0 }
0x107d   : > { %3015 = vadd.xlane.f32.xlu0 %v3014_v35  ;;  %3072 = vmatpush.msrb.mxu2 %v3701_v47  ;;  %v3840_v35 = vld [vmem:[%s4902_s25 + $0x1] ss:$0 sm:$0xff] }
0x10f0   : > { %v3016_v45 = vpop.xlane.xlu0 %3015 }
0x10f1   : > { %v3017_v30 = vmul.f32 %v3016_v45, %v4531_v16 }
0x10f3   : > { %v3018_v48 = vsub.f32 %v3009_v44, %v3017_v30 }
0x10f5   : > { %v3019_v49 = vmul.f32 %v3018_v48, %v3018_v48 }
0x10f7   : > { %v3020_v52 = vsel %vm1101_vm2, %v3019_v49, 0.0  ;;  %v3841_v49 = vld [vmem:[%s4200_s23] ss:$0 sm:$0xff] }
0x10f8   : > { %3021 = vadd.xlane.f32.xlu2 %v3020_v52 }
0x1110   : > { %3226 = vperm.xlu2 %3816, %v3194_v31  }
0x116b   : > { %v3022_v62 = vpop.xlane.xlu2 %3021 }
0x116c   : > { %v3023_v59 = vmul.f32 %v3022_v62, %v4531_v16 }
0x116e   : > { %v3024_v58 = vadd.f32 1e-05, %v3023_v59 }
0x1170   : > { %3884 = vrsqrt.f32 %v3024_v58  ;;  %vm3031_vm4 = vweird.f32 %v3024_v58 }
0x1173   : > { %v3227_v52 = vpop.permute.xlu2 %3226 }
0x1176   : > { %v3885_v33 = vpop.eup %3884 }
0x1177   : > { %v3026_v56 = vmul.f32 %v3885_v33, %v3024_v58  ;;  %vm3032_vm0 = vweird.f32 %v3885_v33 }
0x1178   : > { %vm3033_vm5 = vmor %vm3031_vm4, %vm3032_vm0 }
0x1179   : > { %v3027_v0 = vmul.f32 %v3885_v33, %v3026_v56 }
0x117b   : > { %v3028_v1 = vmul.f32 0.5, %v3027_v0 }
0x117d   : > { %v3029_v55 = vsub.f32 1.5, %v3028_v1  ;;  %v3196_v1 = vld [vmem:[%s4200_s23] sm:$0x1] }
0x117f   : > { %v3030_v3 = vmul.f32 %v3885_v33, %v3029_v55 }
0x1181   : > { %v3034_v60 = vsel %vm3033_vm5, %v3885_v33, %v3030_v3 }
0x1182   : > { %v3035_v9 = vmul.f32 %v3034_v60, %v3018_v48  ;;  %v4769_v48 = vld [vmem:[%s1016_s26] sm:$0xff]  ;;  %s998_s26 = scalar_lea.vmem [#allocation4], %s997_s4 }
0x1183   : > { %vm3195_vm9 = vcmp.gt.f32.partialorder %v4769_v48, 0.5 }
0x1184   : > { %v3039_v19 = vmul.f32 %v3835_v4, %v3035_v9 }
0x1186   : > { %v3043_v57 = vadd.f32 %v3836_v2, %v3039_v19 }
0x1188   : > { %3706 = vmatmul.msk.f32.vlgmr.msrb.gmra.mxu2 %vm1101_vm2, %v3043_v57 }
0x120b   : > { %v3074_v7 = vpop.f32.mrf.mxu2 }
0x120c   : > { %v3075_v14 = vadd.f32 %v3837_v11, %v3074_v7 }
0x120e   : > { %v3077_v21 = vmax.f32 %v3075_v14, 0.0 }
0x1210   : > { %3716 = vmatmul.msk.f32.vlgmr.msra.gmra.mxu3 %vm2139_vm13, %v3077_v21  ;;  %vm3306_vm13 = vcmask 8192  }
0x1293   : > { %v3112_v23 = vpop.f32.mrf.mxu3 }
0x1294   : > { %v3113_v24 = vadd.f32 %v3838_v22, %v3112_v23 }
0x1296   : > { %v3115_v12 = vadd.f32 %v3113_v24, %v3043_v57 }
0x1298   : > { %v3120_v25 = vsel %vm1101_vm2, %v3115_v12, 0.0 }
0x1299   : > { %3121 = vadd.xlane.f32.xlu1 %v3120_v25  ;;  %v3833_v25 = vld [vmem:[%s4922_s18] ss:$0 sm:$0xff]  ;;  %s3364_s18 = sshll.u32 %s998_s26, 4  ;;  %s3365_s18 = int_to_ptr.vmem [resolvable:$true] %s3364_s18 }
0x130c   : > { %v3122_v6 = vpop.xlane.xlu1 %3121 }
0x130d   : > { %v3123_v27 = vmul.f32 %v3122_v6, %v4531_v16  ;;  %v3189_v6 = vpop.f32.mrf.mxu0 }
0x130f   : > { %v3124_v15 = vsub.f32 %v3115_v12, %v3123_v27  ;;  %v3190_v27 = vadd.f32 %v3833_v25, %v3189_v6 }
0x1311   : > { %v3125_v28 = vmul.f32 %v3124_v15, %v3124_v15 }
0x1313   : > { %v3126_v13 = vsel %vm1101_vm2, %v3125_v28, 0.0  ;;  %v3192_v28 = vmax.f32 %v3190_v27, 0.0 }
0x1314   : > { %3127 = vadd.xlane.f32.xlu0 %v3126_v13 }
0x1387   : > { %v3128_v37 = vpop.xlane.xlu0 %3127 }
0x1388   : > { %v3129_v39 = vmul.f32 %v3128_v37, %v4531_v16 }
0x138a   : > { %v3130_v32 = vadd.f32 1e-05, %v3129_v39 }
0x138c   : > { %3886 = vrsqrt.f32 %v3130_v32  ;;  %vm3137_vm7 = vweird.f32 %v3130_v32 }
0x1392   : > { %v3887_v34 = vpop.eup %3886 }
0x1393   : > { %v3132_v40 = vmul.f32 %v3887_v34, %v3130_v32  ;;  %vm3138_vm6 = vweird.f32 %v3887_v34 }
0x1394   : > { %vm3139_vm8 = vmor %vm3137_vm7, %vm3138_vm6 }
0x1395   : > { %v3133_v36 = vmul.f32 %v3887_v34, %v3132_v40 }
0x1397   : > { %v3134_v43 = vmul.f32 0.5, %v3133_v36 }
0x1399   : > { %v3135_v41 = vsub.f32 1.5, %v3134_v43 }
0x139b   : > { %v3136_v42 = vmul.f32 %v3887_v34, %v3135_v41 }
0x139d   : > { %v3140_v44 = vsel %vm3139_vm8, %v3887_v34, %v3136_v42 }
0x139e   : > { %v3141_v45 = vmul.f32 %v3140_v44, %v3124_v15 }
0x13a0   : > { %v3145_v30 = vmul.f32 %v3839_v38, %v3141_v45 }
0x13a2   : > { %v4763_v16 = vadd.f32 %v3840_v35, %v3145_v30 }
0x13a4   : > { %3720 = vmatmul.msk.f32.vlgmr.msra.gmra.mxu1 %vm1101_vm2, %v4763_v16 }
0x1421   : > { %v3221_v53 = vpop.f32.mrf.mxu1 }
0x1422   : > { %v3242_v46 = vadd.f32 %v3841_v49, %v3221_v53  ;;  %v3229_v26 = vmul.f32 %v3227_v52, %v3221_v53 }
0x1424   : > { %v3244_v47 = vsel %vm3195_vm9, -1e+30, %v3242_v46  ;;  %v3231_v50 = vsel %vm3230_vm10, %v3229_v26, 0.0 }
0x1425   : > { %v3246_v51 = vsel %vm3245_vm11, %v3244_v47, -inf  ;;  %v3232_v54 = vrot.slane %v3231_v50, 4 }
0x1426   : > { %v3247_v62 = vrot.slane %v3246_v51, 4 }
0x1427   : > { %v3233_v59 = vadd.f32 %v3232_v54, %v3231_v50 }
0x1428   : > { %v3248_v61 = vmax.f32 %v3246_v51, %v3247_v62 }
0x1429   : > { %v3234_v58 = vrot.slane %v3233_v59, 2 }
0x142a   : > { %v3249_v63 = vrot.slane %v3248_v61, 2 }
0x142b   : > { %v3235_v33 = vadd.f32 %v3234_v58, %v3233_v59 }
0x142c   : > { %v3250_v56 = vmax.f32 %v3248_v61, %v3249_v63 }
0x142d   : > { %v3236_v0 = vrot.slane %v3235_v33, 1 }
0x142e   : > { %v3251_v55 = vrot.slane %v3250_v56, 1 }
0x142f   : > { %v3237_v3 = vadd.f32 %v3236_v0, %v3235_v33 }
0x1430   : > { %v3252_v4 = vmax.f32 %v3250_v56, %v3251_v55 }
0x1431   : > { %v3238_v60 = vadd.f32 %v3237_v3, %v3196_v1 }
0x1432   : > { %v3253_v2 = vsub.f32 %v3244_v47, %v3252_v4 }
0x1433   : > { %v3296_v9 = vsel %vm3295_vm12, %v3238_v60, -inf  ;;  %v3243_v19 = vmax.f32 %v3238_v60, 0.0 }
0x1434   : > { %v3254_v57 = vmul.f32 1.442695, %v3253_v2  ;;  %3297 = vmax.xlane.f32.xlu1 %v3296_v9 }
0x1435   : > { %v3265_v20 = vperm.slane %v3243_v19, 0 }
0x1436   : > { %3888 = vpow2.f32 %v3254_v57 }
0x1437   : > { %3267 = vrot.lane.b32.xlu0 %v3265_v20, %s4039_s15  ;;  %s3366_s15 = sshll.u32 %s3362_s3, 4  ;;  %s3367_s15 = int_to_ptr.hbm [resolvable:$true] %s3366_s15 }
0x143c   : > { %v3889_v5 = vpop.eup %3888 }
0x143d   : > { %v3256_v18 = vsel %vm3245_vm11, %v3889_v5, 0.0 }
0x143e   : > { %v3257_v11 = vrot.slane %v3256_v18, 4 }
0x1440   : > { %v3258_v7 = vadd.f32 %v3257_v11, %v3256_v18 }
0x1442   : > { %v3259_v14 = vrot.slane %v3258_v7, 2 }
0x1444   : > { %v3260_v21 = vadd.f32 %v3259_v14, %v3258_v7 }
0x1446   : > { %v3261_v22 = vrot.slane %v3260_v21, 1 }
0x1448   : > { %v3262_v23 = vadd.f32 %v3261_v22, %v3260_v21 }
0x144a   : > { %3890 = vrcp.f32 %v3262_v23 }
0x1450   : > { %v3891_v24 = vpop.eup %3890 }
0x1451   : > { %v3264_v12 = vmul.f32 %v3891_v24, %v3889_v5 }
0x1453   : > { %3348 = vst.msk [vmem:[%s1024_s24] sm:$0xff] %vm3245_vm11, %v3264_v12  ;;  %s3350_s24 = scalar_lea.sflag [#allocation5], %s997_s4 }
0x14a7   : > { %v3298_v15 = vpop.xlane.xlu1 %3297 }
0x14a8   : > { %v3299_v13 = vsub.f32 %v3238_v60, %v3298_v15 }
0x14a9   : > { %v3268_v8 = vpop.permute.xlu0 %3267 }
0x14aa   : > { %v3300_v29 = vmul.f32 1.442695, %v3299_v13  ;;  %v3270_v10 = vmul.f32 %v3268_v8, %v3192_v28 }
0x14ac   : > { %3892 = vpow2.f32 %v3300_v29  ;;  %v3271_v17 = vsel %vm1139_vm3, %v3270_v10, 0.0  ;;  %vm3346_vm3 = vcmask 253952  }
0x14ad   : > { %3272 = vadd.xlane.f32.xlu0 %v3271_v17 }
0x14b2   : > { %v3893_v31 = vpop.eup %3892 }
0x14b3   : > { %3303 = vrot.lane.b32.xlu1 %v3893_v31, %s4040_s30 }
0x1520   : > { %v3273_v43 = vpop.xlane.xlu0 %3272 }
0x1521   : > { %v3274_v41 = vmul.f32 0.35355338, %v3273_v43 }
0x1523   : > { %v3275_v42 = vsel %vm3195_vm9, -1e+30, %v3274_v41 }
0x1524   : > { %v3276_v38 = vsel %vm3245_vm11, %v3275_v42, -inf }
0x1525   : > { %v3304_v37 = vpop.permute.xlu1 %3303  ;;  %v3277_v44 = vrot.slane %v3276_v38, 4 }
0x1526   : > { %v3307_v39 = vsel %vm3306_vm13, %v3304_v37, 0.0 }
0x1527   : > { %3308 = vadd.xlane.f32.xlu2 %v3307_v39  ;;  %v3278_v35 = vmax.f32 %v3276_v38, %v3277_v44 }
0x1529   : > { %v3279_v45 = vrot.slane %v3278_v35, 2 }
0x152b   : > { %v3280_v30 = vmax.f32 %v3278_v35, %v3279_v45 }
0x152d   : > { %v3281_v49 = vrot.slane %v3280_v30, 1 }
0x152f   : > { %v3282_v52 = vmax.f32 %v3280_v30, %v3281_v49 }
0x1531   : > { %v3283_v53 = vsub.f32 %v3275_v42, %v3282_v52 }
0x1533   : > { %v3284_v46 = vmul.f32 1.442695, %v3283_v53 }
0x159a   : > { %v3309_v32 = vpop.xlane.xlu2 %3308 }
0x159b   : > { %3894 = vrcp.f32 %v3309_v32 }
0x159c   : > { %3896 = vpow2.f32 %v3284_v46 }
0x15a1   : > { %v3895_v34 = vpop.eup %3894 }
0x15a2   : > { %v3311_v40 = vmul.f32 %v3895_v34, %v3893_v31  ;;  %v3897_v26 = vpop.eup %3896 }
0x15a3   : > { %v3286_v47 = vsel %vm3245_vm11, %v3897_v26, 0.0 }
0x15a4   : > { %v3312_v36 = vperm.slane %v3311_v40, 0  ;;  %v3287_v50 = vrot.slane %v3286_v47, 4 }
0x15a6   : > { %3314 = vrot.lane.b32.xlu1 %v3312_v36, %s4040_s30  ;;  %v3288_v51 = vadd.f32 %v3287_v50, %v3286_v47  ;;  %s3937_s30 = sshra.s32 %s3367_s15, 4  ;;  %s3938_s30 = int_to_ptr.hbm [resolvable:$true] %s3937_s30 }
0x15a7   : > { %p3944_p1 = scmp.lt.s32.totalorder %s3938_s30, %s4206_s27 }
0x15a8   : > { %v3289_v54 = vrot.slane %v3288_v51, 2 }
0x15aa   : > { %v3290_v62 = vadd.f32 %v3289_v54, %v3288_v51 }
0x15ac   : > { %v3291_v48 = vrot.slane %v3290_v62, 1 }
0x15ae   : > { %3318 = vrot.lane.b32.xlu1 %v3312_v36, %s4041_s21  ;;  %v3292_v59 = vadd.f32 %v3291_v48, %v3290_v62  ;;  %s3939_s21 = scalar_lea.hbm %s3938_s30, 1 }
0x15af   : > { %p3940_p12 = scmp.ne.s32.totalorder %s3938_s30, %s3939_s21  ;;  %p3945_p2 = scmp.lt.s32.totalorder %s3943_s5, %s3939_s21 }
0x15b0   : > { %3898 = vrcp.f32 %v3292_v59 }
0x15b1   : > { %p3941_p13 = pnand %p3940_p12, %p4253_p10  ;;  %p3946_p3 = por %p3945_p2, %p3944_p1 }
0x15b3   : > { %p3942_p0 = pneg %p3941_p13 }
0x15b5   : > { %p3947_p4 = pnand %p3946_p3, %p3942_p0 }
0x15b6   : > { %v3899_v58 = vpop.eup %3898 }
0x15b7   : > { %v3294_v63 = vmul.f32 %v3899_v58, %v3897_v26 }
0x1618   : > { %v3315_v61 = vpop.permute.xlu1 %3314 }
0x1619   : > { %v3317_v56 = vmul.f32 %v3315_v61, %v3294_v63 }
0x1620   : > { %v3319_v33 = vpop.permute.xlu1 %3318 }
0x1621   : > { %v3321_v0 = vmul.f32 %v3319_v33, %v3264_v12 }
0x1623   : > { %v3322_v1 = vadd.f32 %v3321_v0, %v3317_v56 }
0x1625   : > { %v3323_v55 = vsel %vm3245_vm11, %v3322_v1, 0.0 }
0x1626   : > { %v3324_v3 = vrot.slane %v3323_v55, 4 }
0x1628   : > { %v3325_v4 = vadd.f32 %v3324_v3, %v3323_v55 }
0x162a   : > { %v3326_v60 = vrot.slane %v3325_v4, 2 }
0x162c   : > { %v3327_v2 = vadd.f32 %v3326_v60, %v3325_v4 }
0x162e   : > { %v3328_v9 = vrot.slane %v3327_v2, 1 }
0x1630   : > { %v3329_v19 = vadd.f32 %v3328_v9, %v3327_v2 }
0x1632   : > { %v3330_v57 = vadd.f32 1e-05, %v3329_v19 }
0x1634   : > { %3900 = vrcp.f32 %v3330_v57 }
0x163a   : > { %v3901_v20 = vpop.eup %3900 }
0x163b   : > { %v3332_v5 = vmul.f32 %v3901_v20, %v3322_v1 }
0x163d   : > { %3335 = vperm.xlu1 %3817, %v3332_v5  }
0x16af   : > { %v3336_v18 = vpop.permute.xlu1 %3335 }
0x16b0   : > { %v3338_v11 = vmul.f32 %v3336_v18, %v4763_v16 }
0x16b2   : > { %v3339_v7 = vsel %vm1101_vm2, %v3338_v11, 0.0 }
0x16b3   : > { %v3340_v14 = vrot.slane %v3339_v7, 4 }
0x16b5   : > { %v3341_v21 = vadd.f32 %v3340_v14, %v3339_v7 }
0x16b7   : > { %v3342_v22 = vrot.slane %v3341_v21, 2 }
0x16b9   : > { %v3343_v23 = vadd.f32 %v3342_v22, %v3341_v21 }
0x16bb   : > { %v3344_v24 = vrot.slane %v3343_v23, 1 }
0x16bd   : > { %v3345_v12 = vadd.f32 %v3344_v24, %v3343_v23 }
0x16bf   : > { %3347 = vst.msk [vmem:[%s998_s26] sm:$0x1] %vm3346_vm3, %v3345_v12 }
0x16c0   : > { %3950 = shalt.err (!%p3947_p4)
}
0x16c1   : > { %3723 = dma.vmem_to_hbm [thread:$0]  (%p4253_p10), %s3365_s18, 16, %s3367_s15, %s3350_s24  }
0x16c2 PF: > { %p3729_p5 = scmp.ge.s32.totalorder %s3987_s7, 2  ;;  %s3381_s3 = sand.u32 1, %s3975_s1  }
0x16c3   : > { %s3382_s26 = scalar_lea.sflag [#allocation5], %s3381_s3 }
0x16c4   : > { %p3726_p6 = pnand %p3729_p5, %p4257_p11 }
0x16c6   : > { %p3727_p7 = pneg %p3726_p6 }
0x16c8   : > { %3970 = dma.done.wait (%p3727_p7), %s3382_s26, 16  }
0x16c9   : > { %3972 = vsyncadd (%p3727_p7), %s3382_s26, 4294967280  ;;  %s4924_s7 = sld [smem:[#allocation33_spill]]  ;;  %s4927_s1 = smov %s3979_s0 }
0x16ca   : > { %s4925_s30 = sld [smem:[#allocation32_spill]] }
0x16cb   : > { %s4926_s4 = sld [smem:[#allocation34_spill]] }
0x16cf   : > { %p84_p8 = scmp.ge.s32.totalorder %s4924_s7, 4  }
0x16d0   : > { %s4928_s0 = smov %s4925_s30 }
0x16d1   :  { %86 = sbr.rel (!%p84_p8) target bundleno = 72 (0x48), region = 246 }
0x16d6   :  { %3394 = vsyncpa [#allocation5], 1 }
0x16d7   :  { %3396 = vsyncpa [#allocation5 + $0x1], 1 }

</bundles_post_ra>
